<compile_context>
chip_gen: v7x
topology: tpu7x:2x2x1
jax: 0.10.0
libtpu: 0.0.40
codegen_flags: <defaults>
</compile_context>

<pallas_src>
import jax
import jax.numpy as jnp
from jax.experimental import pallas as pl
from jax.experimental.pallas import tpu as pltpu


def _attention_kernel(q_ref, wq_ref, aw_ref, awcum_ref, w2t_ref, pmem_t_ref,
                      v_ref, len_ref, mem_ref,
                      ctx_ref, w_out_ref, cum_out_ref):
    Bb, T = aw_ref.shape
    A, S = w2t_ref.shape            # S = 2*K folded conv taps (both channels)
    K = S // 2
    P = (K - 1) // 2

    # ---- query_layer: (Bb, D_rnn) @ (D_rnn, A) -> (Bb, A)                  [MXU, bf16 in]
    pq = jnp.dot(q_ref[...].astype(jnp.bfloat16), wq_ref[...],
                 preferred_element_type=jnp.float32)

    # ---- location conv + location dense fused, in the (Bb, A, T) layout.
    # im2col via masked lane rolls (XLU); stacking on axis=1 puts the 2K taps on SUBLANES so
    # the rolled (Bb, T) vregs keep T on lanes (no lane<->sublane transposes of the taps).
    aw = aw_ref[...]
    cum = awcum_ref[...]
    t_idx = jax.lax.broadcasted_iota(jnp.int32, (Bb, T), 1)
    keeps = [(t_idx >= (P - k)) & (t_idx < (T + P - k)) for k in range(K)]   # 'same' zero pad
    cols = []
    for src in (aw, cum):                     # channel order matches torch cat((aw, aw_cum))
        for k in range(K):                    # static unroll over the small kernel width
            shift = (P - k) % T
            rolled = pltpu.roll(src, shift=shift, axis=1) if shift else src
            cols.append(jnp.where(keeps[k], rolled, 0.0))
    x_im2col = jnp.stack(cols, axis=1).astype(jnp.bfloat16)     # (Bb, 2K, T), taps on sublanes

    # ploc_t[b] = W2T (A, 2K) @ x_im2col[b] (2K, T): per-b MXU matmul, static unroll over Bb.
    w2t = w2t_ref[...]                                          # (A, 2K) bf16
    ploc_t = jnp.stack(
        [jnp.dot(w2t, x_im2col[b], preferred_element_type=jnp.float32) for b in range(Bb)],
        axis=0)                                                 # (Bb, A, T) f32

    # ---- energies = v . tanh(processed_query + processed_attention + processed_memory)
    # pmem_t is bf16; the upcast is inlined into the add (no standalone f32 temp tensor).
    e = jnp.tanh(pq[:, :, None] + ploc_t + pmem_t_ref[...].astype(jnp.float32))  # (Bb, A, T)
    # weighted reduce over A (sublanes): VPU vreg tree + a few XLU steps; T stays on lanes.
    energies = jnp.sum(e * v_ref[...][None, :, :], axis=1)      # (Bb, T)

    # ---- padding mask built in-kernel from lengths (no (B,T) mask DMA) + softmax over T.
    valid = t_idx < len_ref[...]                                # (Bb, 1) -> (Bb, T)
    energies = jnp.where(valid, energies, -1e30)                # finite sentinel: no NaN rows
    m = jnp.max(energies, axis=-1, keepdims=True)
    p = jnp.exp(energies - m)
    denom = jnp.sum(p, axis=-1, keepdims=True)
    weights = p / denom             # exact divide: no drift accumulates into the cum weights

    # ---- attention_context = weights @ memory : per-b (1,T)@(T,E) on the MXU, bf16 in / f32 acc
    ctx3 = jnp.einsum('bqt,bte->bqe',
                      weights[:, None, :].astype(jnp.bfloat16), mem_ref[...],
                      preferred_element_type=jnp.float32)       # (Bb, 1, E)

    ctx_ref[...] = ctx3[:, 0, :]
    w_out_ref[...] = weights
    cum_out_ref[...] = awcum_ref[...] + weights


def attention_forward(query, memory, processed_memory, lengths,
                      attention_weights, attention_weights_cum, params,
                      *, block_b=8):
    """One decoder step. Returns (attention_context, new_weights, new_weights_cum)."""
    Wq, conv_w, Wloc, v = params['Wq'], params['conv_w'], params['Wloc'], params['v']
    B, T, E = memory.shape
    D_rnn = query.shape[1]
    A = Wq.shape[1]
    K = conv_w.shape[2]
    S = 2 * K

    # Fold location_conv + location_dense into one (A, 2K) matrix (identical linear map),
    # transposed so ploc comes out directly in the (Bb, A, T) layout. bf16 MXU operand.
    w2t = jnp.einsum('fck,fa->ack', conv_w, Wloc).reshape(A, S).astype(jnp.bfloat16)
    wq_bf16 = Wq.astype(jnp.bfloat16)
    v_col = v.reshape(A, 1)                                     # A lands on sublanes in-kernel

    Bb = block_b
    Bp = -(-B // Bb) * Bb                    # pad batch up to a multiple of the block

    def pad_b(x):
        if x.shape[0] == Bp:
            return x
        return jnp.pad(x, [(0, Bp - x.shape[0])] + [(0, 0)] * (x.ndim - 1))

    q_p = pad_b(query)
    aw_p = pad_b(attention_weights)
    cum_p = pad_b(attention_weights_cum)
    len_p = pad_b(lengths.astype(jnp.int32).reshape(B, 1))      # padded rows -> length 0
    # processed_memory is constant across decoder steps: transpose to (B, A, T) + bf16 once.
    pmem_t_p = pad_b(jnp.swapaxes(processed_memory, 1, 2)).astype(jnp.bfloat16)
    mem_p = pad_b(memory).astype(jnp.bfloat16)                  # bf16 streaming halves HBM bytes

    nb = Bp // Bb
    in_specs = [
        pl.BlockSpec((Bb, D_rnn), lambda i: (i, 0)),            # query
        pl.BlockSpec((D_rnn, A), lambda i: (0, 0)),             # query_layer weight (bf16)
        pl.BlockSpec((Bb, T), lambda i: (i, 0)),                # attention_weights (prev)
        pl.BlockSpec((Bb, T), lambda i: (i, 0)),                # attention_weights_cum
        pl.BlockSpec((A, S), lambda i: (0, 0)),                 # folded conv+dense (A,2K) bf16
        pl.BlockSpec((Bb, A, T), lambda i: (i, 0, 0)),          # processed_memory^T (bf16)
        pl.BlockSpec((A, 1), lambda i: (0, 0)),                 # v column
        pl.BlockSpec((Bb, 1), lambda i: (i, 0)),                # lengths
        pl.BlockSpec((Bb, T, E), lambda i: (i, 0, 0)),          # memory (bf16)
    ]
    out_specs = (
        pl.BlockSpec((Bb, E), lambda i: (i, 0)),
        pl.BlockSpec((Bb, T), lambda i: (i, 0)),
        pl.BlockSpec((Bb, T), lambda i: (i, 0)),
    )
    out_shape = (jax.ShapeDtypeStruct((Bp, E), jnp.float32),
                 jax.ShapeDtypeStruct((Bp, T), jnp.float32),
                 jax.ShapeDtypeStruct((Bp, T), jnp.float32))

    fn = pl.pallas_call(
        _attention_kernel,
        grid=(nb,),
        in_specs=in_specs,
        out_specs=out_specs,
        out_shape=out_shape,
        compiler_params=pltpu.CompilerParams(
            dimension_semantics=("parallel",),   # batch blocks shard across TCs on v7x
            vmem_limit_bytes=32 * 1024 * 1024,   # ~3 MiB live per block; generous headroom
        ),
    )
    ctx, w_new, cum_new = fn(q_p, wq_bf16, aw_p, cum_p, w2t, pmem_t_p, v_col, len_p, mem_p)
    return ctx[:B], w_new[:B], cum_new[:B]


if __name__ == "__main__":
    # Small but lane-dense shapes (T, A, E multiples of 128). B = 4 blocks of 8 so the grid
    # has 4 steps -> >=2 steps per TensorCore even when v7x splits the grid across its cores.
    B, T = 32, 128
    attention_rnn_dim = 64
    embedding_dim = 128
    attention_dim = 128
    n_filters = 32
    kernel_size = 15
    P = (kernel_size - 1) // 2

    key = jax.random.PRNGKey(0)
    ks = jax.random.split(key, 9)

    # deterministic synthetic parameters (shapes per module __init__)
    Wq = 0.1 * jax.random.normal(ks[0], (attention_rnn_dim, attention_dim), jnp.float32)
    Wm = 0.1 * jax.random.normal(ks[1], (embedding_dim, attention_dim), jnp.float32)
    conv_w = 0.1 * jax.random.normal(ks[2], (n_filters, 2, kernel_size), jnp.float32)
    Wloc = 0.1 * jax.random.normal(ks[3], (n_filters, attention_dim), jnp.float32)
    v = 0.1 * jax.random.normal(ks[4], (1, attention_dim), jnp.float32)

    # inputs
    query = jax.random.normal(ks[5], (B, attention_rnn_dim), jnp.float32)
    memory = jax.random.normal(ks[6], (B, T, embedding_dim), jnp.float32)
    processed_memory = memory @ Wm   # memory_layer / preprocess_inputs (glue, outside forward)

    attention_weights = jax.nn.softmax(
        jax.random.normal(ks[7], (B, T), jnp.float32), axis=1)
    attention_weights_cum = attention_weights + jax.nn.softmax(
        jax.random.normal(ks[8], (B, T), jnp.float32), axis=1)

    lengths = jnp.array([T - (11 * i) % (T // 2) for i in range(B)], dtype=jnp.int32)

    params = dict(Wq=Wq, conv_w=conv_w, Wloc=Wloc, v=v)
    ctx, new_w, new_cum = attention_forward(
        query, memory, processed_memory, lengths,
        attention_weights, attention_weights_cum, params)
    jax.block_until_ready((ctx, new_w, new_cum))

    # ---- pure-JAX reference.
    # Precision contract: the reference uses the same bf16-quantized memory / processed_memory
    # the kernel streams, but keeps all weights and matmuls in f32; the kernel additionally
    # runs its MXU matmuls with bf16 operands (f32 accumulation), covered by the 1e-2 budget.
    mem_q = memory.astype(jnp.bfloat16).astype(jnp.float32)
    pmem_q = processed_memory.astype(jnp.bfloat16).astype(jnp.float32)
    mask_bool = jnp.arange(T)[None, :] >= lengths[:, None]      # True == padded

    pq_r = jnp.dot(query, Wq, precision='highest')
    awc_r = jnp.stack([attention_weights, attention_weights_cum], axis=1)    # (B, 2, T)
    loc_r = jax.lax.conv_general_dilated(
        awc_r, conv_w, window_strides=(1,), padding=[(P, P)],
        dimension_numbers=('NCH', 'OIH', 'NCH'),
        precision='highest')                                                 # (B, F, T)
    ploc_r = jnp.einsum('bft,fa->bta', loc_r, Wloc, precision='highest')
    e_r = jnp.tanh(pq_r[:, None, :] + ploc_r + pmem_q)
    en_r = jnp.sum(e_r * v[0], axis=-1)
    en_r = jnp.where(mask_bool, -jnp.inf, en_r)
    w_r = jax.nn.softmax(en_r, axis=1)
    ctx_r = jnp.einsum('bt,bte->be', w_r, mem_q, precision='highest')
    cum_r = attention_weights_cum + w_r

    assert jnp.allclose(ctx, ctx_r, atol=1e-2, rtol=1e-2), "context mismatch"
    assert jnp.allclose(new_w, w_r, atol=1e-2, rtol=1e-2), "weights mismatch"
    assert jnp.allclose(new_cum, cum_r, atol=1e-2, rtol=1e-2), "cum weights mismatch"
    assert jnp.allclose(jnp.sum(new_w, axis=1), 1.0, atol=2e-3), "softmax not normalized"

    print("KERNEL_OK")
</pallas_src>

<mosaic_0001>
module attributes {stable_mosaic.version = 11 : i64} {
  func.func @_attention_kernel(%arg0: i32, %arg1: memref<8x64xf32, #tpu.memory_space<vmem>>, %arg2: memref<64x128xbf16, #tpu.memory_space<vmem>>, %arg3: memref<8x128xf32, #tpu.memory_space<vmem>>, %arg4: memref<8x128xf32, #tpu.memory_space<vmem>>, %arg5: memref<128x30xbf16, #tpu.memory_space<vmem>>, %arg6: memref<8x128x128xbf16, #tpu.memory_space<vmem>>, %arg7: memref<128x1xf32, #tpu.memory_space<vmem>>, %arg8: memref<8x1xi32, #tpu.memory_space<vmem>>, %arg9: memref<8x128x128xbf16, #tpu.memory_space<vmem>>, %arg10: memref<8x128xf32, #tpu.memory_space<vmem>>, %arg11: memref<8x128xf32, #tpu.memory_space<vmem>>, %arg12: memref<8x128xf32, #tpu.memory_space<vmem>>) attributes {dimension_semantics = [#tpu.dimension_semantics<parallel>], iteration_bounds = array<i64: 4>, scalar_prefetch = 0 : i64, scratch_operands = 0 : i64, tpu.core_type = #tpu.core_type<tc>, window_params = [{transform_indices = @transform_0, window_bounds = array<i64: 8, 64>}, {pipeline_mode = #tpu.pipeline_mode<synchronous>, transform_indices = @transform_1, window_bounds = array<i64: 64, 128>}, {transform_indices = @transform_2, window_bounds = array<i64: 8, 128>}, {transform_indices = @transform_3, window_bounds = array<i64: 8, 128>}, {pipeline_mode = #tpu.pipeline_mode<synchronous>, transform_indices = @transform_4, window_bounds = array<i64: 128, 30>}, {transform_indices = @transform_5, window_bounds = array<i64: 8, 128, 128>}, {pipeline_mode = #tpu.pipeline_mode<synchronous>, transform_indices = @transform_6, window_bounds = array<i64: 128, 1>}, {transform_indices = @transform_7, window_bounds = array<i64: 8, 1>}, {transform_indices = @transform_8, window_bounds = array<i64: 8, 128, 128>}, {transform_indices = @transform_9, window_bounds = array<i64: 8, 128>}, {transform_indices = @transform_10, window_bounds = array<i64: 8, 128>}, {transform_indices = @transform_11, window_bounds = array<i64: 8, 128>}]} {
    %c0 = arith.constant 0 : index
    %c0_0 = arith.constant 0 : index
    %0 = vector.load %arg1[%c0, %c0_0] : memref<8x64xf32, #tpu.memory_space<vmem>>, vector<8x64xf32>
    %1 = arith.truncf %0 : vector<8x64xf32> to vector<8x64xbf16>
    %c0_1 = arith.constant 0 : index
    %c0_2 = arith.constant 0 : index
    %2 = vector.load %arg2[%c0_1, %c0_2] : memref<64x128xbf16, #tpu.memory_space<vmem>>, vector<64x128xbf16>
    %cst = arith.constant dense<0.000000e+00> : vector<8x128xf32>
    %3 = tpu.matmul %1, %2, %cst {dimension_numbers = #tpu.dot_dimension_numbers<[1], [0], [0], [1], [0, 0, 1, 1], [], []>} : vector<8x64xbf16>, vector<64x128xbf16>, vector<8x128xf32> -> vector<8x128xf32>
    %c0_3 = arith.constant 0 : index
    %c0_4 = arith.constant 0 : index
    %4 = vector.load %arg3[%c0_3, %c0_4] : memref<8x128xf32, #tpu.memory_space<vmem>>, vector<8x128xf32>
    %c0_5 = arith.constant 0 : index
    %c0_6 = arith.constant 0 : index
    %5 = vector.load %arg4[%c0_5, %c0_6] : memref<8x128xf32, #tpu.memory_space<vmem>>, vector<8x128xf32>
    %6 = tpu.iota {dimensions = array<i32: 1>} : vector<8x128xi32>
    %c7_i32 = arith.constant 7 : i32
    %7 = vector.broadcast %c7_i32 : i32 to vector<8x128xi32>
    %8 = arith.cmpi sge, %6, %7 : vector<8x128xi32>
    %c135_i32 = arith.constant 135 : i32
    %9 = vector.broadcast %c135_i32 : i32 to vector<8x128xi32>
    %10 = arith.cmpi slt, %6, %9 : vector<8x128xi32>
    %11 = arith.andi %8, %10 : vector<8x128xi1>
    %c6_i32 = arith.constant 6 : i32
    %12 = vector.broadcast %c6_i32 : i32 to vector<8x128xi32>
    %13 = arith.cmpi sge, %6, %12 : vector<8x128xi32>
    %c134_i32 = arith.constant 134 : i32
    %14 = vector.broadcast %c134_i32 : i32 to vector<8x128xi32>
    %15 = arith.cmpi slt, %6, %14 : vector<8x128xi32>
    %16 = arith.andi %13, %15 : vector<8x128xi1>
    %c5_i32 = arith.constant 5 : i32
    %17 = vector.broadcast %c5_i32 : i32 to vector<8x128xi32>
    %18 = arith.cmpi sge, %6, %17 : vector<8x128xi32>
    %c133_i32 = arith.constant 133 : i32
    %19 = vector.broadcast %c133_i32 : i32 to vector<8x128xi32>
    %20 = arith.cmpi slt, %6, %19 : vector<8x128xi32>
    %21 = arith.andi %18, %20 : vector<8x128xi1>
    %c4_i32 = arith.constant 4 : i32
    %22 = vector.broadcast %c4_i32 : i32 to vector<8x128xi32>
    %23 = arith.cmpi sge, %6, %22 : vector<8x128xi32>
    %c132_i32 = arith.constant 132 : i32
    %24 = vector.broadcast %c132_i32 : i32 to vector<8x128xi32>
    %25 = arith.cmpi slt, %6, %24 : vector<8x128xi32>
    %26 = arith.andi %23, %25 : vector<8x128xi1>
    %c3_i32 = arith.constant 3 : i32
    %27 = vector.broadcast %c3_i32 : i32 to vector<8x128xi32>
    %28 = arith.cmpi sge, %6, %27 : vector<8x128xi32>
    %c131_i32 = arith.constant 131 : i32
    %29 = vector.broadcast %c131_i32 : i32 to vector<8x128xi32>
    %30 = arith.cmpi slt, %6, %29 : vector<8x128xi32>
    %31 = arith.andi %28, %30 : vector<8x128xi1>
    %c2_i32 = arith.constant 2 : i32
    %32 = vector.broadcast %c2_i32 : i32 to vector<8x128xi32>
    %33 = arith.cmpi sge, %6, %32 : vector<8x128xi32>
    %c130_i32 = arith.constant 130 : i32
    %34 = vector.broadcast %c130_i32 : i32 to vector<8x128xi32>
    %35 = arith.cmpi slt, %6, %34 : vector<8x128xi32>
    %36 = arith.andi %33, %35 : vector<8x128xi1>
    %c1_i32 = arith.constant 1 : i32
    %37 = vector.broadcast %c1_i32 : i32 to vector<8x128xi32>
    %38 = arith.cmpi sge, %6, %37 : vector<8x128xi32>
    %c129_i32 = arith.constant 129 : i32
    %39 = vector.broadcast %c129_i32 : i32 to vector<8x128xi32>
    %40 = arith.cmpi slt, %6, %39 : vector<8x128xi32>
    %41 = arith.andi %38, %40 : vector<8x128xi1>
    %c0_i32 = arith.constant 0 : i32
    %42 = vector.broadcast %c0_i32 : i32 to vector<8x128xi32>
    %43 = arith.cmpi sge, %6, %42 : vector<8x128xi32>
    %c128_i32 = arith.constant 128 : i32
    %44 = vector.broadcast %c128_i32 : i32 to vector<8x128xi32>
    %45 = arith.cmpi slt, %6, %44 : vector<8x128xi32>
    %46 = arith.andi %43, %45 : vector<8x128xi1>
    %c-1_i32 = arith.constant -1 : i32
    %47 = vector.broadcast %c-1_i32 : i32 to vector<8x128xi32>
    %48 = arith.cmpi sge, %6, %47 : vector<8x128xi32>
    %c127_i32 = arith.constant 127 : i32
    %49 = vector.broadcast %c127_i32 : i32 to vector<8x128xi32>
    %50 = arith.cmpi slt, %6, %49 : vector<8x128xi32>
    %51 = arith.andi %48, %50 : vector<8x128xi1>
    %c-2_i32 = arith.constant -2 : i32
    %52 = vector.broadcast %c-2_i32 : i32 to vector<8x128xi32>
    %53 = arith.cmpi sge, %6, %52 : vector<8x128xi32>
    %c126_i32 = arith.constant 126 : i32
    %54 = vector.broadcast %c126_i32 : i32 to vector<8x128xi32>
    %55 = arith.cmpi slt, %6, %54 : vector<8x128xi32>
    %56 = arith.andi %53, %55 : vector<8x128xi1>
    %c-3_i32 = arith.constant -3 : i32
    %57 = vector.broadcast %c-3_i32 : i32 to vector<8x128xi32>
    %58 = arith.cmpi sge, %6, %57 : vector<8x128xi32>
    %c125_i32 = arith.constant 125 : i32
    %59 = vector.broadcast %c125_i32 : i32 to vector<8x128xi32>
    %60 = arith.cmpi slt, %6, %59 : vector<8x128xi32>
    %61 = arith.andi %58, %60 : vector<8x128xi1>
    %c-4_i32 = arith.constant -4 : i32
    %62 = vector.broadcast %c-4_i32 : i32 to vector<8x128xi32>
    %63 = arith.cmpi sge, %6, %62 : vector<8x128xi32>
    %c124_i32 = arith.constant 124 : i32
    %64 = vector.broadcast %c124_i32 : i32 to vector<8x128xi32>
    %65 = arith.cmpi slt, %6, %64 : vector<8x128xi32>
    %66 = arith.andi %63, %65 : vector<8x128xi1>
    %c-5_i32 = arith.constant -5 : i32
    %67 = vector.broadcast %c-5_i32 : i32 to vector<8x128xi32>
    %68 = arith.cmpi sge, %6, %67 : vector<8x128xi32>
    %c123_i32 = arith.constant 123 : i32
    %69 = vector.broadcast %c123_i32 : i32 to vector<8x128xi32>
    %70 = arith.cmpi slt, %6, %69 : vector<8x128xi32>
    %71 = arith.andi %68, %70 : vector<8x128xi1>
    %c-6_i32 = arith.constant -6 : i32
    %72 = vector.broadcast %c-6_i32 : i32 to vector<8x128xi32>
    %73 = arith.cmpi sge, %6, %72 : vector<8x128xi32>
    %c122_i32 = arith.constant 122 : i32
    %74 = vector.broadcast %c122_i32 : i32 to vector<8x128xi32>
    %75 = arith.cmpi slt, %6, %74 : vector<8x128xi32>
    %76 = arith.andi %73, %75 : vector<8x128xi1>
    %c-7_i32 = arith.constant -7 : i32
    %77 = vector.broadcast %c-7_i32 : i32 to vector<8x128xi32>
    %78 = arith.cmpi sge, %6, %77 : vector<8x128xi32>
    %c121_i32 = arith.constant 121 : i32
    %79 = vector.broadcast %c121_i32 : i32 to vector<8x128xi32>
    %80 = arith.cmpi slt, %6, %79 : vector<8x128xi32>
    %81 = arith.andi %78, %80 : vector<8x128xi1>
    %c7_i32_7 = arith.constant 7 : i32
    %82 = tpu.dynamic_rotate %4 by %c7_i32_7 dim 1 : vector<8x128xf32>, i32 -> vector<8x128xf32>
    %cst_8 = arith.constant 0.000000e+00 : f32
    %83 = vector.broadcast %cst_8 : f32 to vector<8x128xf32>
    %84 = arith.select %11, %82, %83 : vector<8x128xi1>, vector<8x128xf32>
    %c6_i32_9 = arith.constant 6 : i32
    %85 = tpu.dynamic_rotate %4 by %c6_i32_9 dim 1 : vector<8x128xf32>, i32 -> vector<8x128xf32>
    %cst_10 = arith.constant 0.000000e+00 : f32
    %86 = vector.broadcast %cst_10 : f32 to vector<8x128xf32>
    %87 = arith.select %16, %85, %86 : vector<8x128xi1>, vector<8x128xf32>
    %c5_i32_11 = arith.constant 5 : i32
    %88 = tpu.dynamic_rotate %4 by %c5_i32_11 dim 1 : vector<8x128xf32>, i32 -> vector<8x128xf32>
    %cst_12 = arith.constant 0.000000e+00 : f32
    %89 = vector.broadcast %cst_12 : f32 to vector<8x128xf32>
    %90 = arith.select %21, %88, %89 : vector<8x128xi1>, vector<8x128xf32>
    %c4_i32_13 = arith.constant 4 : i32
    %91 = tpu.dynamic_rotate %4 by %c4_i32_13 dim 1 : vector<8x128xf32>, i32 -> vector<8x128xf32>
    %cst_14 = arith.constant 0.000000e+00 : f32
    %92 = vector.broadcast %cst_14 : f32 to vector<8x128xf32>
    %93 = arith.select %26, %91, %92 : vector<8x128xi1>, vector<8x128xf32>
    %c3_i32_15 = arith.constant 3 : i32
    %94 = tpu.dynamic_rotate %4 by %c3_i32_15 dim 1 : vector<8x128xf32>, i32 -> vector<8x128xf32>
    %cst_16 = arith.constant 0.000000e+00 : f32
    %95 = vector.broadcast %cst_16 : f32 to vector<8x128xf32>
    %96 = arith.select %31, %94, %95 : vector<8x128xi1>, vector<8x128xf32>
    %c2_i32_17 = arith.constant 2 : i32
    %97 = tpu.dynamic_rotate %4 by %c2_i32_17 dim 1 : vector<8x128xf32>, i32 -> vector<8x128xf32>
    %cst_18 = arith.constant 0.000000e+00 : f32
    %98 = vector.broadcast %cst_18 : f32 to vector<8x128xf32>
    %99 = arith.select %36, %97, %98 : vector<8x128xi1>, vector<8x128xf32>
    %c1_i32_19 = arith.constant 1 : i32
    %100 = tpu.dynamic_rotate %4 by %c1_i32_19 dim 1 : vector<8x128xf32>, i32 -> vector<8x128xf32>
    %cst_20 = arith.constant 0.000000e+00 : f32
    %101 = vector.broadcast %cst_20 : f32 to vector<8x128xf32>
    %102 = arith.select %41, %100, %101 : vector<8x128xi1>, vector<8x128xf32>
    %cst_21 = arith.constant 0.000000e+00 : f32
    %103 = vector.broadcast %cst_21 : f32 to vector<8x128xf32>
    %104 = arith.select %46, %4, %103 : vector<8x128xi1>, vector<8x128xf32>
    %c127_i32_22 = arith.constant 127 : i32
    %105 = tpu.dynamic_rotate %4 by %c127_i32_22 dim 1 : vector<8x128xf32>, i32 -> vector<8x128xf32>
    %cst_23 = arith.constant 0.000000e+00 : f32
    %106 = vector.broadcast %cst_23 : f32 to vector<8x128xf32>
    %107 = arith.select %51, %105, %106 : vector<8x128xi1>, vector<8x128xf32>
    %c126_i32_24 = arith.constant 126 : i32
    %108 = tpu.dynamic_rotate %4 by %c126_i32_24 dim 1 : vector<8x128xf32>, i32 -> vector<8x128xf32>
    %cst_25 = arith.constant 0.000000e+00 : f32
    %109 = vector.broadcast %cst_25 : f32 to vector<8x128xf32>
    %110 = arith.select %56, %108, %109 : vector<8x128xi1>, vector<8x128xf32>
    %c125_i32_26 = arith.constant 125 : i32
    %111 = tpu.dynamic_rotate %4 by %c125_i32_26 dim 1 : vector<8x128xf32>, i32 -> vector<8x128xf32>
    %cst_27 = arith.constant 0.000000e+00 : f32
    %112 = vector.broadcast %cst_27 : f32 to vector<8x128xf32>
    %113 = arith.select %61, %111, %112 : vector<8x128xi1>, vector<8x128xf32>
    %c124_i32_28 = arith.constant 124 : i32
    %114 = tpu.dynamic_rotate %4 by %c124_i32_28 dim 1 : vector<8x128xf32>, i32 -> vector<8x128xf32>
    %cst_29 = arith.constant 0.000000e+00 : f32
    %115 = vector.broadcast %cst_29 : f32 to vector<8x128xf32>
    %116 = arith.select %66, %114, %115 : vector<8x128xi1>, vector<8x128xf32>
    %c123_i32_30 = arith.constant 123 : i32
    %117 = tpu.dynamic_rotate %4 by %c123_i32_30 dim 1 : vector<8x128xf32>, i32 -> vector<8x128xf32>
    %cst_31 = arith.constant 0.000000e+00 : f32
    %118 = vector.broadcast %cst_31 : f32 to vector<8x128xf32>
    %119 = arith.select %71, %117, %118 : vector<8x128xi1>, vector<8x128xf32>
    %c122_i32_32 = arith.constant 122 : i32
    %120 = tpu.dynamic_rotate %4 by %c122_i32_32 dim 1 : vector<8x128xf32>, i32 -> vector<8x128xf32>
    %cst_33 = arith.constant 0.000000e+00 : f32
    %121 = vector.broadcast %cst_33 : f32 to vector<8x128xf32>
    %122 = arith.select %76, %120, %121 : vector<8x128xi1>, vector<8x128xf32>
    %c121_i32_34 = arith.constant 121 : i32
    %123 = tpu.dynamic_rotate %4 by %c121_i32_34 dim 1 : vector<8x128xf32>, i32 -> vector<8x128xf32>
    %cst_35 = arith.constant 0.000000e+00 : f32
    %124 = vector.broadcast %cst_35 : f32 to vector<8x128xf32>
    %125 = arith.select %81, %123, %124 : vector<8x128xi1>, vector<8x128xf32>
    %c7_i32_36 = arith.constant 7 : i32
    %126 = tpu.dynamic_rotate %5 by %c7_i32_36 dim 1 : vector<8x128xf32>, i32 -> vector<8x128xf32>
    %cst_37 = arith.constant 0.000000e+00 : f32
    %127 = vector.broadcast %cst_37 : f32 to vector<8x128xf32>
    %128 = arith.select %11, %126, %127 : vector<8x128xi1>, vector<8x128xf32>
    %c6_i32_38 = arith.constant 6 : i32
    %129 = tpu.dynamic_rotate %5 by %c6_i32_38 dim 1 : vector<8x128xf32>, i32 -> vector<8x128xf32>
    %cst_39 = arith.constant 0.000000e+00 : f32
    %130 = vector.broadcast %cst_39 : f32 to vector<8x128xf32>
    %131 = arith.select %16, %129, %130 : vector<8x128xi1>, vector<8x128xf32>
    %c5_i32_40 = arith.constant 5 : i32
    %132 = tpu.dynamic_rotate %5 by %c5_i32_40 dim 1 : vector<8x128xf32>, i32 -> vector<8x128xf32>
    %cst_41 = arith.constant 0.000000e+00 : f32
    %133 = vector.broadcast %cst_41 : f32 to vector<8x128xf32>
    %134 = arith.select %21, %132, %133 : vector<8x128xi1>, vector<8x128xf32>
    %c4_i32_42 = arith.constant 4 : i32
    %135 = tpu.dynamic_rotate %5 by %c4_i32_42 dim 1 : vector<8x128xf32>, i32 -> vector<8x128xf32>
    %cst_43 = arith.constant 0.000000e+00 : f32
    %136 = vector.broadcast %cst_43 : f32 to vector<8x128xf32>
    %137 = arith.select %26, %135, %136 : vector<8x128xi1>, vector<8x128xf32>
    %c3_i32_44 = arith.constant 3 : i32
    %138 = tpu.dynamic_rotate %5 by %c3_i32_44 dim 1 : vector<8x128xf32>, i32 -> vector<8x128xf32>
    %cst_45 = arith.constant 0.000000e+00 : f32
    %139 = vector.broadcast %cst_45 : f32 to vector<8x128xf32>
    %140 = arith.select %31, %138, %139 : vector<8x128xi1>, vector<8x128xf32>
    %c2_i32_46 = arith.constant 2 : i32
    %141 = tpu.dynamic_rotate %5 by %c2_i32_46 dim 1 : vector<8x128xf32>, i32 -> vector<8x128xf32>
    %cst_47 = arith.constant 0.000000e+00 : f32
    %142 = vector.broadcast %cst_47 : f32 to vector<8x128xf32>
    %143 = arith.select %36, %141, %142 : vector<8x128xi1>, vector<8x128xf32>
    %c1_i32_48 = arith.constant 1 : i32
    %144 = tpu.dynamic_rotate %5 by %c1_i32_48 dim 1 : vector<8x128xf32>, i32 -> vector<8x128xf32>
    %cst_49 = arith.constant 0.000000e+00 : f32
    %145 = vector.broadcast %cst_49 : f32 to vector<8x128xf32>
    %146 = arith.select %41, %144, %145 : vector<8x128xi1>, vector<8x128xf32>
    %cst_50 = arith.constant 0.000000e+00 : f32
    %147 = vector.broadcast %cst_50 : f32 to vector<8x128xf32>
    %148 = arith.select %46, %5, %147 : vector<8x128xi1>, vector<8x128xf32>
    %c127_i32_51 = arith.constant 127 : i32
    %149 = tpu.dynamic_rotate %5 by %c127_i32_51 dim 1 : vector<8x128xf32>, i32 -> vector<8x128xf32>
    %cst_52 = arith.constant 0.000000e+00 : f32
    %150 = vector.broadcast %cst_52 : f32 to vector<8x128xf32>
    %151 = arith.select %51, %149, %150 : vector<8x128xi1>, vector<8x128xf32>
    %c126_i32_53 = arith.constant 126 : i32
    %152 = tpu.dynamic_rotate %5 by %c126_i32_53 dim 1 : vector<8x128xf32>, i32 -> vector<8x128xf32>
    %cst_54 = arith.constant 0.000000e+00 : f32
    %153 = vector.broadcast %cst_54 : f32 to vector<8x128xf32>
    %154 = arith.select %56, %152, %153 : vector<8x128xi1>, vector<8x128xf32>
    %c125_i32_55 = arith.constant 125 : i32
    %155 = tpu.dynamic_rotate %5 by %c125_i32_55 dim 1 : vector<8x128xf32>, i32 -> vector<8x128xf32>
    %cst_56 = arith.constant 0.000000e+00 : f32
    %156 = vector.broadcast %cst_56 : f32 to vector<8x128xf32>
    %157 = arith.select %61, %155, %156 : vector<8x128xi1>, vector<8x128xf32>
    %c124_i32_57 = arith.constant 124 : i32
    %158 = tpu.dynamic_rotate %5 by %c124_i32_57 dim 1 : vector<8x128xf32>, i32 -> vector<8x128xf32>
    %cst_58 = arith.constant 0.000000e+00 : f32
    %159 = vector.broadcast %cst_58 : f32 to vector<8x128xf32>
    %160 = arith.select %66, %158, %159 : vector<8x128xi1>, vector<8x128xf32>
    %c123_i32_59 = arith.constant 123 : i32
    %161 = tpu.dynamic_rotate %5 by %c123_i32_59 dim 1 : vector<8x128xf32>, i32 -> vector<8x128xf32>
    %cst_60 = arith.constant 0.000000e+00 : f32
    %162 = vector.broadcast %cst_60 : f32 to vector<8x128xf32>
    %163 = arith.select %71, %161, %162 : vector<8x128xi1>, vector<8x128xf32>
    %c122_i32_61 = arith.constant 122 : i32
    %164 = tpu.dynamic_rotate %5 by %c122_i32_61 dim 1 : vector<8x128xf32>, i32 -> vector<8x128xf32>
    %cst_62 = arith.constant 0.000000e+00 : f32
    %165 = vector.broadcast %cst_62 : f32 to vector<8x128xf32>
    %166 = arith.select %76, %164, %165 : vector<8x128xi1>, vector<8x128xf32>
    %c121_i32_63 = arith.constant 121 : i32
    %167 = tpu.dynamic_rotate %5 by %c121_i32_63 dim 1 : vector<8x128xf32>, i32 -> vector<8x128xf32>
    %cst_64 = arith.constant 0.000000e+00 : f32
    %168 = vector.broadcast %cst_64 : f32 to vector<8x128xf32>
    %169 = arith.select %81, %167, %168 : vector<8x128xi1>, vector<8x128xf32>
    %170 = vector.shape_cast %84 : vector<8x128xf32> to vector<8x1x128xf32>
    %171 = vector.shape_cast %87 : vector<8x128xf32> to vector<8x1x128xf32>
    %172 = vector.shape_cast %90 : vector<8x128xf32> to vector<8x1x128xf32>
    %173 = vector.shape_cast %93 : vector<8x128xf32> to vector<8x1x128xf32>
    %174 = vector.shape_cast %96 : vector<8x128xf32> to vector<8x1x128xf32>
    %175 = vector.shape_cast %99 : vector<8x128xf32> to vector<8x1x128xf32>
    %176 = vector.shape_cast %102 : vector<8x128xf32> to vector<8x1x128xf32>
    %177 = vector.shape_cast %104 : vector<8x128xf32> to vector<8x1x128xf32>
    %178 = vector.shape_cast %107 : vector<8x128xf32> to vector<8x1x128xf32>
    %179 = vector.shape_cast %110 : vector<8x128xf32> to vector<8x1x128xf32>
    %180 = vector.shape_cast %113 : vector<8x128xf32> to vector<8x1x128xf32>
    %181 = vector.shape_cast %116 : vector<8x128xf32> to vector<8x1x128xf32>
    %182 = vector.shape_cast %119 : vector<8x128xf32> to vector<8x1x128xf32>
    %183 = vector.shape_cast %122 : vector<8x128xf32> to vector<8x1x128xf32>
    %184 = vector.shape_cast %125 : vector<8x128xf32> to vector<8x1x128xf32>
    %185 = vector.shape_cast %128 : vector<8x128xf32> to vector<8x1x128xf32>
    %186 = vector.shape_cast %131 : vector<8x128xf32> to vector<8x1x128xf32>
    %187 = vector.shape_cast %134 : vector<8x128xf32> to vector<8x1x128xf32>
    %188 = vector.shape_cast %137 : vector<8x128xf32> to vector<8x1x128xf32>
    %189 = vector.shape_cast %140 : vector<8x128xf32> to vector<8x1x128xf32>
    %190 = vector.shape_cast %143 : vector<8x128xf32> to vector<8x1x128xf32>
    %191 = vector.shape_cast %146 : vector<8x128xf32> to vector<8x1x128xf32>
    %192 = vector.shape_cast %148 : vector<8x128xf32> to vector<8x1x128xf32>
    %193 = vector.shape_cast %151 : vector<8x128xf32> to vector<8x1x128xf32>
    %194 = vector.shape_cast %154 : vector<8x128xf32> to vector<8x1x128xf32>
    %195 = vector.shape_cast %157 : vector<8x128xf32> to vector<8x1x128xf32>
    %196 = vector.shape_cast %160 : vector<8x128xf32> to vector<8x1x128xf32>
    %197 = vector.shape_cast %163 : vector<8x128xf32> to vector<8x1x128xf32>
    %198 = vector.shape_cast %166 : vector<8x128xf32> to vector<8x1x128xf32>
    %199 = vector.shape_cast %169 : vector<8x128xf32> to vector<8x1x128xf32>
    %200 = tpu.concatenate %170, %171, %172, %173, %174, %175, %176, %177, %178, %179, %180, %181, %182, %183, %184, %185 in 1 : vector<8x1x128xf32>, vector<8x1x128xf32>, vector<8x1x128xf32>, vector<8x1x128xf32>, vector<8x1x128xf32>, vector<8x1x128xf32>, vector<8x1x128xf32>, vector<8x1x128xf32>, vector<8x1x128xf32>, vector<8x1x128xf32>, vector<8x1x128xf32>, vector<8x1x128xf32>, vector<8x1x128xf32>, vector<8x1x128xf32>, vector<8x1x128xf32>, vector<8x1x128xf32> -> vector<8x16x128xf32>
    %201 = tpu.concatenate %186, %187, %188, %189, %190, %191, %192, %193, %194, %195, %196, %197, %198, %199 in 1 : vector<8x1x128xf32>, vector<8x1x128xf32>, vector<8x1x128xf32>, vector<8x1x128xf32>, vector<8x1x128xf32>, vector<8x1x128xf32>, vector<8x1x128xf32>, vector<8x1x128xf32>, vector<8x1x128xf32>, vector<8x1x128xf32>, vector<8x1x128xf32>, vector<8x1x128xf32>, vector<8x1x128xf32>, vector<8x1x128xf32> -> vector<8x14x128xf32>
    %202 = tpu.concatenate %200, %201 in 1 : vector<8x16x128xf32>, vector<8x14x128xf32> -> vector<8x30x128xf32>
    %203 = arith.truncf %202 : vector<8x30x128xf32> to vector<8x30x128xbf16>
    %c0_65 = arith.constant 0 : index
    %c0_66 = arith.constant 0 : index
    %204 = vector.load %arg5[%c0_65, %c0_66] : memref<128x30xbf16, #tpu.memory_space<vmem>>, vector<128x30xbf16>
    %205 = vector.extract_strided_slice %203 {offsets = [0, 0, 0], sizes = [1, 30, 128], strides = [1, 1, 1]} : vector<8x30x128xbf16> to vector<1x30x128xbf16>
    %206 = vector.shape_cast %205 : vector<1x30x128xbf16> to vector<30x128xbf16>
    %cst_67 = arith.constant dense<0.000000e+00> : vector<128x128xf32>
    %207 = tpu.matmul %204, %206, %cst_67 {dimension_numbers = #tpu.dot_dimension_numbers<[1], [0], [0], [1], [0, 0, 1, 1], [], []>} : vector<128x30xbf16>, vector<30x128xbf16>, vector<128x128xf32> -> vector<128x128xf32>
    %208 = vector.extract_strided_slice %203 {offsets = [1, 0, 0], sizes = [1, 30, 128], strides = [1, 1, 1]} : vector<8x30x128xbf16> to vector<1x30x128xbf16>
    %209 = vector.shape_cast %208 : vector<1x30x128xbf16> to vector<30x128xbf16>
    %cst_68 = arith.constant dense<0.000000e+00> : vector<128x128xf32>
    %210 = tpu.matmul %204, %209, %cst_68 {dimension_numbers = #tpu.dot_dimension_numbers<[1], [0], [0], [1], [0, 0, 1, 1], [], []>} : vector<128x30xbf16>, vector<30x128xbf16>, vector<128x128xf32> -> vector<128x128xf32>
    %211 = vector.extract_strided_slice %203 {offsets = [2, 0, 0], sizes = [1, 30, 128], strides = [1, 1, 1]} : vector<8x30x128xbf16> to vector<1x30x128xbf16>
    %212 = vector.shape_cast %211 : vector<1x30x128xbf16> to vector<30x128xbf16>
    %cst_69 = arith.constant dense<0.000000e+00> : vector<128x128xf32>
    %213 = tpu.matmul %204, %212, %cst_69 {dimension_numbers = #tpu.dot_dimension_numbers<[1], [0], [0], [1], [0, 0, 1, 1], [], []>} : vector<128x30xbf16>, vector<30x128xbf16>, vector<128x128xf32> -> vector<128x128xf32>
    %214 = vector.extract_strided_slice %203 {offsets = [3, 0, 0], sizes = [1, 30, 128], strides = [1, 1, 1]} : vector<8x30x128xbf16> to vector<1x30x128xbf16>
    %215 = vector.shape_cast %214 : vector<1x30x128xbf16> to vector<30x128xbf16>
    %cst_70 = arith.constant dense<0.000000e+00> : vector<128x128xf32>
    %216 = tpu.matmul %204, %215, %cst_70 {dimension_numbers = #tpu.dot_dimension_numbers<[1], [0], [0], [1], [0, 0, 1, 1], [], []>} : vector<128x30xbf16>, vector<30x128xbf16>, vector<128x128xf32> -> vector<128x128xf32>
    %217 = vector.extract_strided_slice %203 {offsets = [4, 0, 0], sizes = [1, 30, 128], strides = [1, 1, 1]} : vector<8x30x128xbf16> to vector<1x30x128xbf16>
    %218 = vector.shape_cast %217 : vector<1x30x128xbf16> to vector<30x128xbf16>
    %cst_71 = arith.constant dense<0.000000e+00> : vector<128x128xf32>
    %219 = tpu.matmul %204, %218, %cst_71 {dimension_numbers = #tpu.dot_dimension_numbers<[1], [0], [0], [1], [0, 0, 1, 1], [], []>} : vector<128x30xbf16>, vector<30x128xbf16>, vector<128x128xf32> -> vector<128x128xf32>
    %220 = vector.extract_strided_slice %203 {offsets = [5, 0, 0], sizes = [1, 30, 128], strides = [1, 1, 1]} : vector<8x30x128xbf16> to vector<1x30x128xbf16>
    %221 = vector.shape_cast %220 : vector<1x30x128xbf16> to vector<30x128xbf16>
    %cst_72 = arith.constant dense<0.000000e+00> : vector<128x128xf32>
    %222 = tpu.matmul %204, %221, %cst_72 {dimension_numbers = #tpu.dot_dimension_numbers<[1], [0], [0], [1], [0, 0, 1, 1], [], []>} : vector<128x30xbf16>, vector<30x128xbf16>, vector<128x128xf32> -> vector<128x128xf32>
    %223 = vector.extract_strided_slice %203 {offsets = [6, 0, 0], sizes = [1, 30, 128], strides = [1, 1, 1]} : vector<8x30x128xbf16> to vector<1x30x128xbf16>
    %224 = vector.shape_cast %223 : vector<1x30x128xbf16> to vector<30x128xbf16>
    %cst_73 = arith.constant dense<0.000000e+00> : vector<128x128xf32>
    %225 = tpu.matmul %204, %224, %cst_73 {dimension_numbers = #tpu.dot_dimension_numbers<[1], [0], [0], [1], [0, 0, 1, 1], [], []>} : vector<128x30xbf16>, vector<30x128xbf16>, vector<128x128xf32> -> vector<128x128xf32>
    %226 = vector.extract_strided_slice %203 {offsets = [7, 0, 0], sizes = [1, 30, 128], strides = [1, 1, 1]} : vector<8x30x128xbf16> to vector<1x30x128xbf16>
    %227 = vector.shape_cast %226 : vector<1x30x128xbf16> to vector<30x128xbf16>
    %cst_74 = arith.constant dense<0.000000e+00> : vector<128x128xf32>
    %228 = tpu.matmul %204, %227, %cst_74 {dimension_numbers = #tpu.dot_dimension_numbers<[1], [0], [0], [1], [0, 0, 1, 1], [], []>} : vector<128x30xbf16>, vector<30x128xbf16>, vector<128x128xf32> -> vector<128x128xf32>
    %229 = vector.shape_cast %207 : vector<128x128xf32> to vector<1x128x128xf32>
    %230 = vector.shape_cast %210 : vector<128x128xf32> to vector<1x128x128xf32>
    %231 = vector.shape_cast %213 : vector<128x128xf32> to vector<1x128x128xf32>
    %232 = vector.shape_cast %216 : vector<128x128xf32> to vector<1x128x128xf32>
    %233 = vector.shape_cast %219 : vector<128x128xf32> to vector<1x128x128xf32>
    %234 = vector.shape_cast %222 : vector<128x128xf32> to vector<1x128x128xf32>
    %235 = vector.shape_cast %225 : vector<128x128xf32> to vector<1x128x128xf32>
    %236 = vector.shape_cast %228 : vector<128x128xf32> to vector<1x128x128xf32>
    %237 = tpu.concatenate %229, %230, %231, %232, %233, %234, %235, %236 in 0 : vector<1x128x128xf32>, vector<1x128x128xf32>, vector<1x128x128xf32>, vector<1x128x128xf32>, vector<1x128x128xf32>, vector<1x128x128xf32>, vector<1x128x128xf32>, vector<1x128x128xf32> -> vector<8x128x128xf32>
    %238 = vector.shape_cast %3 : vector<8x128xf32> to vector<8x128x1xf32>
    %239 = vector.broadcast %238 : vector<8x128x1xf32> to vector<8x128x128xf32>
    %240 = arith.addf %239, %237 : vector<8x128x128xf32>
    %c0_75 = arith.constant 0 : index
    %c0_76 = arith.constant 0 : index
    %c0_77 = arith.constant 0 : index
    %241 = vector.load %arg6[%c0_75, %c0_76, %c0_77] : memref<8x128x128xbf16, #tpu.memory_space<vmem>>, vector<8x128x128xbf16>
    %242 = arith.extf %241 : vector<8x128x128xbf16> to vector<8x128x128xf32>
    %243 = arith.addf %240, %242 : vector<8x128x128xf32>
    %244 = math.tanh %243 : vector<8x128x128xf32>
    %c0_78 = arith.constant 0 : index
    %c0_79 = arith.constant 0 : index
    %245 = vector.load %arg7[%c0_78, %c0_79] : memref<128x1xf32, #tpu.memory_space<vmem>>, vector<128x1xf32>
    %246 = vector.shape_cast %245 : vector<128x1xf32> to vector<1x128x1xf32>
    %247 = vector.broadcast %246 : vector<1x128x1xf32> to vector<8x128x128xf32>
    %248 = arith.mulf %244, %247 : vector<8x128x128xf32>
    %cst_80 = arith.constant dense<0.000000e+00> : vector<8x128xf32>
    %249 = vector.multi_reduction <add>, %248, %cst_80 [1] : vector<8x128x128xf32> to vector<8x128xf32>
    %c0_81 = arith.constant 0 : index
    %c0_82 = arith.constant 0 : index
    %250 = vector.load %arg8[%c0_81, %c0_82] : memref<8x1xi32, #tpu.memory_space<vmem>>, vector<8x1xi32>
    %251 = vector.broadcast %250 : vector<8x1xi32> to vector<8x128xi32>
    %252 = arith.cmpi slt, %6, %251 : vector<8x128xi32>
    %cst_83 = arith.constant -1.000000e+30 : f32
    %253 = vector.broadcast %cst_83 : f32 to vector<8x128xf32>
    %254 = arith.select %252, %249, %253 : vector<8x128xi1>, vector<8x128xf32>
    %cst_84 = arith.constant dense<0xFF800000> : vector<8xf32>
    %255 = vector.multi_reduction <maximumf>, %254, %cst_84 [1] : vector<8x128xf32> to vector<8xf32>
    %256 = vector.shape_cast %255 : vector<8xf32> to vector<8x1xf32>
    %257 = vector.broadcast %256 : vector<8x1xf32> to vector<8x128xf32>
    %258 = arith.subf %254, %257 : vector<8x128xf32>
    %259 = math.exp %258 : vector<8x128xf32>
    %cst_85 = arith.constant dense<0.000000e+00> : vector<8xf32>
    %260 = vector.multi_reduction <add>, %259, %cst_85 [1] : vector<8x128xf32> to vector<8xf32>
    %261 = vector.shape_cast %260 : vector<8xf32> to vector<8x1xf32>
    %262 = vector.broadcast %261 : vector<8x1xf32> to vector<8x128xf32>
    %263 = arith.divf %259, %262 : vector<8x128xf32>
    %264 = vector.shape_cast %263 : vector<8x128xf32> to vector<8x1x128xf32>
    %265 = arith.truncf %264 : vector<8x1x128xf32> to vector<8x1x128xbf16>
    %c0_86 = arith.constant 0 : index
    %c0_87 = arith.constant 0 : index
    %c0_88 = arith.constant 0 : index
    %266 = vector.load %arg9[%c0_86, %c0_87, %c0_88] : memref<8x128x128xbf16, #tpu.memory_space<vmem>>, vector<8x128x128xbf16>
    "tpu.trace_start"() <{level = 10 : i32, message = "bqt,bte->bqe"}> : () -> ()
    %cst_89 = arith.constant dense<0.000000e+00> : vector<8x1x128xf32>
    %267 = tpu.matmul %265, %266, %cst_89 {dimension_numbers = #tpu.dot_dimension_numbers<[2], [1], [1], [2], [0, 0, 0, 1, 1, 2], [0], [0]>} : vector<8x1x128xbf16>, vector<8x128x128xbf16>, vector<8x1x128xf32> -> vector<8x1x128xf32>
    "tpu.trace_stop"() : () -> ()
    %268 = vector.shape_cast %267 : vector<8x1x128xf32> to vector<8x128xf32>
    %c0_90 = arith.constant 0 : index
    %c0_91 = arith.constant 0 : index
    %269 = vector.load %arg10[%c0_90, %c0_91] : memref<8x128xf32, #tpu.memory_space<vmem>>, vector<8x128xf32>
    tpu.vector_store %arg10[%c0_90, %c0_91], %268 {strides = array<i32>} : memref<8x128xf32, #tpu.memory_space<vmem>>, vector<8x128xf32>,
    %c0_92 = arith.constant 0 : index
    %c0_93 = arith.constant 0 : index
    %270 = vector.load %arg11[%c0_92, %c0_93] : memref<8x128xf32, #tpu.memory_space<vmem>>, vector<8x128xf32>
    tpu.vector_store %arg11[%c0_92, %c0_93], %263 {strides = array<i32>} : memref<8x128xf32, #tpu.memory_space<vmem>>, vector<8x128xf32>,
    %c0_94 = arith.constant 0 : index
    %c0_95 = arith.constant 0 : index
    %271 = vector.load %arg4[%c0_94, %c0_95] : memref<8x128xf32, #tpu.memory_space<vmem>>, vector<8x128xf32>
    %272 = arith.addf %271, %263 : vector<8x128xf32>
    %c0_96 = arith.constant 0 : index
    %c0_97 = arith.constant 0 : index
    %273 = vector.load %arg12[%c0_96, %c0_97] : memref<8x128xf32, #tpu.memory_space<vmem>>, vector<8x128xf32>
    tpu.vector_store %arg12[%c0_96, %c0_97], %272 {strides = array<i32>} : memref<8x128xf32, #tpu.memory_space<vmem>>, vector<8x128xf32>,
    return
  }
  func.func @transform_0(%arg0: i32) -> (i32, i32) {
    %c0_i32 = arith.constant 0 : i32
    %c0_i32_0 = arith.constant 0 : i32
    return %arg0, %c0_i32 : i32, i32
  }
  func.func @transform_1(%arg0: i32) -> (i32, i32) {
    %c0_i32 = arith.constant 0 : i32
    %c0_i32_0 = arith.constant 0 : i32
    %c0_i32_1 = arith.constant 0 : i32
    return %c0_i32, %c0_i32_0 : i32, i32
  }
  func.func @transform_2(%arg0: i32) -> (i32, i32) {
    %c0_i32 = arith.constant 0 : i32
    %c0_i32_0 = arith.constant 0 : i32
    return %arg0, %c0_i32 : i32, i32
  }
  func.func @transform_3(%arg0: i32) -> (i32, i32) {
    %c0_i32 = arith.constant 0 : i32
    %c0_i32_0 = arith.constant 0 : i32
    return %arg0, %c0_i32 : i32, i32
  }
  func.func @transform_4(%arg0: i32) -> (i32, i32) {
    %c0_i32 = arith.constant 0 : i32
    %c0_i32_0 = arith.constant 0 : i32
    %c0_i32_1 = arith.constant 0 : i32
    return %c0_i32, %c0_i32_0 : i32, i32
  }
  func.func @transform_5(%arg0: i32) -> (i32, i32, i32) {
    %c0_i32 = arith.constant 0 : i32
    %c0_i32_0 = arith.constant 0 : i32
    %c0_i32_1 = arith.constant 0 : i32
    return %arg0, %c0_i32, %c0_i32_0 : i32, i32, i32
  }
  func.func @transform_6(%arg0: i32) -> (i32, i32) {
    %c0_i32 = arith.constant 0 : i32
    %c0_i32_0 = arith.constant 0 : i32
    %c0_i32_1 = arith.constant 0 : i32
    return %c0_i32, %c0_i32_0 : i32, i32
  }
  func.func @transform_7(%arg0: i32) -> (i32, i32) {
    %c0_i32 = arith.constant 0 : i32
    %c0_i32_0 = arith.constant 0 : i32
    return %arg0, %c0_i32 : i32, i32
  }
  func.func @transform_8(%arg0: i32) -> (i32, i32, i32) {
    %c0_i32 = arith.constant 0 : i32
    %c0_i32_0 = arith.constant 0 : i32
    %c0_i32_1 = arith.constant 0 : i32
    return %arg0, %c0_i32, %c0_i32_0 : i32, i32, i32
  }
  func.func @transform_9(%arg0: i32) -> (i32, i32) {
    %c0_i32 = arith.constant 0 : i32
    %c0_i32_0 = arith.constant 0 : i32
    return %arg0, %c0_i32 : i32, i32
  }
  func.func @transform_10(%arg0: i32) -> (i32, i32) {
    %c0_i32 = arith.constant 0 : i32
    %c0_i32_0 = arith.constant 0 : i32
    return %arg0, %c0_i32 : i32, i32
  }
  func.func @transform_11(%arg0: i32) -> (i32, i32) {
    %c0_i32 = arith.constant 0 : i32
    %c0_i32_0 = arith.constant 0 : i32
    return %arg0, %c0_i32 : i32, i32
  }
}

</mosaic_0001>

<bundles_post_ra>
// kernel: tpu_custom_call.1
= control target key start
LH: loop header
LB: loop body
LE: loop exit
PB: predicated region body
PF: predicated region fallthrough
CT: control target
= control target key end

     0   :  { %s12581_s0 = inlined_call_operand.vmem [shape: f32[32,64], index: 0, kind: input, shape index: {}]   ;;  %s12582_s1 = inlined_call_operand.vmem [shape: bf16[64,128], index: 1, kind: input, shape index: {}]   ;;  %s12583_s2 = inlined_call_operand.vmem [shape: f32[32,128], index: 2, kind: input, shape index: {}]   ;;  %s12584_s3 = inlined_call_operand.vmem [shape: f32[32,128], index: 3, kind: input, shape index: {}]   ;;  %s12585_s4 = inlined_call_operand.vmem [shape: bf16[128,30], index: 4, kind: input, shape index: {}]   ;;  %s12586_s5 = inlined_call_operand.hbm [shape: bf16[32,128,128], index: 5, kind: input, shape index: {}]   ;;  %s12587_s6 = inlined_call_operand.vmem [shape: f32[128,1], index: 6, kind: input, shape index: {}]   ;;  %s12588_s7 = inlined_call_operand.vmem [shape: s32[32,1], index: 7, kind: input, shape index: {}]   ;;  %s12589_s8 = inlined_call_operand.hbm [shape: bf16[32,128,128], index: 8, kind: input, shape index: {}]   ;;  %s12590_s9 = inlined_call_operand.hbm [shape: f32[32,128], index: 9, kind: output, shape index: {0}]   ;;  %s12591_s10 = inlined_call_operand.hbm [shape: f32[32,128], index: 10, kind: output, shape index: {1}]   ;;  %s12592_s11 = inlined_call_operand.hbm [shape: f32[32,128], index: 11, kind: output, shape index: {2}]  }
   0x1   :  { %12670 = sst [smem:[#allocation108_spill]] %s12581_s0 }
   0x2   :  { %12671 = sst [smem:[#allocation109_spill]] %s12582_s1 }
   0x3   :  { %12672 = sst [smem:[#allocation110_spill]] %s12583_s2 }
   0x4   :  { %12673 = sst [smem:[#allocation111_spill]] %s12584_s3 }
   0x5   :  { %12674 = sst [smem:[#allocation112_spill]] %s12586_s5 }
   0x6   :  { %17 = vsyncpa [#allocation3], 0 }
   0x7   :  { %19 = vsyncpa [#allocation3 + $0x1], 0 }
   0x8   :  { %20 = vsyncpa [#allocation6], 0 }
   0x9   :  { %22 = vsyncpa [#allocation6 + $0x1], 0 }
   0xa   :  { %23 = vsyncpa [#allocation4], 0 }
   0xb   :  { %25 = vsyncpa [#allocation4 + $0x1], 0 }
   0xc   :  { %26 = vsyncpa [#allocation9], 0 }
   0xd   :  { %28 = vsyncpa [#allocation9 + $0x1], 0  ;;  %s8912_s17 = smov 0   ;;  %s8914_s18 = smov 0  }
   0xe   :  { %s8916_s19 = smov 0   ;;  %s8918_s20 = smov 0  }
   0xf LB: > { %12675 = sst [smem:[#allocation15_spill]] %s8813_s17  ;;  %s8933_s21 = sadd.s32 4294967295, %s8825_s20   ;;  %s8825_s20 = sphi %s8918_s20, %s13113_s20   ;;  %s8821_s19 = sphi %s8916_s19, %s13115_s19   ;;  %s8817_s18 = sphi %s8914_s18, %s13117_s18   ;;  %s8813_s17 = sphi %s8912_s17, %s13116_s17  }
  0x10   : > { %12676 = sst [smem:[#allocation16_spill]] %s8821_s19  ;;  %s12593_s22 = sadd.s32 4294967294, %s8825_s20  }
  0x11   : > { %s8937_s23 = sadd.s32 1, %s8825_s20   ;;  %s161_s24 = sadd.s32 1, %s8821_s19 }
  0x12   : > { %12677 = sst [smem:[#allocation17_spill]] %s8937_s23  ;;  %s158_s25 = ssub.s32 %s8825_s20, %s8937_s23 }
  0x13   : > { %p168_p0 = scmp.ne.s32.totalorder %s8821_s19, %s8817_s18  ;;  %p159_p1 = scmp.eq.s32.totalorder %s158_s25, 0 }
  0x14   : > { %p169_p2 = scmp.eq.s32.totalorder %s8825_s20, 0  ;;  %p174_p3 = scmp.ne.s32.totalorder %s8817_s18, %s8813_s17 }
  0x15   : > { %p175_p4 = scmp.eq.s32.totalorder %s8933_s21, 0  ;;  %p271_p7 = scmp.eq.s32.totalorder %s8933_s21, 3 }
  0x16   : > { %s8949_s26 = scalar_select %p159_p1, %s8821_s19, %s161_s24  }
  0x17   : > { %p8951_p5 = por %p169_p2, %p168_p0  ;;  %p8955_p6 = por %p175_p4, %p174_p3 }
  0x18   : > { %12678 = sst [smem:[#allocation18_spill]] %s8949_s26  ;;  %p277_p8 = scmp.eq.s32.totalorder %s12593_s22, 3 }
  0x19   : > { %s12680_s28 = scalar_select %p8955_p6, 1, 0 }
  0x1a   : > { %p8239_p9 = scmp.lt.s32.totalorder %s8825_s20, 4  ;;  %p8963_p10 = por %p271_p7, %p168_p0 }
  0x1b   : > { %p8967_p11 = por %p277_p8, %p174_p3  ;;  %s8972_s12 = sand.u32 1, %s8821_s19  }
  0x1c   : > { %s12681_s29 = scalar_select %p8963_p10, 1, 0 }
  0x1d   : > { %s12682_s30 = scalar_select %p8967_p11, 1, 0 }
  0x1e   : > { %s12596_s13 = sshll.u32 %s8825_s20, 13  ;;  %s12595_s14 = sshll.u32 %s8972_s12, 9 }
  0x1f   : > { %12683 = sst [smem:[#allocation19_spill]] %s12682_s30  ;;  %s12684_s5 = sld [smem:[#allocation112_spill]] }
  0x20   : > { %s383_s25 = scalar_lea.vmem [#allocation2], %s12595_s14  ;;  %p8987_p12 = pnand %p8239_p9, %p8951_p5 }
  0x21   : > { %s391_s22 = sshll.u32 %s383_s25, 4  ;;  %s8991_s22 = int_to_ptr.vmem [resolvable:$true] %s391_s22 }
  0x22   : > { %p8637_p0 = pneg %p8987_p12 }
  0x25   : > { %s8981_s24 = scalar_lea.hbm %s12684_s5, %s12596_s13  ;;  %s8640_s27 = scalar_lea.hbm %s12684_s5, 32768 }
  0x26   : > { %s8635_s15 = scalar_lea.hbm %s8981_s24, 8192  ;;  %p8641_p3 = scmp.lt.u32.totalorder %s8981_s24, %s12684_s5 }
  0x27   : > { %p8636_p13 = scmp.ne.s32.totalorder %s8981_s24, %s8635_s15  ;;  %p8642_p4 = scmp.lt.u32.totalorder %s8640_s27, %s8635_s15 }
  0x28   : > { %p8644_p7 = scmp.lt.u32.totalorder %s8635_s15, %s8981_s24 }
  0x29   : > { %p8638_p1 = pnand %p8637_p0, %p8636_p13  ;;  %p8643_p5 = por %p8642_p4, %p8641_p3 }
  0x2b   : > { %p8639_p2 = pneg %p8638_p1  ;;  %p8645_p8 = por %p8644_p7, %p8643_p5 }
  0x2d   : > { %p8646_p9 = pnand %p8645_p8, %p8639_p2 }
  0x2f   : > { %8649 = shalt.err (!%p8646_p9)
}
  0x30   : > { %s8650_s19 = scalar_lea.vmem %s8991_s22, 8192  ;;  %s8827_s16 = smov [#allocation2]  }
  0x31   : > { %p8651_p13 = scmp.ne.s32.totalorder %s8991_s22, %s8650_s19  ;;  %s8655_s25 = sshll.u32 %s8827_s16, 4  ;;  %s8656_s25 = int_to_ptr.vmem [resolvable:$false] %s8655_s25 }
  0x32   : > { %s8657_s13 = scalar_lea.vmem %s8656_s25, 16384  ;;  %p8658_p10 = scmp.lt.s32.totalorder %s8991_s22, %s8656_s25 }
  0x33   : > { %p8653_p1 = pnand %p8651_p13, %p8637_p0  ;;  %p8659_p3 = scmp.lt.s32.totalorder %s8657_s13, %s8650_s19 }
  0x35   : > { %p8654_p11 = pneg %p8653_p1  ;;  %p8660_p4 = por %p8659_p3, %p8658_p10 }
  0x37   : > { %p8661_p5 = pnand %p8660_p4, %p8654_p11 }
  0x39   : > { %8664 = shalt.err (!%p8661_p5)
}
  0x3a   : > { %s12602_s14 = smov 64   ;;  %s8829_s15 = smov 4  }
  0x3b   : > { %s12686_s19 = scalar_lea.sflag [#allocation3], %s8972_s12  ;;  %p7228_p10 = scmp.ge.s32.totalorder %s8825_s20, 1 }
  0x3c   : > { %8225 = dma.hbm_to_vmem [thread:$0]  (!%p8987_p12), %s8981_s24, 8192, %s8991_s22, %s12686_s19, %s12602_s14, %s12602_s14, %s8829_s15  }
  0x3d   : > { %p428_p11 = scmp.lt.s32.totalorder %s8825_s20, 5  ;;  %s12688_s16 = sshll.u32 %s8825_s20, 13 }
  0x3e   : > { %s9035_s5 = scalar_lea.hbm %s12589_s8, %s12688_s16  ;;  %s12689_s23 = sshll.u32 %s8972_s12, 9 }
  0x3f   : > { %p9026_p2 = pnand %p7228_p10, %p428_p11  ;;  %s412_s30 = scalar_lea.vmem [#allocation5], %s12689_s23 }
  0x40   : > { %s420_s17 = sshll.u32 %s412_s30, 4  ;;  %s409_s22 = scalar_lea.sflag [#allocation6], %s8972_s12  ;;  %s9039_s17 = int_to_ptr.vmem [resolvable:$true] %s420_s17 }
  0x41   : > { %s8665_s24 = scalar_lea.hbm %s9035_s5, 8192  ;;  %s8670_s16 = scalar_lea.hbm %s12589_s8, 32768 }
  0x42   : > { %p8666_p7 = scmp.ne.s32.totalorder %s9035_s5, %s8665_s24  ;;  %p8671_p13 = scmp.lt.u32.totalorder %s9035_s5, %s12589_s8 }
  0x43   : > { %p8672_p1 = scmp.lt.u32.totalorder %s8670_s16, %s8665_s24  ;;  %p8674_p4 = scmp.lt.u32.totalorder %s8665_s24, %s9035_s5 }
  0x44   : > { %p8668_p8 = pnand %p8666_p7, %p8637_p0 }
  0x45   : > { %p8673_p3 = por %p8672_p1, %p8671_p13 }
  0x46   : > { %p8669_p9 = pneg %p8668_p8 }
  0x47   : > { %p8675_p5 = por %p8674_p4, %p8673_p3 }
  0x49   : > { %p8676_p10 = pnand %p8675_p5, %p8669_p9 }
  0x4b   : > { %8679 = shalt.err (!%p8676_p10)
}
  0x4c   : > { %s8680_s23 = scalar_lea.vmem %s9039_s17, 8192  ;;  %s8830_s30 = smov [#allocation5]  }
  0x4d   : > { %p8681_p11 = scmp.ne.s32.totalorder %s9039_s17, %s8680_s23  ;;  %s8685_s19 = sshll.u32 %s8830_s30, 4  ;;  %s8686_s19 = int_to_ptr.vmem [resolvable:$false] %s8685_s19 }
  0x4e   : > { %s8687_s14 = scalar_lea.vmem %s8686_s19, 16384  ;;  %p8688_p6 = scmp.lt.s32.totalorder %s9039_s17, %s8686_s19 }
  0x4f   : > { %p8683_p7 = pnand %p8681_p11, %p8637_p0  ;;  %p8689_p13 = scmp.lt.s32.totalorder %s8687_s14, %s8680_s23 }
  0x51   : > { %p8684_p8 = pneg %p8683_p7  ;;  %p8690_p1 = por %p8689_p13, %p8688_p6 }
  0x53   : > { %p8691_p3 = pnand %p8690_p1, %p8684_p8 }
  0x55   : > { %8694 = shalt.err (!%p8691_p3)
}
  0x56   : > { %s12690_s24 = smov 64   ;;  %432 = sbr.rel (%p9026_p2) target bundleno = 1512 (0x5e8), region = 56 }
  0x57   : > { %8228 = dma.hbm_to_vmem [thread:$0]  (!%p8987_p12), %s9035_s5, 8192, %s9039_s17, %s409_s22, %s12690_s24, %s12690_s24, %s8829_s15  }
  0x5d   : > { %s9073_s25 = sand.u32 1, %s8817_s18   ;;  %p12691_p6 = scmp.ne.s32.totalorder %s12680_s28, 0 }
  0x5e   : > { %s7229_s16 = sshll.u32 %s9073_s25, 9  ;;  %s435_s13 = scalar_lea.sflag [#allocation3], %s9073_s25 }
  0x5f   : > { %s9077_s26 = scalar_lea.vmem [#allocation2], %s7229_s16 }
  0x60   : > { %8796 = dma.done.wait (%p12691_p6), %s435_s13, 8192  }
  0x61   : > { %8798 = vsyncadd (%p12691_p6), %s435_s13, 4294959104  ;;  %s444_s5 = scalar_lea.sflag [#allocation6], %s9073_s25  ;;  %s9084_s17 = scalar_lea.vmem [#allocation5], %s7229_s16 }
  0x62   : > { %8800 = dma.done.wait (%p12691_p6), %s444_s5, 8192  }
  0x63   : > { %8802 = vsyncadd (%p12691_p6), %s444_s5, 4294959104  ;;  %p517_p12 = scmp.lt.s32.totalorder %s8933_s21, 3  ;;  %v12610_v0 = vmov 0.0   ;;  %vm12612_vm0 = vmmov 0   ;;  %s12692_s2 = sld [smem:[#allocation110_spill]]  ;;  %vm570_vm1 = vcmask 523264   ;;  %v616_v9 = vlaneseq }
  0x64   : > { %7867 = vmatprep.subr.bf16.mxu0 %v12610_v0  ;;  %7875 = vmatprep.mubr.msk.bf16.mxu0 %vm12612_vm0, %v12610_v0  ;;  %s12608_s28 = smov 5   ;;  %s12605_s30 = smov 6   ;;  %v8847_v10 = vmov 1966171168   ;;  %vm2841_vm10 = vcmask 1040384   ;;  %vm2850_vm11 = vcmask 1041408  }
  0x65   : > { %s518_s12 = scalar_select %p517_p12, %s8933_s21, 3  ;;  %v752_v11 = vunpack.c.l.s4 %v8847_v10  ;;  %v9142_v12 = vand.u32 127, %v616_v9  ;;  %v9144_v14 = vshrl.u32 %v616_v9, 7  ;;  %vm2859_vm13 = vcmask 1042432  }
  0x66   : > { %s12693_s1 = sld [smem:[#allocation109_spill]]  ;;  %s12604_s13 = smov 125  }
  0x67   : > { %s9095_s15 = sshll.u32 %s518_s12, 3  ;;  %s12606_s5 = smov 126   ;;  %12702 = vst [vmem:[#allocation20_spill] sm:$0xff] %v9142_v12  ;;  %v753_v13 = vunpack.c.0.s8 %v752_v11  ;;  %12703 = vst [vmem:[#allocation21_spill] sm:$0xff] %v9144_v14  ;;  %vm624_vm2 = vcmp.ge.s32.totalorder %v9142_v12, 5  ;;  %vm621_vm3 = vcmp.ge.s32.totalorder %v9142_v12, 6 }
  0x68   : > { %s12694_s0 = sld [smem:[#allocation108_spill]]  ;;  %s8837_s24 = smov 4   ;;  %vm649_vm4 = vcmp.lt.s32.totalorder %v9142_v12, 125  ;;  %v9164_v29 = vsub.s32 0, %v9144_v14  ;;  %vm646_vm5 = vcmp.lt.s32.totalorder %v9142_v12, 126  ;;  %vm627_vm6 = vcmp.ge.s32.totalorder %v9142_v12, 4 }
  0x69   : > { %s9101_s23 = scalar_lea.vmem %s12692_s2, %s9095_s15  ;;  %s12607_s16 = smov 7   ;;  %v9148_v15 = vsub.s32 %v753_v13, %v9144_v14  ;;  %vm618_vm7 = vcmp.ge.s32.totalorder %v9142_v12, 7  ;;  %vm652_vm8 = vcmp.lt.s32.totalorder %v9142_v12, 124  ;;  %vm12614_vm9 = vcmp.lt.s32.totalorder %v9142_v12, 127 }
  0x6a   : > { %v614_v1 = vld [vmem:[%s9101_s23] sm:$0xff]  ;;  %s8839_s12 = smov 124   ;;  %s12609_s27 = smov 127   ;;  %vm12615_vm12 = vcmp.lt.s32.totalorder %v9142_v12, 123  ;;  %vm630_vm14 = vcmp.ge.s32.totalorder %v9142_v12, 3  ;;  %vm658_vm15 = vcmp.lt.s32.totalorder %v9142_v12, 122 }
  0x6b   : > { %669 = vrot.lane.b32.xlu1 %v614_v1, %s12608_s28  ;;  %666 = vrot.lane.b32.xlu0 %v614_v1, %s12605_s30  ;;  %s8841_s22 = smov 123   ;;  %s8842_s19 = smov 3   ;;  %12704 = vst [vmem:[#allocation22_spill] sm:$0xff] %v9148_v15  ;;  %vm636_vm0 = vcmp.ge.s32.totalorder %v9142_v12, 1 }
  0x6c   : > { %v8295_v2 = vld [vmem:[%s12693_s1] sm:$0xff]   ;;  %v8296_v3 = vld [vmem:[%s12693_s1 + $0x8] sm:$0xff]   ;;  %v8297_v4 = vld [vmem:[%s12693_s1 + $0x10] sm:$0xff]   ;;  %s12695_s3 = sld [smem:[#allocation111_spill]]  ;;  %s8845_s28 = smov 1  }
  0x6d   : > { %7868 = vmatpush3.bf16.msra.mxu0 %v8295_v2  ;;  %v8298_v5 = vld [vmem:[%s12693_s1 + $0x18] sm:$0xff]   ;;  %s12697_s1 = smov 6   ;;  %s12698_s2 = smov 7  }
  0x6e   : > { %7869 = vmatprep.subr.bf16.mxu0 %v12610_v0  ;;  %s520_s14 = scalar_lea.vmem %s12694_s0, %s9095_s15  ;;  %s8846_s0 = smov 121  }
  0x6f   : > { %691 = vrot.lane.b32.xlu1 %v614_v1, %s12604_s13  ;;  %688 = vrot.lane.b32.xlu0 %v614_v1, %s12606_s5  ;;  %v536_v6 = vld [vmem:[%s520_s14] sm:$0xff]  ;;  %s8843_s14 = smov 122   ;;  %s12699_s30 = smov 125  }
  0x70   : > { %v537_v7 = vpack.c.bf16 %v536_v6, %v536_v6  ;;  %s12700_s13 = smov 126   ;;  %p13108_p2 = scmp.ne.s32.totalorder %s12681_s29, 0 }
  0x71   : > { %7870 = vmatpush3.bf16.msra.mxu0 %v8296_v3 }
  0x72   : > { %7871 = vmatprep.subr.bf16.mxu0 %v12610_v0  ;;  %s9133_s5 = scalar_lea.vmem %s12695_s3, %s9095_s15  ;;  %s12701_s3 = smov 127  }
  0x73   : > { %672 = vrot.lane.b32.xlu1 %v614_v1, %s8837_s24  ;;  %663 = vrot.lane.b32.xlu0 %v614_v1, %s12607_s16  ;;  %s8844_s16 = smov 2   ;;  %v615_v8 = vld [vmem:[%s9133_s5] sm:$0xff] }
  0x75   : > { %7872 = vmatpush3.bf16.msra.mxu0 %v8297_v4 }
  0x76   : > { %7873 = vmatprep.subr.bf16.mxu0 %v12610_v0 }
  0x77   : > { %694 = vrot.lane.b32.xlu1 %v614_v1, %s8839_s12  ;;  %685 = vrot.lane.b32.xlu0 %v614_v1, %s12609_s27  ;;  %s12696_s27 = smov 5  }
  0x79   : > { %7874 = vmatpush3.bf16.msra.mxu0 %v8298_v5 }
  0x7b   : > { %697 = vrot.lane.b32.xlu1 %v614_v1, %s8841_s22  ;;  %675 = vrot.lane.b32.xlu0 %v614_v1, %s8842_s19 }
  0x7c   : > { %7876 = vmatmul.mubr.msk.bf16.vlgmr.msra.gmra.mrb[0].mxu0 %vm570_vm1, %v537_v7  ;;  %vm633_vm1 = vcmp.ge.s32.totalorder %v9142_v12, 2 }
  0x7f   : > { %700 = vrot.lane.b32.xlu1 %v614_v1, %s8843_s14  ;;  %678 = vrot.lane.b32.xlu0 %v614_v1, %s8844_s16 }
  0x83   : > { %681 = vrot.lane.b32.xlu1 %v614_v1, %s8845_s28  ;;  %712 = vrot.lane.b32.xlu0 %v615_v8, %s12696_s27 }
  0x87   : > { %715 = vrot.lane.b32.xlu1 %v615_v8, %s8837_s24  ;;  %703 = vrot.lane.b32.xlu0 %v614_v1, %s8846_s0 }
  0x8b   : > { %709 = vrot.lane.b32.xlu1 %v615_v8, %s12697_s1  ;;  %706 = vrot.lane.b32.xlu0 %v615_v8, %s12698_s2 }
  0x8f   : > { %734 = vrot.lane.b32.xlu1 %v615_v8, %s12699_s30  ;;  %718 = vrot.lane.b32.xlu0 %v615_v8, %s8842_s19  ;;  %s8849_s30 = smov [#allocation8]  }
  0x93   : > { %737 = vrot.lane.b32.xlu1 %v615_v8, %s8839_s12  ;;  %721 = vrot.lane.b32.xlu0 %v615_v8, %s8844_s16  ;;  %s12468_s16 = sshll.u32 %s8933_s21, 7 }
  0x97   : > { %731 = vrot.lane.b32.xlu1 %v615_v8, %s12700_s13  ;;  %724 = vrot.lane.b32.xlu0 %v615_v8, %s8845_s28  ;;  %s8699_s13 = sshll.u32 %s8849_s30, 4  ;;  %s8700_s13 = int_to_ptr.vmem [resolvable:$false] %s8699_s13 }
  0x9b   : > { %743 = vrot.lane.b32.xlu1 %v615_v8, %s8843_s14  ;;  %740 = vrot.lane.b32.xlu0 %v615_v8, %s8841_s22  ;;  %s12474_s22 = scalar_lea.hbm %s12591_s10, %s12468_s16 }
  0x9f   : > { %746 = vrot.lane.b32.xlu1 %v615_v8, %s8846_s0  ;;  %728 = vrot.lane.b32.xlu0 %v615_v8, %s12701_s3  ;;  %s533_s3 = scalar_lea.vmem %s12588_s7, %s9095_s15 }
  0xdd   : > { %v670_v16 = vpop.permute.xlu1 %669  ;;  %v667_v19 = vpop.permute.xlu0 %666 }
  0xde   : > { %v671_v17 = vsel %vm624_vm2, %v670_v16, 0.0  ;;  %v668_v21 = vsel %vm621_vm3, %v667_v19, 0.0 }
  0xdf   : > { %v858_v18 = vcombine.high %v671_v17, %v671_v17  ;;  %v865_v20 = vrot.slane %v671_v17, %v9148_v15  ;;  %v808_v22 = vcombine.high %v668_v21, %v668_v21  ;;  %v815_v24 = vrot.slane %v668_v21, %v9148_v15 }
  0xe1   : > { %v872_v23 = vrot.slane %v858_v18, %v9148_v15  ;;  %v873_v25 = vcombine.high %v865_v20, %v865_v20  ;;  %v822_v26 = vrot.slane %v808_v22, %v9148_v15  ;;  %v9160_v28 = vrot.slane %v865_v20, %v9148_v15  ;;  %v692_v31 = vpop.permute.xlu1 %691  ;;  %v689_v32 = vpop.permute.xlu0 %688 }
  0xe2   : > { %v823_v30 = vcombine.high %v815_v24, %v815_v24  ;;  %v9178_v37 = vrot.slane %v815_v24, %v9148_v15  ;;  %v693_v38 = vsel %vm649_vm4, %v692_v31, 0.0  ;;  %v690_v42 = vsel %vm646_vm5, %v689_v32, 0.0 }
  0xe3   : > { %v874_v27 = vcombine.high %v872_v23, %v872_v23  ;;  %v9168_v33 = vrot.slane %v873_v25, %v9148_v15  ;;  %v903_v34 = vcombine.high %v9160_v28, %v9160_v28  ;;  %v9175_v35 = vrot.slane %v872_v23, %v9148_v15 }
  0xe4   : > { %v824_v36 = vcombine.high %v822_v26, %v822_v26  ;;  %v1266_v41 = vcombine.high %v693_v38, %v693_v38  ;;  %v9196_v45 = vrot.slane %v822_v26, %v9148_v15  ;;  %v9199_v46 = vrot.slane %v823_v30, %v9148_v15 }
  0xe5   : > { %v9185_v39 = vrot.slane %v874_v27, %v9148_v15  ;;  %v905_v40 = vcombine.high %v9168_v33, %v9168_v33  ;;  %v904_v43 = vcombine.high %v9175_v35, %v9175_v35  ;;  %v9206_v49 = vrot.slane %v903_v34, %v9164_v29  ;;  %v673_v55 = vpop.permute.xlu1 %672  ;;  %v664_v56 = vpop.permute.xlu0 %663 }
  0xe6   : > { %v1273_v50 = vrot.slane %v693_v38, %v9148_v15  ;;  %v9210_v51 = vrot.slane %v824_v36, %v9148_v15  ;;  %v853_v52 = vcombine.high %v9178_v37, %v9178_v37  ;;  %v855_v53 = vcombine.high %v9199_v46, %v9199_v46 }
  0xe7   : > { %v906_v47 = vcombine.high %v9185_v39, %v9185_v39  ;;  %v1216_v54 = vcombine.high %v690_v42, %v690_v42  ;;  %v9217_v57 = vrot.slane %v905_v40, %v9164_v29  ;;  %v854_v59 = vcombine.high %v9196_v45, %v9196_v45 }
  0xe8   : > { %v1280_v60 = vrot.slane %v1266_v41, %v9148_v15  ;;  %v9227_v62 = vrot.slane %v904_v43, %v9164_v29  ;;  %v856_v63 = vcombine.high %v9210_v51, %v9210_v51  ;;  %v1223_v1 = vrot.slane %v690_v42, %v9148_v15 }
  0xe9   : > { %v9233_v2 = vrot.slane %v906_v47, %v9164_v29  ;;  %v2284_v3 = vrot.slane %v9178_v37, %v9164_v29  ;;  %v2288_v4 = vrot.slane %v9199_v46, %v9164_v29  ;;  %v1281_v5 = vcombine.high %v1273_v50, %v1273_v50  ;;  %v695_v21 = vpop.permute.xlu1 %694  ;;  %v686_v22 = vpop.permute.xlu0 %685 }
  0xea   : > { %v9240_v6 = vrot.slane %v853_v52, %v9164_v29  ;;  %v9243_v7 = vrot.slane %v855_v53, %v9164_v29  ;;  %v1230_v9 = vrot.slane %v1216_v54, %v9148_v15  ;;  %v9251_v11 = vrot.slane %v854_v59, %v9164_v29 }
  0xeb   : > { %12705 = vst [vmem:[#allocation23_spill] sm:$0xff] %v9233_v2  ;;  %v1282_v13 = vcombine.high %v1280_v60, %v1280_v60  ;;  %v9254_v16 = vrot.slane %v1273_v50, %v9148_v15  ;;  %v9257_v17 = vrot.slane %v856_v63, %v9164_v29  ;;  %v1231_v18 = vcombine.high %v1223_v1, %v1223_v1 }
  0xec   : > { %v674_v19 = vsel %vm627_vm6, %v673_v55, 0.0  ;;  %v665_v20 = vsel %vm618_vm7, %v664_v56, 0.0  ;;  %v9264_v23 = vrot.slane %v1281_v5, %v9148_v15  ;;  %v9270_v25 = vsel %vm652_vm8, %v695_v21, 0.0 }
  0xed   : > { %v1311_v24 = vcombine.high %v9254_v16, %v9254_v16  ;;  %v9274_v26 = vsel %vm12614_vm9, %v686_v22, 0.0  ;;  %v9277_v27 = vrot.slane %v1280_v60, %v9148_v15  ;;  %v1232_v30 = vcombine.high %v1230_v9, %v1230_v9 }
  0xee   : > { %v9280_v31 = vrot.slane %v1223_v1, %v9148_v15  ;;  %v908_v32 = vcombine.high %v674_v19, %v674_v19  ;;  %v9283_v34 = vrot.slane %v1282_v13, %v9148_v15  ;;  %v1313_v36 = vcombine.high %v9264_v23, %v9264_v23 }
  0xef   : > { %v915_v40 = vrot.slane %v674_v19, %v9148_v15  ;;  %v1312_v41 = vcombine.high %v9277_v27, %v9277_v27  ;;  %v9293_v42 = vrot.slane %v1230_v9, %v9148_v15  ;;  %v9296_v43 = vrot.slane %v1231_v18, %v9148_v15 }
  0xf0   : > { %v750_v47 = vcombine.high %v665_v20, %v665_v20  ;;  %v1314_v50 = vcombine.high %v9283_v34, %v9283_v34  ;;  %v9303_v53 = vrot.slane %v1311_v24, %v9164_v29  ;;  %v1261_v54 = vcombine.high %v9280_v31, %v9280_v31 }
  0xf1   : > { %v9310_v56 = vrot.slane %v1232_v30, %v9148_v15  ;;  %v922_v59 = vrot.slane %v908_v32, %v9148_v15  ;;  %v757_v60 = vrot.slane %v665_v20, %v9148_v15  ;;  %v9315_v63 = vrot.slane %v1313_v36, %v9164_v29 }
  0xf2   : > { %v1262_v1 = vcombine.high %v9293_v42, %v9293_v42  ;;  %v1263_v5 = vcombine.high %v9296_v43, %v9296_v43  ;;  %v923_v9 = vcombine.high %v915_v40, %v915_v40  ;;  %v9324_v18 = vrot.slane %v1312_v41, %v9164_v29 }
  0xf3   : > { %v1264_v19 = vcombine.high %v9310_v56, %v9310_v56  ;;  %v764_v20 = vrot.slane %v750_v47, %v9148_v15  ;;  %v9330_v21 = vrot.slane %v1314_v50, %v9164_v29  ;;  %v9337_v30 = vrot.slane %v1261_v54, %v9164_v29 }
  0xf4   : > { %v924_v36 = vcombine.high %v922_v59, %v922_v59  ;;  %v9342_v41 = vrot.slane %v915_v40, %v9148_v15  ;;  %v765_v47 = vcombine.high %v757_v60, %v757_v60  ;;  %v9345_v50 = vrot.slane %v1263_v5, %v9164_v29 }
  0xf5   : > { %12706 = vst [vmem:[#allocation24_spill] sm:$0xff] %v9330_v21  ;;  %v9350_v13 = vrot.slane %v1262_v1, %v9164_v29  ;;  %v9353_v54 = vrot.slane %v923_v9, %v9148_v15  ;;  %v9356_v55 = vrot.slane %v1264_v19, %v9164_v29  ;;  %v9359_v40 = vrot.slane %v922_v59, %v9148_v15 }
  0xf6   : > { %v953_v52 = vcombine.high %v9342_v41, %v9342_v41  ;;  %v766_v5 = vcombine.high %v764_v20, %v764_v20  ;;  %v773_v0 = vrot.slane %v757_v60, %v9148_v15  ;;  %v1316_v1 = vcombine.high %v9270_v25, %v9270_v25 }
  0xf7   : > { %12707 = vst [vmem:[#allocation25_spill] sm:$0xff] %v9359_v40  ;;  %v955_v38 = vcombine.high %v9353_v54, %v9353_v54  ;;  %v1323_v9 = vrot.slane %v9270_v25, %v9148_v15  ;;  %v9372_v59 = vrot.slane %v924_v36, %v9148_v15  ;;  %v954_v19 = vcombine.high %v9359_v40, %v9359_v40 }
  0xf8   : > { %v787_v32 = vrot.slane %v765_v47, %v9148_v15  ;;  %v1158_v24 = vcombine.high %v9274_v26, %v9274_v26  ;;  %v2368_v22 = vrot.slane %v9353_v54, %v9164_v29  ;;  %v780_v25 = vrot.slane %v764_v20, %v9148_v15 }
  0xf9   : > { %12708 = vst [vmem:[#allocation26_spill] sm:$0xff] %v9372_v59  ;;  %v795_v61 = vcombine.high %v773_v0, %v773_v0  ;;  %v956_v36 = vcombine.high %v9372_v59, %v9372_v59  ;;  %v9387_v58 = vrot.slane %v953_v52, %v9164_v29  ;;  %v794_v47 = vrot.slane %v766_v5, %v9148_v15 }
  0xfa   : > { %v797_v48 = vcombine.high %v787_v32, %v787_v32  ;;  %v9391_v44 = vrot.slane %v955_v38, %v9164_v29  ;;  %v796_v10 = vcombine.high %v780_v25, %v780_v25  ;;  %v1330_v54 = vrot.slane %v1316_v1, %v9148_v15 }
  0xfb   : > { %12709 = vst [vmem:[#allocation27_spill] sm:$0xff] %v9387_v58  ;;  %v9399_v8 = vrot.slane %v954_v19, %v9164_v29  ;;  %v798_v52 = vcombine.high %v794_v47, %v794_v47  ;;  %v2842_v38 = vsel %vm2841_vm10, %v773_v0, %v2284_v3  ;;  %v2843_v5 = vsel %vm2841_vm10, %v787_v32, %v2288_v4 }
  0xfc   : > { %v2844_v1 = vsel %vm2841_vm10, %v795_v61, %v9240_v6  ;;  %v1331_v60 = vcombine.high %v1323_v9, %v1323_v9  ;;  %v1165_v20 = vrot.slane %v9274_v26, %v9148_v15  ;;  %v9415_v19 = vrot.slane %v956_v36, %v9164_v29  ;;  %v698_v36 = vpop.permute.xlu1 %697 }
  0xfd   : > { %12710 = vst [vmem:[#allocation28_spill] sm:$0xff] %v9399_v8  ;;  %v2845_v0 = vsel %vm2841_vm10, %v797_v48, %v9243_v7  ;;  %v12712_v37 = vrot.slane %v9196_v45, %v9164_v29  ;;  %v12713_v61 = vrot.slane %v9210_v51, %v9164_v29  ;;  %v2848_v4 = vsel %vm2841_vm10, %v796_v10, %v9251_v11 }
  0xfe   : > { %12711 = vst [vmem:[#allocation29_spill] sm:$0xff] %v9415_v19  ;;  %v12714_v6 = vrot.slane %v9160_v28, %v9164_v29  ;;  %v1332_v48 = vcombine.high %v1330_v54, %v1330_v54  ;;  %v1172_v7 = vrot.slane %v1158_v24, %v9148_v15  ;;  %v9438_v45 = vsel %vm2841_vm10, %v798_v52, %v9257_v17 }
  0xff   : > { %v2846_v46 = vsel %vm2841_vm10, %v780_v25, %v12712_v37  ;;  %v2847_v3 = vsel %vm2841_vm10, %v794_v47, %v12713_v61  ;;  %12715 = vst [vmem:[#allocation30_spill] sm:$0xff] %v9438_v45  ;;  %v12716_v51 = vrot.slane %v9168_v33, %v9164_v29  ;;  %v9446_v10 = vsel %vm2850_vm11, %v2844_v1, %v9206_v49 }
 0x100   : > { %v9433_v26 = vsel %vm2850_vm11, %v2842_v38, %v12714_v6  ;;  %12717 = vst [vmem:[#allocation31_spill] sm:$0xff] %v9446_v10  ;;  %v9449_v28 = vrot.slane %v1323_v9, %v9148_v15  ;;  %v9453_v11 = vsel %vm2850_vm11, %v2845_v0, %v9217_v57  ;;  %v12718_v17 = vrot.slane %v9175_v35, %v9164_v29 }
 0x101   : > { %v2852_v32 = vsel %vm2850_vm11, %v2843_v5, %v12716_v51  ;;  %v9462_v33 = vrot.slane %v1331_v60, %v9148_v15  ;;  %v1173_v25 = vcombine.high %v1165_v20, %v1165_v20  ;;  %v12720_v49 = vrot.slane %v9185_v39, %v9164_v29  ;;  %v701_v5 = vpop.permute.xlu1 %700 }
 0x102   : > { %v9459_v24 = vsel %vm2850_vm11, %v2846_v46, %v12718_v17  ;;  %v9472_v57 = vsel %vm2850_vm11, %v2848_v4, %v9227_v62  ;;  %v9475_v35 = vrot.slane %v1330_v54, %v9148_v15  ;;  %v699_v47 = vsel %vm12615_vm12, %v698_v36, 0.0  ;;  %v676_v17 = vpop.permute.xlu0 %675 }
 0x103   : > { %12719 = vst [vmem:[#allocation32_spill] sm:$0xff] %v9459_v24  ;;  %v9468_v9 = vsel %vm2850_vm11, %v2847_v3, %v12720_v49  ;;  %12722 = vst [vmem:[#allocation34_spill] sm:$0xff] %v9472_v57  ;;  %v9480_v60 = vrot.slane %v1332_v48, %v9148_v15  ;;  %v1361_v52 = vcombine.high %v9449_v28, %v9449_v28  ;;  %v677_v49 = vsel %vm630_vm14, %v676_v17, 0.0 }
 0x104   : > { %12721 = vst [vmem:[#allocation33_spill] sm:$0xff] %v9468_v9  ;;  %12723 = vst [vmem:[#allocation35_spill] sm:$0xff] %v9475_v35  ;;  %v1174_v39 = vcombine.high %v1172_v7, %v1172_v7  ;;  %v1181_v38 = vrot.slane %v1165_v20, %v9148_v15  ;;  %v1362_v62 = vcombine.high %v9475_v35, %v9475_v35  ;;  %vm2868_vm9 = vcmask 1043456  }
 0x105   : > { %12724 = vst [vmem:[#allocation36_spill] sm:$0xff] %v9480_v60  ;;  %v1363_v54 = vcombine.high %v9462_v33, %v9462_v33  ;;  %v9493_v1 = vsel %vm2859_vm13, %v2852_v32, %v2368_v22  ;;  %v2648_v0 = vrot.slane %v9462_v33, %v9164_v29  ;;  %v1195_v37 = vrot.slane %v1173_v25, %v9148_v15 }
 0x106   : > { %v1203_v20 = vcombine.high %v1181_v38, %v1181_v38  ;;  %v1366_v46 = vcombine.high %v699_v47, %v699_v47  ;;  %v1364_v61 = vcombine.high %v9480_v60, %v9480_v60  ;;  %v1188_v4 = vrot.slane %v1172_v7, %v9148_v15 }
 0x107   : > { %v1373_v6 = vrot.slane %v699_v47, %v9148_v15  ;;  %v9507_v22 = vrot.slane %v1361_v52, %v9164_v29  ;;  %v1202_v51 = vrot.slane %v1174_v39, %v9148_v15  ;;  %v1205_v32 = vcombine.high %v1195_v37, %v1195_v37 }
 0x108   : > { %v9513_v33 = vrot.slane %v1362_v62, %v9164_v29  ;;  %v1204_v7 = vcombine.high %v1188_v4, %v1188_v4  ;;  %v12727_v25 = vrot.slane %v9280_v31, %v9164_v29  ;;  %v12728_v47 = vrot.slane %v9296_v43, %v9164_v29 }
 0x109   : > { %12725 = vst [vmem:[#allocation37_spill] sm:$0xff] %v9507_v22  ;;  %v2906_v39 = vsel %vm2841_vm10, %v1203_v20, %v9337_v30  ;;  %v1380_v62 = vrot.slane %v1366_v46, %v9148_v15  ;;  %v958_v48 = vcombine.high %v677_v49, %v677_v49  ;;  %v9529_v3 = vrot.slane %v1363_v54, %v9164_v29 }
 0x10a   : > { %12726 = vst [vmem:[#allocation38_spill] sm:$0xff] %v9513_v33  ;;  %v2904_v36 = vsel %vm2841_vm10, %v1181_v38, %v12727_v25  ;;  %v2905_v52 = vsel %vm2841_vm10, %v1195_v37, %v12728_v47  ;;  %v1206_v31 = vcombine.high %v1202_v51, %v1202_v51  ;;  %v12729_v38 = vrot.slane %v9293_v42, %v9164_v29 }
 0x10b   : > { %v1381_v25 = vcombine.high %v1373_v6, %v1373_v6  ;;  %v9536_v43 = vrot.slane %v1364_v61, %v9164_v29  ;;  %v2907_v30 = vsel %vm2841_vm10, %v1205_v32, %v9345_v50  ;;  %v12731_v37 = vrot.slane %v9310_v56, %v9164_v29 }
 0x10c   : > { %v2908_v17 = vsel %vm2841_vm10, %v1188_v4, %v12729_v38  ;;  %v12732_v20 = vrot.slane %v9254_v16, %v9164_v29  ;;  %v2910_v46 = vsel %vm2841_vm10, %v1204_v7, %v9350_v13  ;;  %v12733_v61 = vrot.slane %v9264_v23, %v9164_v29 }
 0x10d   : > { %12730 = vst [vmem:[#allocation39_spill] sm:$0xff] %v9536_v43  ;;  %v2909_v54 = vsel %vm2841_vm10, %v1202_v51, %v12731_v37  ;;  %v9558_v50 = vsel %vm2850_vm11, %v2906_v39, %v9303_v53  ;;  %v965_v56 = vrot.slane %v677_v49, %v9148_v15  ;;  %v12735_v16 = vrot.slane %v9277_v27, %v9164_v29 }
 0x10e   : > { %v9548_v42 = vsel %vm2850_vm11, %v2904_v36, %v12732_v20  ;;  %v2913_v4 = vsel %vm2850_vm11, %v2905_v52, %v12733_v61  ;;  %12734 = vst [vmem:[#allocation40_spill] sm:$0xff] %v9558_v50  ;;  %v1382_v32 = vcombine.high %v1380_v62, %v1380_v62  ;;  %v9568_v13 = vrot.slane %v1373_v6, %v9148_v15 }
 0x10f   : > { %v9565_v51 = vsel %vm2850_vm11, %v2908_v17, %v12735_v16  ;;  %v972_v23 = vrot.slane %v958_v48, %v9148_v15  ;;  %v9573_v7 = vsel %vm2841_vm10, %v1206_v31, %v9356_v55  ;;  %v9577_v53 = vsel %vm2850_vm11, %v2907_v30, %v9315_v63  ;;  %v679_v31 = vpop.permute.xlu0 %678 }
 0x110   : > { %12736 = vst [vmem:[#allocation41_spill] sm:$0xff] %v9565_v51  ;;  %12737 = vst [vmem:[#allocation42_spill] sm:$0xff] %v9573_v7  ;;  %v1403_v27 = vrot.slane %v1381_v25, %v9148_v15  ;;  %v702_v36 = vsel %vm658_vm15, %v701_v5, 0.0  ;;  %v12738_v49 = vrot.slane %v9283_v34, %v9164_v29  ;;  %v9590_v48 = vsel %vm2850_vm11, %v2910_v46, %v9324_v18  ;;  %v682_v34 = vpop.permute.xlu1 %681 }
 0x111   : > { %12740 = vst [vmem:[#allocation44_spill] sm:$0xff] %v9590_v48  ;;  %v1411_v55 = vcombine.high %v9568_v13, %v9568_v13  ;;  %v1416_v63 = vcombine.high %v702_v36, %v702_v36  ;;  %v9595_v47 = vrot.slane %v1380_v62, %v9148_v15  ;;  %v2921_v5 = vsel %vm2859_vm13, %v2913_v4, %v2648_v0 }
 0x112   : > { %v9586_v6 = vsel %vm2850_vm11, %v2909_v54, %v12738_v49  ;;  %v1413_v52 = vcombine.high %v1403_v27, %v1403_v27  ;;  %v973_v39 = vcombine.high %v965_v56, %v965_v56  ;;  %v9599_v38 = vrot.slane %v1382_v32, %v9148_v15 }
 0x113   : > { %12739 = vst [vmem:[#allocation43_spill] sm:$0xff] %v9586_v6  ;;  %12741 = vst [vmem:[#allocation45_spill] sm:$0xff] %v9595_v47  ;;  %v974_v17 = vcombine.high %v972_v23, %v972_v23  ;;  %v680_v18 = vsel %vm633_vm1, %v679_v31, 0.0  ;;  %v683_v25 = vsel %vm636_vm0, %v682_v34, 0.0  ;;  %v1412_v62 = vcombine.high %v9595_v47, %v9595_v47  ;;  %v713_v21 = vpop.permute.xlu0 %712 }
 0x114   : > { %12742 = vst [vmem:[#allocation46_spill] sm:$0xff] %v9599_v38  ;;  %v2688_v0 = vrot.slane %v1403_v27, %v9164_v29  ;;  %v1423_v37 = vrot.slane %v702_v36, %v9148_v15  ;;  %v1414_v54 = vcombine.high %v9599_v38, %v9599_v38  ;;  %v9614_v20 = vrot.slane %v1411_v55, %v9164_v29  ;;  %v716_v48 = vpop.permute.xlu1 %715 }
 0x115   : > { %v9617_v46 = vrot.slane %v965_v56, %v9148_v15  ;;  %v1430_v61 = vrot.slane %v1416_v63, %v9148_v15  ;;  %v9621_v4 = vrot.slane %v1413_v52, %v9164_v29  ;;  %v9626_v32 = vrot.slane %v972_v23, %v9148_v15 }
 0x116   : > { %12743 = vst [vmem:[#allocation47_spill] sm:$0xff] %v9614_v20  ;;  %v995_v27 = vrot.slane %v973_v39, %v9148_v15  ;;  %v9632_v49 = vrot.slane %v974_v17, %v9148_v15  ;;  %v1008_v55 = vcombine.high %v680_v18, %v680_v18  ;;  %v9637_v63 = vrot.slane %v1412_v62, %v9164_v29 }
 0x117   : > { %12744 = vst [vmem:[#allocation48_spill] sm:$0xff] %v9621_v4  ;;  %12745 = vst [vmem:[#allocation49_spill] sm:$0xff] %v9626_v32  ;;  %v1003_v56 = vcombine.high %v9617_v46, %v9617_v46  ;;  %v9640_v52 = vsel %vm2868_vm9, %v2921_v5, %v2688_v0  ;;  %v1004_v23 = vcombine.high %v9626_v32, %v9626_v32  ;;  %vm661_vm12 = vcmp.lt.s32.totalorder %v9142_v12, 121 }
 0x118   : > { %12746 = vst [vmem:[#allocation50_spill] sm:$0xff] %v9632_v49  ;;  %12747 = vst [vmem:[#allocation51_spill] sm:$0xff] %v9637_v63  ;;  %v1431_v39 = vcombine.high %v1423_v37, %v1423_v37  ;;  %v9645_v31 = vrot.slane %v1414_v54, %v9164_v29  ;;  %v1005_v34 = vcombine.high %v995_v27, %v995_v27  ;;  %v710_v38 = vpop.permute.xlu1 %709 }
 0x119   : > { %v1432_v17 = vcombine.high %v1430_v61, %v1430_v61  ;;  %v1015_v16 = vrot.slane %v680_v18, %v9148_v15  ;;  %v1006_v36 = vcombine.high %v9632_v49, %v9632_v49  ;;  %v2408_v5 = vrot.slane %v995_v27, %v9164_v29 }
 0x11a   : > { %12748 = vst [vmem:[#allocation52_spill] sm:$0xff] %v9645_v31  ;;  %v9656_v30 = vrot.slane %v1003_v56, %v9164_v29  ;;  %v9661_v31 = vrot.slane %v1423_v37, %v9148_v15  ;;  %v1022_v18 = vrot.slane %v1008_v55, %v9148_v15  ;;  %v9665_v63 = vrot.slane %v1004_v23, %v9164_v29 }
 0x11b   : > { %v9668_v62 = vrot.slane %v1430_v61, %v9148_v15  ;;  %v9671_v27 = vrot.slane %v1431_v39, %v9148_v15  ;;  %v1058_v0 = vcombine.high %v683_v25, %v683_v25  ;;  %v9674_v56 = vrot.slane %v1005_v34, %v9164_v29 }
 0x11c   : > { %12749 = vst [vmem:[#allocation53_spill] sm:$0xff] %v9656_v30  ;;  %12750 = vst [vmem:[#allocation54_spill] sm:$0xff] %v9665_v63  ;;  %v9677_v54 = vrot.slane %v1432_v17, %v9148_v15  ;;  %v1461_v37 = vcombine.high %v9661_v31, %v9661_v31  ;;  %v1023_v55 = vcombine.high %v1015_v16, %v1015_v16 }
 0x11d   : > { %12751 = vst [vmem:[#allocation55_spill] sm:$0xff] %v9668_v62  ;;  %v9682_v23 = vrot.slane %v1006_v36, %v9164_v29  ;;  %v9686_v61 = vsel %vm2868_vm9, %v9493_v1, %v2408_v5  ;;  %v1462_v39 = vcombine.high %v9668_v62, %v9668_v62  ;;  %v1463_v34 = vcombine.high %v9671_v27, %v9671_v27 }
 0x11e   : > { %12752 = vst [vmem:[#allocation56_spill] sm:$0xff] %v9677_v54  ;;  %v1464_v17 = vcombine.high %v9677_v54, %v9677_v54  ;;  %v1024_v19 = vcombine.high %v1022_v18, %v1022_v18  ;;  %v1065_v36 = vrot.slane %v683_v25, %v9148_v15  ;;  %v1072_v7 = vrot.slane %v1058_v0, %v9148_v15 }
 0x11f   : > { %12753 = vst [vmem:[#allocation57_spill] sm:$0xff] %v9682_v23  ;;  %v9703_v23 = vrot.slane %v1015_v16, %v9148_v15  ;;  %v9707_v45 = vrot.slane %v1461_v37, %v9164_v29  ;;  %v9710_v43 = vrot.slane %v1022_v18, %v9148_v15  ;;  %v9713_v25 = vrot.slane %v1023_v55, %v9148_v15 }
 0x120   : > { %v714_v1 = vsel %vm624_vm2, %v713_v21, 0.0  ;;  %v9718_v5 = vrot.slane %v1463_v34, %v9164_v29  ;;  %v9723_v0 = vrot.slane %v1462_v39, %v9164_v29  ;;  %v9726_v2 = vrot.slane %v1464_v17, %v9164_v29 }
 0x121   : > { %12754 = vst [vmem:[#allocation58_spill] sm:$0xff] %v9707_v45  ;;  %12755 = vst [vmem:[#allocation59_spill] sm:$0xff] %v9710_v43  ;;  %v1624_v37 = vcombine.high %v714_v1, %v714_v1  ;;  %v9729_v18 = vrot.slane %v1024_v19, %v9148_v15  ;;  %v1053_v55 = vcombine.high %v9703_v23, %v9703_v23  ;;  %v704_v19 = vpop.permute.xlu0 %703  ;;  %vm2877_vm2 = vcmask 1044480  }
 0x122   : > { %12756 = vst [vmem:[#allocation60_spill] sm:$0xff] %v9718_v5  ;;  %12757 = vst [vmem:[#allocation61_spill] sm:$0xff] %v9723_v0  ;;  %v1073_v21 = vcombine.high %v1065_v36, %v1065_v36  ;;  %v1054_v34 = vcombine.high %v9710_v43, %v9710_v43  ;;  %v1074_v39 = vcombine.high %v1072_v7, %v1072_v7  ;;  %v717_v0 = vsel %vm627_vm6, %v716_v48, 0.0 }
 0x123   : > { %12758 = vst [vmem:[#allocation62_spill] sm:$0xff] %v9726_v2  ;;  %12759 = vst [vmem:[#allocation63_spill] sm:$0xff] %v9729_v18  ;;  %v1055_v17 = vcombine.high %v9713_v25, %v9713_v25  ;;  %v1674_v33 = vcombine.high %v717_v0, %v717_v0  ;;  %v1056_v63 = vcombine.high %v9729_v18, %v9729_v18  ;;  %vm3608_vm6 = vcmask 244736  }
 0x124   : > { %v9748_v57 = vrot.slane %v1065_v36, %v9148_v15  ;;  %v1631_v16 = vrot.slane %v714_v1, %v9148_v15  ;;  %v1638_v48 = vrot.slane %v1624_v37, %v9148_v15  ;;  %v9753_v8 = vrot.slane %v1053_v55, %v9164_v29 }
 0x125   : > { %v9758_v62 = vrot.slane %v1072_v7, %v9148_v15  ;;  %v9761_v2 = vrot.slane %v1073_v21, %v9148_v15  ;;  %v9764_v43 = vrot.slane %v1054_v34, %v9164_v29  ;;  %v9767_v36 = vrot.slane %v1074_v39, %v9148_v15 }
 0x126   : > { %12760 = vst [vmem:[#allocation64_spill] sm:$0xff] %v9753_v8  ;;  %v1103_v1 = vcombine.high %v9748_v57, %v9748_v57  ;;  %v1681_v37 = vrot.slane %v717_v0, %v9148_v15  ;;  %v9773_v55 = vrot.slane %v1055_v17, %v9164_v29  ;;  %v1688_v34 = vrot.slane %v1674_v33, %v9148_v15 }
 0x127   : > { %12761 = vst [vmem:[#allocation65_spill] sm:$0xff] %v9758_v62  ;;  %12762 = vst [vmem:[#allocation66_spill] sm:$0xff] %v9764_v43  ;;  %v1104_v7 = vcombine.high %v9758_v62, %v9758_v62  ;;  %v1105_v21 = vcombine.high %v9761_v2, %v9761_v2  ;;  %v9781_v39 = vrot.slane %v1056_v63, %v9164_v29  ;;  %v705_v0 = vsel %vm661_vm12, %v704_v19, 0.0 }
 0x128   : > { %12763 = vst [vmem:[#allocation67_spill] sm:$0xff] %v9767_v36  ;;  %v1639_v43 = vcombine.high %v1631_v16, %v1631_v16  ;;  %v1640_v14 = vcombine.high %v1638_v48, %v1638_v48  ;;  %v1466_v54 = vcombine.high %v705_v0, %v705_v0  ;;  %v9792_v33 = vrot.slane %v1103_v1, %v9164_v29 }
 0x129   : > { %12764 = vst [vmem:[#allocation68_spill] sm:$0xff] %v9781_v39  ;;  %v1689_v19 = vcombine.high %v1681_v37, %v1681_v37  ;;  %v9799_v18 = vrot.slane %v1105_v21, %v9164_v29  ;;  %v9802_v17 = vrot.slane %v1104_v7, %v9164_v29  ;;  %v9805_v32 = vrot.slane %v1631_v16, %v9148_v15 }
 0x12a   : > { %12765 = vst [vmem:[#allocation69_spill] sm:$0xff] %v9792_v33  ;;  %v1690_v47 = vcombine.high %v1688_v34, %v1688_v34  ;;  %v9808_v1 = vrot.slane %v1638_v48, %v9148_v15  ;;  %v9811_v63 = vrot.slane %v1639_v43, %v9148_v15  ;;  %v9814_v39 = vrot.slane %v1640_v14, %v9148_v15  ;;  %v735_v33 = vpop.permute.xlu1 %734 }
 0x12b   : > { %12766 = vst [vmem:[#allocation70_spill] sm:$0xff] %v9799_v18  ;;  %12767 = vst [vmem:[#allocation71_spill] sm:$0xff] %v9802_v17  ;;  %v711_v21 = vsel %vm621_vm3, %v710_v38, 0.0  ;;  %v1669_v7 = vcombine.high %v9805_v32, %v9805_v32  ;;  %v9821_v16 = vrot.slane %v1681_v37, %v9148_v15  ;;  %v1473_v17 = vrot.slane %v705_v0, %v9148_v15 }
 0x12c   : > { %12768 = vst [vmem:[#allocation72_spill] sm:$0xff] %v9808_v1  ;;  %v1480_v48 = vrot.slane %v1466_v54, %v9148_v15  ;;  %v1671_v43 = vcombine.high %v9811_v63, %v9811_v63  ;;  %v1672_v14 = vcombine.high %v9814_v39, %v9814_v39  ;;  %v9830_v62 = vrot.slane %v1689_v19, %v9148_v15 }
 0x12d   : > { %v1566_v38 = vcombine.high %v711_v21, %v711_v21  ;;  %v2963_v36 = vrot.slane %v9805_v32, %v9164_v29  ;;  %v9835_v37 = vrot.slane %v1690_v47, %v9148_v15  ;;  %v1719_v0 = vcombine.high %v9821_v16, %v9821_v16 }
 0x12e   : > { %v1573_v54 = vrot.slane %v711_v21, %v9148_v15  ;;  %v2967_v49 = vrot.slane %v9811_v63, %v9164_v29  ;;  %v2979_v24 = vrot.slane %v9808_v1, %v9164_v29  ;;  %v9845_v19 = vrot.slane %v1688_v34, %v9148_v15 }
 0x12f   : > { %v1721_v32 = vcombine.high %v9830_v62, %v9830_v62  ;;  %v2971_v47 = vrot.slane %v1669_v7, %v9164_v29  ;;  %v2983_v40 = vrot.slane %v9814_v39, %v9164_v29  ;;  %v1722_v21 = vcombine.high %v9835_v37, %v9835_v37 }
 0x130   : > { %12769 = vst [vmem:[#allocation73_spill] sm:$0xff] %v9845_v19  ;;  %v1481_v6 = vcombine.high %v1473_v17, %v1473_v17  ;;  %v2975_v63 = vrot.slane %v1671_v43, %v9164_v29  ;;  %v9856_v60 = vrot.slane %v1672_v14, %v9164_v29  ;;  %v1482_v1 = vcombine.high %v1480_v48, %v1480_v48 }
 0x131   : > { %v1580_v34 = vrot.slane %v1566_v38, %v9148_v15  ;;  %v3003_v9 = vrot.slane %v9821_v16, %v9164_v29  ;;  %v3007_v7 = vrot.slane %v9830_v62, %v9164_v29  ;;  %v3011_v39 = vrot.slane %v1719_v0, %v9164_v29  ;;  %v707_v38 = vpop.permute.xlu0 %706 }
 0x132   : > { %v1581_v59 = vcombine.high %v1573_v54, %v1573_v54  ;;  %v3015_v51 = vrot.slane %v1721_v32, %v9164_v29  ;;  %v3019_v43 = vrot.slane %v9845_v19, %v9164_v29  ;;  %v9868_v14 = vrot.slane %v1473_v17, %v9148_v15 }
 0x133   : > { %v9871_v35 = vrot.slane %v1480_v48, %v9148_v15  ;;  %v3023_v16 = vrot.slane %v9835_v37, %v9164_v29  ;;  %v9876_v62 = vrot.slane %v1722_v21, %v9164_v29  ;;  %v9879_v0 = vrot.slane %v1481_v6, %v9148_v15 }
 0x134   : > { %v708_v32 = vsel %vm618_vm7, %v707_v38, 0.0  ;;  %v9884_v19 = vrot.slane %v1482_v1, %v9148_v15  ;;  %v1511_v17 = vcombine.high %v9868_v14, %v9868_v14  ;;  %v1582_v48 = vcombine.high %v1580_v34, %v1580_v34 }
 0x135   : > { %12770 = vst [vmem:[#allocation74_spill] sm:$0xff] %v9871_v35  ;;  %12771 = vst [vmem:[#allocation75_spill] sm:$0xff] %v9876_v62  ;;  %v1516_v45 = vcombine.high %v708_v32, %v708_v32  ;;  %v1512_v37 = vcombine.high %v9871_v35, %v9871_v35  ;;  %v1513_v21 = vcombine.high %v9879_v0, %v9879_v0  ;;  %v736_v8 = vsel %vm649_vm4, %v735_v33, 0.0  ;;  %v719_v10 = vpop.permute.xlu0 %718 }
 0x136   : > { %12772 = vst [vmem:[#allocation76_spill] sm:$0xff] %v9884_v19  ;;  %v1589_v6 = vrot.slane %v1573_v54, %v9148_v15  ;;  %v1603_v62 = vrot.slane %v1581_v59, %v9148_v15  ;;  %v1523_v20 = vrot.slane %v708_v32, %v9148_v15  ;;  %v9904_v22 = vrot.slane %v1580_v34, %v9148_v15 }
 0x137   : > { %v1610_v38 = vrot.slane %v1582_v48, %v9148_v15  ;;  %v1530_v32 = vrot.slane %v1516_v45, %v9148_v15  ;;  %v9913_v33 = vrot.slane %v1511_v17, %v9164_v29  ;;  %v9916_v50 = vrot.slane %v1513_v21, %v9164_v29 }
 0x138   : > { %12773 = vst [vmem:[#allocation77_spill] sm:$0xff] %v9904_v22  ;;  %v1611_v54 = vcombine.high %v1589_v6, %v1589_v6  ;;  %v1613_v59 = vcombine.high %v1603_v62, %v1603_v62  ;;  %v9919_v34 = vrot.slane %v1512_v37, %v9164_v29  ;;  %v2032_v35 = vcombine.high %v736_v8, %v736_v8 }
 0x139   : > { %12774 = vst [vmem:[#allocation78_spill] sm:$0xff] %v9913_v33  ;;  %12775 = vst [vmem:[#allocation79_spill] sm:$0xff] %v9916_v50  ;;  %v3440_v30 = vsel %vm2841_vm10, %v1589_v6, %v2963_v36  ;;  %v3441_v1 = vsel %vm2841_vm10, %v1603_v62, %v2967_v49  ;;  %v1531_v48 = vcombine.high %v1523_v20, %v1523_v20  ;;  %v720_v45 = vsel %vm630_vm14, %v719_v10, 0.0 }
 0x13a   : > { %12776 = vst [vmem:[#allocation80_spill] sm:$0xff] %v9919_v34  ;;  %v1614_v19 = vcombine.high %v1610_v38, %v1610_v38  ;;  %v3442_v21 = vsel %vm2841_vm10, %v1611_v54, %v2971_v47  ;;  %v3443_v33 = vsel %vm2841_vm10, %v1613_v59, %v2975_v63  ;;  %v3444_v37 = vsel %vm2841_vm10, %v9904_v22, %v2979_v24  ;;  %v722_v54 = vpop.permute.xlu0 %721 }
 0x13b   : > { %v1532_v50 = vcombine.high %v1530_v32, %v1530_v32  ;;  %v2039_v36 = vrot.slane %v736_v8, %v9148_v15  ;;  %v1724_v49 = vcombine.high %v720_v45, %v720_v45  ;;  %v9934_v6 = vsel %vm2850_vm11, %v3440_v30, %v3003_v9 }
 0x13c   : > { %v9937_v10 = vrot.slane %v1523_v20, %v9148_v15  ;;  %v2046_v47 = vrot.slane %v2032_v35, %v9148_v15  ;;  %v1731_v63 = vrot.slane %v720_v45, %v9148_v15  ;;  %v9942_v24 = vsel %vm2850_vm11, %v3441_v1, %v3007_v7 }
 0x13d   : > { %v9948_v8 = vsel %vm2850_vm11, %v3443_v33, %v3015_v51  ;;  %v9955_v9 = vsel %vm2841_vm10, %v1614_v19, %v9856_v60  ;;  %v9958_v35 = vsel %vm2850_vm11, %v3444_v37, %v3019_v43  ;;  %v9964_v20 = vrot.slane %v1530_v32, %v9148_v15 }
 0x13e   : > { %12778 = vst [vmem:[#allocation82_spill] sm:$0xff] %v9955_v9  ;;  %v9967_v7 = vrot.slane %v1532_v50, %v9148_v15  ;;  %v1561_v51 = vcombine.high %v9937_v10, %v9937_v10  ;;  %v1738_v1 = vrot.slane %v1724_v49, %v9148_v15  ;;  %v2048_v19 = vcombine.high %v2046_v47, %v2046_v47 }
 0x13f   : > { %12779 = vst [vmem:[#allocation83_spill] sm:$0xff] %v9964_v20  ;;  %v9975_v43 = vrot.slane %v2039_v36, %v9148_v15  ;;  %vm12805_vm3 = vcmp.lt.s32.totalorder %v9142_v12, 127  ;;  %vm2886_vm4 = vcmask 1045504   ;;  %vm12947_vm7 = vmmov 0  }
 0x140   : > { %12780 = vst [vmem:[#allocation84_spill] sm:$0xff] %v9967_v7  ;;  %v1740_v37 = vcombine.high %v1738_v1, %v1738_v1  ;;  %v10000_v49 = vrot.slane %v2048_v19, %v9148_v15  ;;  %vm6026_vm14 = vcmask 1047559  }
 0x142   : > { %12783 = vst [vmem:[#allocation87_spill] sm:$0xff] %v10000_v49 }
 0x14f   : > { %v9921_v58 = vpop.f32.mrb[0].mxu0 }
 0x150   : > { %12777 = vst [vmem:[#allocation81_spill] sm:$0xff] %v9921_v58  ;;  %v7877_v17 = vpop.f32.mrb[1].mxu0  ;;  %v3445_v58 = vsel %vm2841_vm10, %v1610_v38, %v2983_v40  ;;  %v9945_v40 = vsel %vm2850_vm11, %v3442_v21, %v3011_v39  ;;  %v9951_v38 = vrot.slane %v1531_v48, %v9148_v15  ;;  %v2047_v39 = vcombine.high %v2039_v36, %v2039_v36 }
 0x151   : > { %v611_v34 = vpop.f32.mrb[2].mxu0  ;;  %v9961_v30 = vsel %vm2850_vm11, %v3445_v58, %v3023_v16  ;;  %v1739_v58 = vcombine.high %v1731_v63, %v1731_v63  ;;  %v738_v16 = vpop.permute.xlu1 %737  ;;  %v9990_v48 = vrot.slane %v2046_v47, %v9148_v15  ;;  %v9993_v17 = vrot.slane %v1561_v51, %v9164_v29 }
 0x152   : > { %v7878_v62 = vpop.f32.mrb[3].mxu0  ;;  %v739_v32 = vsel %vm652_vm8, %v738_v16, 0.0  ;;  %v9996_v21 = vrot.slane %v2047_v39, %v9148_v15  ;;  %v1747_v36 = vrot.slane %v1731_v63, %v9148_v15  ;;  %v10008_v51 = vrot.slane %v1738_v1, %v9148_v15 }
 0x153   : > { %12781 = vst [vmem:[#allocation85_spill] sm:$0xff] %v9990_v48  ;;  %v2082_v45 = vcombine.high %v739_v32, %v739_v32  ;;  %12782 = vst [vmem:[#allocation86_spill] sm:$0xff] %v9993_v17  ;;  %v2077_v62 = vcombine.high %v9975_v43, %v9975_v43  ;;  %v1761_v16 = vrot.slane %v1739_v58, %v9148_v15  ;;  %v723_v63 = vsel %vm633_vm1, %v722_v54, 0.0 }
 0x154   : > { %12784 = vst [vmem:[#allocation88_spill] sm:$0xff] %v10008_v51  ;;  %v1769_v39 = vcombine.high %v1747_v36, %v1747_v36  ;;  %v2089_v33 = vrot.slane %v739_v32, %v9148_v15  ;;  %v2079_v19 = vcombine.high %v9996_v21, %v9996_v21  ;;  %v10021_v1 = vrot.slane %v1740_v37, %v9148_v15 }
 0x155   : > { %v1771_v50 = vcombine.high %v1761_v16, %v1761_v16  ;;  %v2096_v59 = vrot.slane %v2082_v45, %v9148_v15  ;;  %v3043_v32 = vrot.slane %v1747_v36, %v9164_v29  ;;  %v1774_v60 = vcombine.high %v723_v63, %v723_v63  ;;  %v732_v45 = vpop.permute.xlu1 %731 }
 0x156   : > { %12785 = vst [vmem:[#allocation89_spill] sm:$0xff] %v10021_v1  ;;  %v3047_v34 = vrot.slane %v1761_v16, %v9164_v29  ;;  %v1781_v22 = vrot.slane %v723_v63, %v9148_v15  ;;  %v3051_v9 = vrot.slane %v1769_v39, %v9164_v29  ;;  %v3059_v37 = vrot.slane %v10008_v51, %v9164_v29 }
 0x157   : > { %v2097_v58 = vcombine.high %v2089_v33, %v2089_v33  ;;  %v733_v36 = vsel %vm646_vm5, %v732_v45, 0.0  ;;  %v10036_v20 = vrot.slane %v2077_v62, %v9164_v29  ;;  %v10039_v54 = vrot.slane %v2079_v19, %v9164_v29 }
 0x158   : > { %v3055_v16 = vrot.slane %v1771_v50, %v9164_v29  ;;  %v2098_v47 = vcombine.high %v2096_v59, %v2096_v59  ;;  %v3063_v63 = vrot.slane %v10021_v1, %v9164_v29  ;;  %v3456_v39 = vsel %vm2859_vm13, %v9934_v6, %v3043_v32 }
 0x159   : > { %v1788_v51 = vrot.slane %v1774_v60, %v9148_v15  ;;  %v1974_v7 = vcombine.high %v733_v36, %v733_v36  ;;  %v3457_v62 = vsel %vm2859_vm13, %v9942_v24, %v3047_v34  ;;  %v1789_v19 = vcombine.high %v1781_v22, %v1781_v22 }
 0x15a   : > { %v1981_v17 = vrot.slane %v733_v36, %v9148_v15  ;;  %v3458_v50 = vsel %vm2859_vm13, %v9945_v40, %v3051_v9  ;;  %v3460_v5 = vsel %vm2859_vm13, %v9958_v35, %v3059_v37  ;;  %v2105_v6 = vrot.slane %v2089_v33, %v9148_v15 }
 0x15b   : > { %v2119_v60 = vrot.slane %v2097_v58, %v9148_v15  ;;  %v10060_v32 = vsel %vm2859_vm13, %v9948_v8, %v3055_v16  ;;  %v10063_v45 = vrot.slane %v2096_v59, %v9148_v15  ;;  %v10066_v24 = vrot.slane %v2098_v47, %v9148_v15  ;;  %v725_v58 = vpop.permute.xlu0 %724 }
 0x15c   : > { %12786 = vst [vmem:[#allocation90_spill] sm:$0xff] %v10060_v32  ;;  %v1797_v34 = vrot.slane %v1781_v22, %v9148_v15  ;;  %v10071_v40 = vsel %vm2859_vm13, %v9961_v30, %v3063_v63  ;;  %v2127_v9 = vcombine.high %v2105_v6, %v2105_v6  ;;  %v1790_v35 = vcombine.high %v1788_v51, %v1788_v51 }
 0x15d   : > { %12787 = vst [vmem:[#allocation91_spill] sm:$0xff] %v10063_v45  ;;  %12788 = vst [vmem:[#allocation92_spill] sm:$0xff] %v10066_v24  ;;  %v1988_v33 = vrot.slane %v1974_v7, %v9148_v15  ;;  %v2129_v37 = vcombine.high %v2119_v60, %v2119_v60  ;;  %v1811_v59 = vrot.slane %v1789_v19, %v9148_v15  ;;  %v726_v19 = vsel %vm636_vm0, %v725_v58, 0.0 }
 0x15e   : > { %12789 = vst [vmem:[#allocation93_spill] sm:$0xff] %v10071_v40  ;;  %v1989_v36 = vcombine.high %v1981_v17, %v1981_v17  ;;  %v3283_v47 = vrot.slane %v2105_v6, %v9164_v29  ;;  %v3287_v22 = vrot.slane %v2119_v60, %v9164_v29  ;;  %v10080_v16 = vrot.slane %v1788_v51, %v9148_v15  ;;  %v744_v51 = vpop.permute.xlu1 %743 }
 0x15f   : > { %v1819_v30 = vcombine.high %v1797_v34, %v1797_v34  ;;  %v3299_v63 = vrot.slane %v10063_v45, %v9164_v29  ;;  %v3083_v1 = vrot.slane %v1797_v34, %v9164_v29  ;;  %v10090_v8 = vrot.slane %v1790_v35, %v9148_v15  ;;  %v741_v4 = vpop.permute.xlu0 %740 }
 0x160   : > { %12790 = vst [vmem:[#allocation94_spill] sm:$0xff] %v10080_v16  ;;  %v1821_v6 = vcombine.high %v1811_v59, %v1811_v59  ;;  %v1990_v60 = vcombine.high %v1988_v33, %v1988_v33  ;;  %v1824_v40 = vcombine.high %v726_v19, %v726_v19  ;;  %v3291_v32 = vrot.slane %v2127_v9, %v9164_v29 }
 0x161   : > { %12791 = vst [vmem:[#allocation95_spill] sm:$0xff] %v10090_v8  ;;  %v3087_v18 = vrot.slane %v1811_v59, %v9164_v29  ;;  %v1997_v45 = vrot.slane %v1981_v17, %v9148_v15  ;;  %v2011_v7 = vrot.slane %v1989_v36, %v9148_v15  ;;  %v10097_v34 = vrot.slane %v2129_v37, %v9164_v29 }
 0x162   : > { %v3091_v58 = vrot.slane %v1819_v30, %v9164_v29  ;;  %v3099_v35 = vrot.slane %v10080_v16, %v9164_v29  ;;  %v745_v24 = vsel %vm658_vm15, %v744_v51, 0.0  ;;  %v10105_v9 = vsel %vm2868_vm9, %v3456_v39, %v3083_v1  ;;  %v747_v8 = vpop.permute.xlu1 %746 }
 0x163   : > { %v10108_v59 = vrot.slane %v1988_v33, %v9148_v15  ;;  %v2019_v17 = vcombine.high %v1997_v45, %v1997_v45  ;;  %v1831_v36 = vrot.slane %v726_v19, %v9148_v15  ;;  %v10112_v37 = vrot.slane %v1821_v6, %v9164_v29 }
 0x164   : > { %v10117_v16 = vrot.slane %v1990_v60, %v9148_v15  ;;  %v1838_v51 = vrot.slane %v1824_v40, %v9148_v15  ;;  %v10121_v1 = vsel %vm2868_vm9, %v3457_v62, %v3087_v18  ;;  %v12794_v39 = vrot.slane %v9975_v43, %v9164_v29 }
 0x165   : > { %12792 = vst [vmem:[#allocation96_spill] sm:$0xff] %v10108_v59  ;;  %v12795_v19 = vrot.slane %v9996_v21, %v9164_v29  ;;  %v2189_v30 = vrot.slane %v745_v24, %v9148_v15  ;;  %v10133_v60 = vsel %vm2868_vm9, %v3458_v50, %v3091_v58  ;;  %v10136_v40 = vsel %vm2868_vm9, %v3460_v5, %v3099_v35  ;;  %v729_v35 = vpop.permute.xlu0 %728 }
 0x166   : > { %12793 = vst [vmem:[#allocation97_spill] sm:$0xff] %v10117_v16  ;;  %v3496_v33 = vsel %vm2841_vm10, %v1997_v45, %v12794_v39  ;;  %12796 = vst [vmem:[#allocation98_spill] sm:$0xff] %v10133_v60  ;;  %v2021_v18 = vcombine.high %v2011_v7, %v2011_v7  ;;  %v2182_v62 = vcombine.high %v745_v24, %v745_v24  ;;  %vm12799_vm0 = vcmp.lt.s32.totalorder %v9142_v12, 123 }
 0x167   : > { %v3497_v6 = vsel %vm2841_vm10, %v2011_v7, %v12795_v19  ;;  %12797 = vst [vmem:[#allocation99_spill] sm:$0xff] %v10136_v40  ;;  %v3498_v43 = vsel %vm2841_vm10, %v2019_v17, %v10036_v20  ;;  %v12798_v45 = vrot.slane %v9990_v48, %v9164_v29  ;;  %v1839_v39 = vcombine.high %v1831_v36, %v1831_v36 }
 0x168   : > { %v742_v50 = vsel %vm12799_vm0, %v741_v4, 0.0  ;;  %v12800_v5 = vrot.slane %v10000_v49, %v9164_v29  ;;  %v10155_v7 = vsel %vm2850_vm11, %v3496_v33, %v3283_v47  ;;  %v10158_v20 = vsel %vm2850_vm11, %v3497_v6, %v3287_v22 }
 0x169   : > { %v3500_v21 = vsel %vm2841_vm10, %v10108_v59, %v12798_v45  ;;  %v1840_v58 = vcombine.high %v1838_v51, %v1838_v51  ;;  %v1847_v17 = vrot.slane %v1831_v36, %v9148_v15  ;;  %v2197_v4 = vcombine.high %v2189_v30, %v2189_v30 }
 0x16a   : > { %v10152_v24 = vsel %vm2841_vm10, %v10117_v16, %v12800_v5  ;;  %v2132_v19 = vcombine.high %v742_v50, %v742_v50  ;;  %v748_v45 = vsel %vm661_vm12, %v747_v8, 0.0  ;;  %v10165_v5 = vsel %vm2841_vm10, %v2021_v18, %v10039_v54 }
 0x16b   : > { %12801 = vst [vmem:[#allocation100_spill] sm:$0xff] %v10152_v24  ;;  %v10168_v47 = vrot.slane %v1838_v51, %v9148_v15  ;;  %v2196_v22 = vrot.slane %v2182_v62, %v9148_v15  ;;  %v2139_v33 = vrot.slane %v742_v50, %v9148_v15  ;;  %v10173_v6 = vsel %vm2850_vm11, %v3498_v43, %v3291_v32  ;;  %v10190_v62 = vld [vmem:[%s9101_s23] sm:$0xff] }
 0x16c   : > { %12803 = vst [vmem:[#allocation102_spill] sm:$0xff] %v10173_v6  ;;  %v10176_v36 = vsel %vm2850_vm11, %v3500_v21, %v3299_v63  ;;  %v10179_v59 = vrot.slane %v1839_v39, %v9148_v15  ;;  %v10183_v54 = vsel %vm12805_vm3, %v729_v35, 0.0  ;;  %v10186_v8 = vrot.slane %v1840_v58, %v9148_v15 }
 0x16d   : > { %12802 = vst [vmem:[#allocation101_spill] sm:$0xff] %v10168_v47  ;;  %12804 = vst [vmem:[#allocation103_spill] sm:$0xff] %v10176_v36  ;;  %v1869_v51 = vcombine.high %v1847_v17, %v1847_v17  ;;  %v2239_v18 = vrot.slane %v748_v45, %v9148_v15  ;;  %v1115_v32 = vrot.slane %v10190_v62, %v9148_v15  ;;  %vm2895_vm5 = vcmask 1046528  }
 0x16e   : > { %12806 = vst [vmem:[#allocation104_spill] sm:$0xff] %v10186_v8  ;;  %v1871_v63 = vcombine.high %v10179_v59, %v10179_v59  ;;  %v3123_v43 = vrot.slane %v1847_v17, %v9164_v29  ;;  %v10198_v21 = vrot.slane %v2197_v4, %v9148_v15  ;;  %v2146_v39 = vrot.slane %v2132_v19, %v9148_v15 }
 0x16f   : > { %v2198_v58 = vcombine.high %v2196_v22, %v2196_v22  ;;  %v10204_v35 = vrot.slane %v2189_v30, %v9148_v15  ;;  %v2147_v12 = vcombine.high %v2139_v33, %v2139_v33  ;;  %v10209_v16 = vrot.slane %v2196_v22, %v9148_v15 }
 0x170   : > { %v2229_v17 = vcombine.high %v10198_v21, %v10198_v21  ;;  %v2232_v4 = vcombine.high %v748_v45, %v748_v45  ;;  %v10214_v19 = vrot.slane %v1869_v51, %v9164_v29  ;;  %v10217_v50 = vrot.slane %v2139_v33, %v9148_v15 }
 0x171   : > { %v2247_v49 = vcombine.high %v2239_v18, %v2239_v18  ;;  %v1931_v30 = vrot.slane %v10183_v54, %v9148_v15  ;;  %v10222_v36 = vrot.slane %v1871_v63, %v9164_v29  ;;  %v10228_v48 = vsel %vm2877_vm2, %v10105_v9, %v3123_v43 }
 0x172   : > { %12807 = vst [vmem:[#allocation105_spill] sm:$0xff] %v10214_v19  ;;  %v2148_v45 = vcombine.high %v2146_v39, %v2146_v39  ;;  %v10231_v51 = vrot.slane %v2198_v58, %v9148_v15  ;;  %v3363_v40 = vrot.slane %v10204_v35, %v9164_v29  ;;  %v10238_v63 = vrot.slane %v2147_v12, %v9148_v15 }
 0x173   : > { %v10243_v8 = vrot.slane %v2229_v17, %v9164_v29  ;;  %v10246_v9 = vrot.slane %v2232_v4, %v9148_v15  ;;  %v10249_v43 = vrot.slane %v2239_v18, %v9148_v15  ;;  %v3323_v33 = vrot.slane %v10217_v50, %v9164_v29 }
 0x174   : > { %v2179_v58 = vcombine.high %v10238_v63, %v10238_v63  ;;  %v10256_v12 = vrot.slane %v2247_v49, %v9148_v15  ;;  %v1939_v47 = vcombine.high %v1931_v30, %v1931_v30  ;;  %v10259_v22 = vrot.slane %v2146_v39, %v9148_v15 }
 0x175   : > { %v10262_v17 = vrot.slane %v2148_v45, %v9148_v15  ;;  %v10267_v4 = vrot.slane %v1115_v32, %v9148_v15  ;;  %v10272_v6 = vrot.slane %v1931_v30, %v9148_v15  ;;  %v12810_v39 = vrot.slane %v9342_v41, %v9164_v29 }
 0x176   : > { %12808 = vst [vmem:[#allocation106_spill] sm:$0xff] %v10259_v22  ;;  %v2279_v24 = vcombine.high %v10256_v12, %v10256_v12  ;;  %v10275_v49 = vrot.slane %v1939_v47, %v9148_v15  ;;  %v3327_v60 = vrot.slane %v10238_v63, %v9164_v29  ;;  %v1123_v30 = vcombine.high %v1115_v32, %v1115_v32 }
 0x177   : > { %12809 = vst [vmem:[#allocation107_spill] sm:$0xff] %v10262_v17  ;;  %v2860_v45 = vsel %vm2859_vm13, %v9433_v26, %v12810_v39  ;;  %v10289_v17 = vrot.slane %v2179_v58, %v9164_v29  ;;  %v3512_v47 = vsel %vm2859_vm13, %v10155_v7, %v3323_v33  ;;  %v3403_v41 = vrot.slane %v10249_v43, %v9164_v29 }
 0x178   : > { %v1971_v26 = vcombine.high %v10275_v49, %v10275_v49  ;;  %v3407_v39 = vrot.slane %v10256_v12, %v9164_v29  ;;  %v2524_v63 = vrot.slane %v10267_v4, %v9164_v29  ;;  %v12811_v32 = vrot.slane %v9617_v46, %v9164_v29 }
 0x179   : > { %v10306_v7 = vrot.slane %v2279_v24, %v9164_v29  ;;  %v3203_v33 = vrot.slane %v10272_v6, %v9164_v29  ;;  %v3207_v19 = vrot.slane %v10275_v49, %v9164_v29  ;;  %v12812_v18 = vrot.slane %v9703_v23, %v9164_v29 }
 0x17a   : > { %v2869_v58 = vsel %vm2868_vm9, %v2860_v45, %v12811_v32  ;;  %v12813_v24 = vrot.slane %v9449_v28, %v9164_v29  ;;  %v1145_v32 = vrot.slane %v1123_v30, %v9148_v15  ;;  %v10325_v49 = vrot.slane %v1971_v26, %v9164_v29 }
 0x17b   : > { %v2878_v46 = vsel %vm2877_vm2, %v2869_v58, %v12812_v18  ;;  %v12814_v12 = vrot.slane %v9748_v57, %v9164_v29  ;;  %v12815_v23 = vrot.slane %v9568_v13, %v9164_v29  ;;  %v12816_v28 = vrot.slane %v9713_v25, %v9164_v29 }
 0x17c   : > { %v2920_v45 = vsel %vm2859_vm13, %v9548_v42, %v12813_v24  ;;  %v12817_v26 = vrot.slane %v9661_v31, %v9164_v29  ;;  %v2528_v58 = vrot.slane %v1145_v32, %v9164_v29  ;;  %v12818_v13 = vrot.slane %v9761_v2, %v9164_v29  ;;  %v10368_v24 = vld [vmem:[%s12585_s4] sm:$0xff]  }
 0x17d   : > { %v2887_v22 = vsel %vm2886_vm4, %v2878_v46, %v12814_v12  ;;  %v2928_v18 = vsel %vm2868_vm9, %v2920_v45, %v12815_v23  ;;  %v2879_v42 = vsel %vm2877_vm2, %v9686_v61, %v12816_v28  ;;  %v12819_v25 = vrot.slane %v9868_v14, %v9164_v29  ;;  %7883 = vmatprep.mubr.msk.bf16.mxu1 %vm3608_vm6, %v10368_v24 }
 0x17e   : > { %v2896_v30 = vsel %vm2895_vm5, %v2887_v22, %v2524_v63  ;;  %v2936_v57 = vsel %vm2877_vm2, %v2928_v18, %v12817_v26  ;;  %v2888_v12 = vsel %vm2886_vm4, %v2879_v42, %v12818_v13  ;;  %v12820_v61 = vrot.slane %v9671_v27, %v9164_v29  ;;  %v10360_v22 = vld [vmem:[%s9133_s5] sm:$0xff]  ;;  %7903 = vmatprep.mubr.msk.bf16.mxu0 %vm3608_vm6, %v10368_v24 }
 0x17f   : > { %v2944_v46 = vsel %vm2886_vm4, %v2936_v57, %v12819_v25  ;;  %v1881_v63 = vrot.slane %v10360_v22, %v9148_v15  ;;  %v3520_v2 = vsel %vm2868_vm9, %v3512_v47, %v3363_v40  ;;  %v12821_v14 = vrot.slane %v9937_v10, %v9164_v29 }
 0x180   : > { %v2937_v31 = vsel %vm2877_vm2, %v9640_v52, %v12820_v61  ;;  %v2897_v45 = vsel %vm2895_vm5, %v2888_v12, %v2528_v58  ;;  %v12822_v52 = vrot.slane %v9879_v0, %v9164_v29  ;;  %v3528_v18 = vsel %vm2877_vm2, %v3520_v2, %v3403_v41 }
 0x181   : > { %v2952_v27 = vsel %vm2895_vm5, %v2944_v46, %v12821_v14  ;;  %v12823_v47 = vrot.slane %v9951_v38, %v9164_v29  ;;  %v10385_v42 = vrot.slane %v1881_v63, %v9148_v15  ;;  %v1889_v10 = vcombine.high %v1881_v63, %v1881_v63  ;;  %v5609_v63 = vld [vmem:[%s12587_s6] sm:$0xff] }
 0x182   : > { %v2945_v23 = vsel %vm2886_vm4, %v2937_v31, %v12822_v52  ;;  %v3536_v40 = vpack.c.bf16 %v2952_v27, %v2896_v30  ;;  %v12824_v57 = vrot.slane %v10179_v59, %v9164_v29  ;;  %v3513_v41 = vsel %vm2859_vm13, %v10158_v20, %v3327_v60  ;;  %v12828_v27 = vld [vmem:[#allocation70_spill] sm:$0xff] }
 0x183   : > { %v2953_v28 = vsel %vm2895_vm5, %v2945_v23, %v12823_v47  ;;  %v3163_v30 = vrot.slane %v10385_v42, %v9164_v29  ;;  %v1911_v58 = vrot.slane %v1889_v10, %v9148_v15  ;;  %v12825_v13 = vrot.slane %v10198_v21, %v9164_v29  ;;  %v5610_v21 = vld [vmem:[%s12587_s6 + $0x8] sm:$0xff]  ;;  %v10459_v10 = vld [vmem:[%s12585_s4 + $0x10] sm:$0xff]  }
 0x184   : > { %v10387_v26 = vpack.c.bf16 %v2953_v28, %v2897_v45  ;;  %v3473_v0 = vsel %vm2877_vm2, %v10121_v1, %v12824_v57  ;;  %7879 = vmatprep.subr.bf16.mxu1 %v3536_v40  ;;  %v1155_v1 = vcombine.high %v1145_v32, %v1145_v32  ;;  %v12826_v60 = vcombine.high %v9951_v38, %v9951_v38  ;;  %v5611_v28 = vld [vmem:[%s12587_s6 + $0x10] sm:$0xff] }
 0x185   : > { %v3521_v12 = vsel %vm2868_vm9, %v3513_v41, %v12825_v13  ;;  %7880 = vmatpush3.bf16.msra.mxu1 %v3536_v40  ;;  %v3480_v25 = vsel %vm2886_vm4, %v10228_v48, %v3163_v30  ;;  %v3167_v46 = vrot.slane %v1911_v58, %v9164_v29  ;;  %v2923_v48 = vsel %vm2859_vm13, %v9577_v53, %v9529_v3  ;;  %v12829_v53 = vld [vmem:[#allocation60_spill] sm:$0xff]  ;;  %v12830_v40 = vld [vmem:[#allocation79_spill] sm:$0xff]  ;;  %v12831_v41 = vld [vmem:[#allocation90_spill] sm:$0xff] }
 0x186   : > { %7899 = vmatprep.subr.bf16.mxu0 %v10387_v26  ;;  %v3529_v59 = vsel %vm2877_vm2, %v3521_v12, %v3407_v39  ;;  %v2816_v20 = vrot.slane %v12826_v60, %v9164_v29  ;;  %v2863_v39 = vsel %vm2859_vm13, %v9453_v11, %v9391_v44  ;;  %v3488_v38 = vsel %vm2895_vm5, %v3480_v25, %v3203_v33  ;;  %v12827_v33 = vld [vmem:[#allocation48_spill] sm:$0xff] }
 0x187   : > { %7900 = vmatpush3.bf16.msra.mxu0 %v10387_v26  ;;  %v2536_v32 = vrot.slane %v1155_v1, %v9164_v29  ;;  %v2872_v61 = vsel %vm2868_vm9, %v2863_v39, %v9674_v56  ;;  %v8848_v31 = vmov 0   ;;  %v3537_v2 = vpack.c.bf16 %v3528_v18, %v3488_v38  ;;  %v12836_v39 = vld [vmem:[#allocation37_spill] sm:$0xff]  ;;  %v12837_v38 = vld [vmem:[#allocation40_spill] sm:$0xff] }
 0x188   : > { %8294 = vset.pattern.permute.xlu1 %v8848_v31  ;;  %v3481_v44 = vsel %vm2886_vm4, %v3473_v0, %v3167_v46  ;;  %v2881_v11 = vsel %vm2877_vm2, %v2872_v61, %v9773_v55  ;;  %v2931_v14 = vsel %vm2868_vm9, %v2923_v48, %v12827_v33  ;;  %v1921_v52 = vcombine.high %v1911_v58, %v1911_v58  ;;  %v10448_v55 = vld [vmem:[%s12585_s4 + $0x8] sm:$0xff]   ;;  %v12835_v46 = vld [vmem:[#allocation53_spill] sm:$0xff]  ;;  %v12838_v61 = vld [vmem:[#allocation64_spill] sm:$0xff] }
 0x189   : > { %5632 = vperm.xlu1 %8294, %v5610_v21   ;;  %v3489_v56 = vsel %vm2895_vm5, %v3481_v44, %v3207_v19  ;;  %v2890_v3 = vsel %vm2886_vm4, %v2881_v11, %v12828_v27  ;;  %v2939_v45 = vsel %vm2877_vm2, %v2931_v14, %v12829_v53  ;;  %8293 = vset.pattern.permute.xlu0 %v8848_v31  ;;  %v3634_v23 = vsel %vm2895_vm5, %v3537_v2, 0  ;;  %v12834_v21 = vld [vmem:[#allocation31_spill] sm:$0xff]  ;;  %v12840_v44 = vld [vmem:[#allocation69_spill] sm:$0xff]  ;;  %v12841_v33 = vld [vmem:[#allocation58_spill] sm:$0xff] }
 0x18a   : > { %8203 = vmatprep.subr.msk.bf16.mxu1 %vm2895_vm5, %v3537_v2  ;;  %v3539_v18 = vpack.c.bf16 %v3529_v59, %v3489_v56  ;;  %v2899_v19 = vsel %vm2895_vm5, %v2890_v3, %v2536_v32  ;;  %v2947_v47 = vsel %vm2886_vm4, %v2939_v45, %v12830_v40  ;;  %5627 = vperm.xlu0 %8293, %v5609_v63   ;;  %v12839_v31 = vld [vmem:[#allocation47_spill] sm:$0xff]  ;;  %v12843_v45 = vld [vmem:[#allocation78_spill] sm:$0xff]  ;;  %vm6014_vm8 = vcmask 1041409  }
 0x18b   : > { %7882 = vmatpush3.bf16.msra.mxu1 %v3634_v23  ;;  %v2955_v57 = vsel %vm2895_vm5, %v2947_v47, %v2816_v20  ;;  %v3175_v0 = vrot.slane %v1921_v52, %v9164_v29  ;;  %v3467_v30 = vsel %vm2868_vm9, %v12831_v41, %v10112_v37  ;;  %v3507_v58 = vsel %vm2850_vm11, %v10165_v5, %v10097_v34  ;;  %v12833_v20 = vld [vmem:[#allocation27_spill] sm:$0xff]  ;;  %v10546_v23 = vld [vmem:[%s12585_s4 + $0x20] sm:$0xff]  }
 0x18c   : > { %8204 = vmatprep.subr.msk.bf16.mxu0 %vm2895_vm5, %v3539_v18  ;;  %v3734_v13 = vsel %vm2895_vm5, %v3539_v18, 0  ;;  %v3542_v12 = vpack.c.bf16 %v2955_v57, %v2899_v19  ;;  %v3475_v59 = vsel %vm2877_vm2, %v3467_v30, %v10222_v36  ;;  %v3515_v1 = vsel %vm2859_vm13, %v3507_v58, %v10289_v17  ;;  %8199 = vmatprep.subr.bf16.mxu1 %v10387_v26  ;;  %v12847_v58 = vld [vmem:[#allocation106_spill] sm:$0xff] }
 0x18d   : > { %7902 = vmatpush3.bf16.msra.mxu0 %v3734_v13  ;;  %v3483_v37 = vsel %vm2886_vm4, %v3475_v59, %v3175_v0  ;;  %v3523_v60 = vsel %vm2868_vm9, %v3515_v1, %v10243_v8  ;;  %5637 = vperm.xlu1 %8294, %v5611_v28   ;;  %v12832_v34 = vcombine.high %v10267_v4, %v10267_v4  ;;  %v5613_v4 = vld [vmem:[%s12587_s6 + $0x20] sm:$0xff]  ;;  %v5615_v0 = vld [vmem:[%s12587_s6 + $0x30] sm:$0xff]  ;;  %vm6022_vm12 = vcmask 1045509  }
 0x18e   : > { %7884 = vmatmul.mubr.msk.bf16.vlgmr.msra.gmra.mrb[0].mxu1 %vm3608_vm6, %v10448_v55  ;;  %7939 = vmatprep.subr.bf16.mxu0 %v3542_v12  ;;  %v3491_v36 = vsel %vm2895_vm5, %v3483_v37, %v10325_v49  ;;  %v3531_v17 = vsel %vm2877_vm2, %v3523_v60, %v10306_v7  ;;  %v2862_v8 = vsel %vm2859_vm13, %v12834_v21, %v12833_v20  ;;  %v12851_v20 = vld [vmem:[#allocation98_spill] sm:$0xff] }
 0x18f   : > { %v2532_v5 = vrot.slane %v12832_v34, %v9164_v29  ;;  %7887 = vmatprep.mubr.msk.bf16.mxu1 %vm3608_vm6, %v10459_v10  ;;  %v3543_v25 = vpack.c.bf16 %v3531_v17, %v3491_v36  ;;  %8201 = vmatpush3.bf16.msra.mxu1 %v10387_v26  ;;  %v2871_v49 = vsel %vm2868_vm9, %v2862_v8, %v12835_v46  ;;  %v5612_v26 = vld [vmem:[%s12587_s6 + $0x18] sm:$0xff] }
 0x190   : > { %v2922_v7 = vsel %vm2859_vm13, %v12837_v38, %v12836_v39  ;;  %v10505_v32 = vrot.slane %v10246_v9, %v9148_v15  ;;  %7904 = vmatmul.mubr.msk.bf16.vlgmr.msra.gmra.mrb[4].mxu0 %vm3608_vm6, %v10448_v55  ;;  %8205 = vmatprep.subr.msk.bf16.mxu1 %vm2895_vm5, %v3539_v18  ;;  %v2880_v48 = vsel %vm2877_vm2, %v2871_v49, %v12838_v61  ;;  %v12844_v18 = vld [vmem:[#allocation86_spill] sm:$0xff]  ;;  %v12850_v17 = vld [vmem:[#allocation105_spill] sm:$0xff]  ;;  %v12855_v39 = vld [vmem:[#allocation84_spill] sm:$0xff] }
 0x191   : > { %v2930_v63 = vsel %vm2868_vm9, %v2922_v7, %v12839_v31  ;;  %v2277_v2 = vcombine.high %v10249_v43, %v10249_v43  ;;  %7907 = vmatprep.mubr.msk.bf16.mxu0 %vm3608_vm6, %v10459_v10  ;;  %7940 = vmatpush3.bf16.msra.mxu0 %v3542_v12  ;;  %v2889_v11 = vsel %vm2886_vm4, %v2880_v48, %v12840_v44  ;;  %v10534_v43 = vld [vmem:[%s12585_s4 + $0x18] sm:$0xff]   ;;  %v3934_v3 = vsel %vm2895_vm5, %v3543_v25, 0  ;;  %v5614_v12 = vld [vmem:[%s12587_s6 + $0x28] sm:$0xff]  ;;  %v12856_v7 = vld [vmem:[#allocation26_spill] sm:$0xff] }
 0x192   : > { %v2938_v14 = vsel %vm2877_vm2, %v2930_v63, %v12841_v33  ;;  %v12842_v56 = vcombine.high %v10183_v54, %v10183_v54  ;;  %8207 = vmatprep.subr.msk.bf16.mxu0 %vm2895_vm5, %v3543_v25  ;;  %5647 = vperm.xlu1 %8294, %v5613_v4   ;;  %v2898_v53 = vsel %vm2895_vm5, %v2889_v11, %v2532_v5  ;;  %v12852_v25 = vld [vmem:[#allocation35_spill] sm:$0xff]  ;;  %v12854_v46 = vld [vmem:[#allocation41_spill] sm:$0xff]  ;;  %v12859_v31 = vld [vmem:[#allocation36_spill] sm:$0xff] }
 0x193   : > { %v2946_v52 = vsel %vm2886_vm4, %v2938_v14, %v12843_v45  ;;  %v1969_v54 = vcombine.high %v10272_v6, %v10272_v6  ;;  %5642 = vperm.xlu0 %8293, %v5612_v26   ;;  %8202 = vmatpush3.bf16.msra.mxu1 %v3734_v13  ;;  %v1108_v40 = vcombine.high %v10190_v62, %v10190_v62  ;;  %v12858_v61 = vld [vmem:[#allocation33_spill] sm:$0xff]  ;;  %v10624_v11 = vld [vmem:[%s12585_s4 + $0x28] sm:$0xff]   ;;  %v12865_v45 = vld [vmem:[#allocation50_spill] sm:$0xff] }
 0x194   : > { %v10529_v27 = vrot.slane %v12842_v56, %v9148_v15  ;;  %v2954_v19 = vsel %vm2895_vm5, %v2946_v52, %v12844_v18  ;;  %v12845_v47 = vcombine.high %v10204_v35, %v10204_v35  ;;  %v3379_v6 = vrot.slane %v10209_v16, %v9164_v29  ;;  %v12862_v33 = vld [vmem:[#allocation25_spill] sm:$0xff]  ;;  %v12864_v56 = vld [vmem:[#allocation32_spill] sm:$0xff]  ;;  %v12867_v18 = vld [vmem:[#allocation46_spill] sm:$0xff] }
 0x195   : > { %v10558_v57 = vpack.c.bf16 %v2954_v19, %v2898_v53  ;;  %v1919_v41 = vcombine.high %v10385_v42, %v10385_v42  ;;  %v3383_v62 = vrot.slane %v10231_v51, %v9164_v29  ;;  %v12846_v35 = vcombine.high %v10217_v50, %v10217_v50  ;;  %7942 = vmatpush3.bf16.msra.mxu0 %v3934_v3  ;;  %v12848_v42 = vld [vmem:[#allocation107_spill] sm:$0xff] }
 0x196   : > { %v3371_v28 = vrot.slane %v12845_v47, %v9164_v29  ;;  %v3339_v13 = vrot.slane %v12847_v58, %v9164_v29  ;;  %v1122_v59 = vrot.slane %v1108_v40, %v9148_v15  ;;  %v3343_v1 = vrot.slane %v12848_v42, %v9164_v29  ;;  %7888 = vmatmul.mubr.msk.bf16.gmra.mrb[4].mxu1 %vm3608_vm6, %v10534_v43  ;;  %v10645_v47 = vld [vmem:[%s12585_s4 + $0x30] sm:$0xff]  }
 0x197   : > { %v3331_v30 = vrot.slane %v12846_v35, %v9164_v29  ;;  %v12849_v37 = vcombine.high %v10246_v9, %v10246_v9  ;;  %v3411_v50 = vrot.slane %v2277_v2, %v9164_v29  ;;  %7919 = vmatprep.subr.bf16.mxu1 %v10558_v57  ;;  %v3419_v34 = vrot.slane %v10505_v32, %v9164_v29  ;;  %v12861_v2 = vld [vmem:[#allocation43_spill] sm:$0xff] }
 0x198   : > { %v1940_v5 = vcombine.high %v10529_v27, %v10529_v27  ;;  %v3211_v36 = vrot.slane %v1969_v54, %v9164_v29  ;;  %7891 = vmatprep.mubr.msk.bf16.mxu1 %vm3608_vm6, %v10546_v23  ;;  %5657 = vperm.xlu1 %8294, %v5615_v0   ;;  %v3171_v9 = vrot.slane %v1919_v41, %v9164_v29  ;;  %v12869_v0 = vld [vmem:[#allocation102_spill] sm:$0xff]  ;;  %v12870_v35 = vld [vmem:[#allocation63_spill] sm:$0xff] }
 0x199   : > { %v10583_v60 = vrot.slane %v12849_v37, %v9148_v15  ;;  %7908 = vmatmul.mubr.msk.bf16.gmra.mrb[8].mxu0 %vm3608_vm6, %v10534_v43  ;;  %5652 = vperm.xlu0 %8293, %v5614_v12   ;;  %v3474_v21 = vsel %vm2877_vm2, %v12851_v20, %v12850_v17  ;;  %v1124_v8 = vcombine.high %v1122_v59, %v1122_v59  ;;  %v12872_v17 = vld [vmem:[#allocation56_spill] sm:$0xff] }
 0x19a   : > { %7911 = vmatprep.mubr.msk.bf16.mxu0 %vm3608_vm6, %v10546_v23  ;;  %v12853_v4 = vrot.slane %v12852_v25, %v9164_v29  ;;  %v2824_v38 = vrot.slane %v12855_v39, %v9164_v29  ;;  %v12857_v26 = vrot.slane %v12856_v7, %v9164_v29  ;;  %v12860_v63 = vrot.slane %v12859_v31, %v9164_v29  ;;  %v12874_v25 = vld [vmem:[#allocation81_spill] sm:$0xff] }
 0x19b   : > { %v12863_v14 = vrot.slane %v12862_v33, %v9164_v29  ;;  %v10632_v53 = vrot.slane %v1124_v8, %v9148_v15  ;;  %v12866_v52 = vrot.slane %v12865_v45, %v9164_v29  ;;  %v12868_v19 = vrot.slane %v12867_v18, %v9164_v29 }
 0x19c   : > { %v2924_v49 = vsel %vm2859_vm13, %v12854_v46, %v12853_v4  ;;  %v2865_v48 = vsel %vm2859_vm13, %v12858_v61, %v12857_v26  ;;  %v2925_v44 = vsel %vm2859_vm13, %v12861_v2, %v12860_v63  ;;  %v3514_v41 = vsel %vm2859_vm13, %v12869_v0, %v3331_v30  ;;  %v12875_v46 = vld [vmem:[#allocation45_spill] sm:$0xff]  ;;  %v12877_v61 = vld [vmem:[#allocation67_spill] sm:$0xff]  ;;  %v12879_v63 = vld [vmem:[#allocation76_spill] sm:$0xff] }
 0x19d   : > { %v2864_v3 = vsel %vm2859_vm13, %v12864_v56, %v12863_v14  ;;  %v2874_v54 = vsel %vm2868_vm9, %v2865_v48, %v12866_v52  ;;  %v2933_v40 = vsel %vm2868_vm9, %v2925_v44, %v12868_v19  ;;  %v12871_v12 = vrot.slane %v12870_v35, %v9164_v29  ;;  %v12881_v14 = vld [vmem:[#allocation49_spill] sm:$0xff] }
 0x19e   : > { %v12873_v20 = vrot.slane %v12872_v17, %v9164_v29  ;;  %v10659_v4 = vrot.slane %v12874_v25, %v9164_v29  ;;  %v12876_v7 = vrot.slane %v12875_v46, %v9164_v29  ;;  %v2544_v30 = vrot.slane %v10632_v53, %v9164_v29  ;;  %v12883_v52 = vld [vmem:[#allocation21_spill] sm:$0xff]  ;;  %7892 = vmatmul.mubr.msk.bf16.gmra.mrb[8].mxu1 %vm3608_vm6, %v10624_v11  ;;  %v12888_v17 = vld [vmem:[#allocation92_spill] sm:$0xff] }
 0x19f   : > { %v2883_v37 = vsel %vm2877_vm2, %v2874_v54, %v12871_v12  ;;  %v12878_v48 = vrot.slane %v12877_v61, %v9164_v29  ;;  %v12880_v2 = vrot.slane %v12879_v63, %v9164_v29  ;;  %v3482_v33 = vsel %vm2886_vm4, %v3474_v21, %v3171_v9  ;;  %7895 = vmatprep.mubr.msk.bf16.mxu1 %vm3608_vm6, %v10645_v47 }
 0x1a0   : > { %v2941_v8 = vsel %vm2877_vm2, %v2933_v40, %v12873_v20  ;;  %v2932_v26 = vsel %vm2868_vm9, %v2924_v49, %v12876_v7  ;;  %v12882_v56 = vrot.slane %v12881_v14, %v9164_v29  ;;  %v4502_v54 = vsub.s32 1, %v12883_v52  ;;  %4442 = vbcast.lane.b32.xlu1 %v10659_v4, 264  ;;  %v10729_v7 = vld [vmem:[%s12585_s4 + $0x38] sm:$0xff]   ;;  %4438 = vbcast.lane.b32.xlu0 %v10659_v4, 256 }
 0x1a1   : > { %v2892_v31 = vsel %vm2886_vm4, %v2883_v37, %v12878_v48  ;;  %v2949_v44 = vsel %vm2886_vm4, %v2941_v8, %v12880_v2  ;;  %v3423_v18 = vrot.slane %v10583_v60, %v9164_v29  ;;  %v3522_v19 = vsel %vm2868_vm9, %v3514_v41, %v3371_v28  ;;  %7912 = vmatmul.mubr.msk.bf16.gmra.mrb[12].mxu0 %vm3608_vm6, %v10624_v11  ;;  %v12886_v41 = vld [vmem:[#allocation59_spill] sm:$0xff]  ;;  %v12890_v8 = vld [vmem:[#allocation100_spill] sm:$0xff] }
 0x1a2   : > { %v2873_v49 = vsel %vm2868_vm9, %v2864_v3, %v12882_v56  ;;  %v2957_v45 = vsel %vm2895_vm5, %v2949_v44, %v2824_v38  ;;  %v10689_v9 = vrot.slane %v1122_v59, %v9148_v15  ;;  %v2901_v21 = vsel %vm2895_vm5, %v2892_v31, %v2544_v30  ;;  %v12884_v3 = vld [vmem:[#allocation55_spill] sm:$0xff]  ;;  %7943 = vmatprep.mubr.msk.bf16.mxu0 %vm3608_vm6, %v10368_v24  ;;  %v12891_v30 = vld [vmem:[#allocation74_spill] sm:$0xff] }
 0x1a3   : > { %v10694_v38 = vrot.slane %v10529_v27, %v9148_v15  ;;  %v12885_v40 = vrot.slane %v12884_v3, %v9164_v29  ;;  %v3546_v35 = vpack.c.bf16 %v2957_v45, %v2901_v21  ;;  %v1874_v28 = vcombine.high %v10360_v22, %v10360_v22  ;;  %v12895_v45 = vld [vmem:[#allocation95_spill] sm:$0xff] }
 0x1a4   : > { %v10705_v59 = vrot.slane %v1940_v5, %v9148_v15  ;;  %v3490_v27 = vsel %vm2895_vm5, %v3482_v33, %v3211_v36  ;;  %v12887_v12 = vrot.slane %v12886_v41, %v9164_v29  ;;  %v12889_v20 = vrot.slane %v12888_v17, %v9164_v29  ;;  %v12893_v33 = vld [vmem:[#allocation65_spill] sm:$0xff] }
 0x1a5   : > { %v2940_v0 = vsel %vm2877_vm2, %v2932_v26, %v12885_v40  ;;  %v3530_v22 = vsel %vm2877_vm2, %v3522_v19, %v3411_v50  ;;  %7979 = vmatprep.subr.bf16.mxu0 %v3546_v35  ;;  %v10723_v5 = vrot.slane %v12874_v25, %v4502_v54  ;;  %v1888_v36 = vrot.slane %v1874_v28, %v9148_v15  ;;  %v12897_v19 = vld [vmem:[#allocation93_spill] sm:$0xff]  ;;  %v12898_v28 = vld [vmem:[#allocation83_spill] sm:$0xff] }
 0x1a6   : > { %v2882_v37 = vsel %vm2877_vm2, %v2873_v49, %v12887_v12  ;;  %v3509_v46 = vsel %vm2850_vm11, %v12890_v8, %v12889_v20  ;;  %v2540_v26 = vrot.slane %v10689_v9, %v9164_v29  ;;  %v12892_v48 = vrot.slane %v12891_v30, %v9164_v29  ;;  %v12900_v20 = vld [vmem:[#allocation28_spill] sm:$0xff]  ;;  %v12901_v8 = vld [vmem:[#allocation34_spill] sm:$0xff]  ;;  %7896 = vmatmul.mubr.msk.bf16.gmra.mrb[12].mxu1 %vm3608_vm6, %v10729_v7 }
 0x1a7   : > { %v4569_v50 = vsub.s32 2, %v12883_v52  ;;  %v3517_v2 = vsel %vm2859_vm13, %v3509_v46, %v3343_v1  ;;  %v3219_v44 = vrot.slane %v10694_v38, %v9164_v29  ;;  %v12894_v14 = vrot.slane %v12893_v33, %v9164_v29  ;;  %4509 = vbcast.lane.b32.xlu1 %v10723_v5, 264  ;;  %7915 = vmatprep.mubr.msk.bf16.mxu1 %vm3608_vm6, %v10645_v47 }
 0x1a8   : > { %v2948_v31 = vsel %vm2886_vm4, %v2940_v0, %v12892_v48  ;;  %v1890_v49 = vcombine.high %v1888_v36, %v1888_v36  ;;  %v12896_v54 = vrot.slane %v12895_v45, %v9164_v29  ;;  %v3223_v1 = vrot.slane %v10705_v59, %v9164_v29  ;;  %v12904_v48 = vld [vmem:[#allocation99_spill] sm:$0xff]  ;;  %4505 = vbcast.lane.b32.xlu0 %v10723_v5, 256 }
 0x1a9   : > { %v2891_v56 = vsel %vm2886_vm4, %v2882_v37, %v12894_v14  ;;  %v3541_v3 = vpack.c.bf16 %v3530_v22, %v3490_v27  ;;  %v10758_v40 = vrot.slane %v1888_v36, %v9148_v15  ;;  %v3525_v0 = vsel %vm2868_vm9, %v3517_v2, %v3383_v62  ;;  %v12902_v36 = vld [vmem:[#allocation101_spill] sm:$0xff]  ;;  %v12905_v2 = vld [vmem:[#allocation104_spill] sm:$0xff]  ;;  %7944 = vmatmul.mubr.msk.bf16.vlgmr.msra.gmra.mrb[16].mxu0 %vm3608_vm6, %v10448_v55 }
 0x1aa   : > { %v3469_v21 = vsel %vm2868_vm9, %v12897_v19, %v12896_v54  ;;  %v12899_v41 = vrot.slane %v12898_v28, %v9164_v29  ;;  %v10769_v37 = vrot.slane %v1890_v49, %v9148_v15  ;;  %v2866_v27 = vsel %vm2859_vm13, %v12901_v8, %v12900_v20  ;;  %v12908_v19 = vld [vmem:[#allocation54_spill] sm:$0xff]  ;;  %v12910_v20 = vld [vmem:[#allocation44_spill] sm:$0xff]  ;;  %7947 = vmatprep.mubr.msk.bf16.mxu0 %vm3608_vm6, %v10459_v10 }
 0x1ab   : > { %v1156_v46 = vcombine.high %v10632_v53, %v10632_v53  ;;  %v2900_v62 = vsel %vm2895_vm5, %v2891_v56, %v2540_v26  ;;  %v10780_v22 = vrot.slane %v12874_v25, %v4569_v50  ;;  %v12903_v30 = vrot.slane %v12902_v36, %v9164_v29  ;;  %v12907_v53 = vld [vmem:[#allocation103_spill] sm:$0xff]  ;;  %7980 = vmatpush3.bf16.msra.mxu0 %v3546_v35 }
 0x1ac   : > { %v2956_v12 = vsel %vm2895_vm5, %v2948_v31, %v12899_v41  ;;  %v12906_v33 = vrot.slane %v12905_v2, %v9164_v29  ;;  %v3516_v26 = vsel %vm2859_vm13, %v12907_v53, %v3339_v13  ;;  %v3183_v50 = vrot.slane %v10769_v37, %v9164_v29  ;;  %v12909_v41 = vld [vmem:[#allocation38_spill] sm:$0xff] }
 0x1ad   : > { %v3476_v31 = vsel %vm2877_vm2, %v12904_v48, %v12903_v30  ;;  %v3533_v56 = vsel %vm2877_vm2, %v3525_v0, %v3423_v18  ;;  %v1154_v49 = vcombine.high %v10689_v9, %v10689_v9  ;;  %v3179_v54 = vrot.slane %v10758_v40, %v9164_v29  ;;  %v12914_v53 = vld [vmem:[#allocation30_spill] sm:$0xff]  ;;  %4576 = vbcast.lane.b32.xlu1 %v10780_v22, 264 }
 0x1ae   : > { %v3477_v14 = vsel %vm2877_vm2, %v3469_v21, %v12906_v33  ;;  %v2875_v21 = vsel %vm2868_vm9, %v2866_v27, %v12908_v19  ;;  %v2926_v13 = vsel %vm2859_vm13, %v12910_v20, %v12909_v41  ;;  %v12911_v18 = vcombine.high %v12877_v61, %v12877_v61  ;;  %v12913_v33 = vld [vmem:[#allocation23_spill] sm:$0xff]  ;;  %v12915_v19 = vld [vmem:[#allocation24_spill] sm:$0xff]  ;;  %v12916_v41 = vld [vmem:[#allocation42_spill] sm:$0xff]  ;;  %7916 = vmatmul.mubr.msk.bf16.vlgmr.msra.gmra.mrb[16].mxu1 %vm3608_vm6, %v10729_v7 }
 0x1af   : > { %v3485_v9 = vsel %vm2886_vm4, %v3477_v14, %v3183_v50  ;;  %v2552_v8 = vrot.slane %v1156_v46, %v9164_v29  ;;  %v12912_v27 = vcombine.high %v12879_v63, %v12879_v63  ;;  %v2858_v61 = vsel %vm2850_vm11, %v12914_v53, %v12913_v33  ;;  %v12918_v14 = vld [vmem:[#allocation29_spill] sm:$0xff]  ;;  %v12919_v50 = vld [vmem:[#allocation39_spill] sm:$0xff]  ;;  %v12922_v53 = vld [vmem:[#allocation52_spill] sm:$0xff]  ;;  %7920 = vmatpush3.bf16.msra.mxu1 %v10558_v57 }
 0x1b0   : > { %v2512_v0 = vrot.slane %v12911_v18, %v9164_v29  ;;  %v3493_v48 = vsel %vm2895_vm5, %v3485_v9, %v3223_v1  ;;  %v2919_v20 = vsel %vm2850_vm11, %v12916_v41, %v12915_v19  ;;  %v12917_v63 = vcombine.high %v12855_v39, %v12855_v39  ;;  %7923 = vmatprep.mubr.msk.bf16.mxu1 %vm3608_vm6, %v10368_v24 }
 0x1b1   : > { %v2792_v30 = vrot.slane %v12912_v27, %v9164_v29  ;;  %v3547_v35 = vpack.c.bf16 %v3533_v56, %v3493_v48  ;;  %v2867_v1 = vsel %vm2859_vm13, %v2858_v61, %v12918_v14  ;;  %v2927_v18 = vsel %vm2859_vm13, %v2919_v20, %v12919_v50  ;;  %v12920_v27 = vld [vmem:[#allocation51_spill] sm:$0xff]  ;;  %v12921_v56 = vld [vmem:[#allocation57_spill] sm:$0xff]  ;;  %v12923_v61 = vld [vmem:[#allocation66_spill] sm:$0xff]  ;;  %7948 = vmatmul.mubr.msk.bf16.gmra.mrb[20].mxu0 %vm3608_vm6, %v10534_v43 }
 0x1b2   : > { %v2832_v46 = vrot.slane %v12917_v63, %v9164_v29  ;;  %v3524_v9 = vsel %vm2868_vm9, %v3516_v26, %v3379_v6  ;;  %v2934_v33 = vsel %vm2868_vm9, %v2926_v13, %v12920_v27  ;;  %v2876_v48 = vsel %vm2868_vm9, %v2867_v1, %v12921_v56  ;;  %v12924_v20 = vld [vmem:[#allocation68_spill] sm:$0xff]  ;;  %v12925_v6 = vld [vmem:[#allocation62_spill] sm:$0xff]  ;;  %8206 = vmatprep.subr.msk.bf16.mxu1 %vm2895_vm5, %v3541_v3  ;;  %v12932_v56 = vld [vmem:[#allocation89_spill] sm:$0xff] }
 0x1b3   : > { %v2935_v39 = vsel %vm2868_vm9, %v2927_v18, %v12922_v53  ;;  %8209 = vmatprep.subr.msk.bf16.mxu0 %vm2895_vm5, %v3547_v35  ;;  %v2884_v19 = vsel %vm2877_vm2, %v2875_v21, %v12923_v61  ;;  %v4134_v41 = vsel %vm2895_vm5, %v3547_v35, 0  ;;  %v2885_v63 = vsel %vm2877_vm2, %v2876_v48, %v12924_v20  ;;  %v12926_v35 = vld [vmem:[#allocation61_spill] sm:$0xff]  ;;  %7951 = vmatprep.mubr.msk.bf16.mxu0 %vm3608_vm6, %v10546_v23  ;;  %v12935_v61 = vld [vmem:[#allocation75_spill] sm:$0xff] }
 0x1b4   : > { %v2943_v26 = vsel %vm2877_vm2, %v2935_v39, %v12925_v6  ;;  %v3484_v13 = vsel %vm2886_vm4, %v3476_v31, %v3179_v54  ;;  %7982 = vmatpush3.bf16.msra.mxu0 %v4134_v41  ;;  %v2894_v14 = vsel %vm2886_vm4, %v2885_v63, %v2512_v0  ;;  %v4636_v21 = vsub.s32 3, %v12883_v52  ;;  %4572 = vbcast.lane.b32.xlu0 %v10780_v22, 256  ;;  %v12934_v53 = vld [vmem:[#allocation97_spill] sm:$0xff] }
 0x1b5   : > { %v2951_v1 = vsel %vm2886_vm4, %v2943_v26, %v2792_v30  ;;  %v2942_v50 = vsel %vm2877_vm2, %v2934_v33, %v12926_v35  ;;  %v2903_v18 = vsel %vm2895_vm5, %v2894_v14, %v2552_v8  ;;  %v3834_v31 = vsel %vm2895_vm5, %v3541_v3, 0  ;;  %4513 = vbcast.lane.b32.xlu1 %v10723_v5, 272  ;;  %v12937_v35 = vld [vmem:[#allocation72_spill] sm:$0xff] }
 0x1b6   : > { %v2959_v27 = vsel %vm2895_vm5, %v2951_v1, %v2832_v46  ;;  %v3544_v57 = vpack.c.bf16 %v2956_v12, %v2900_v62  ;;  %v3532_v54 = vsel %vm2877_vm2, %v3524_v9, %v3419_v34  ;;  %v3492_v8 = vsel %vm2895_vm5, %v3484_v13, %v3219_v44  ;;  %v12928_v62 = vld [vmem:[#allocation71_spill] sm:$0xff]  ;;  %v12929_v9 = vld [vmem:[#allocation80_spill] sm:$0xff]  ;;  %7922 = vmatpush3.bf16.msra.mxu1 %v3834_v31 }
 0x1b7   : > { %v10880_v0 = vpack.c.bf16 %v2959_v27, %v2903_v18  ;;  %v2548_v30 = vrot.slane %v1154_v49, %v9164_v29  ;;  %v12927_v3 = vcombine.high %v12898_v28, %v12898_v28  ;;  %v1822_v34 = vcombine.high %v12895_v45, %v12895_v45  ;;  %v12930_v44 = vld [vmem:[#allocation87_spill] sm:$0xff] }
 0x1b8   : > { %v2893_v46 = vsel %vm2886_vm4, %v2884_v19, %v12928_v62  ;;  %v2950_v33 = vsel %vm2886_vm4, %v2942_v50, %v12929_v9  ;;  %v12931_v28 = vcombine.high %v12930_v44, %v12930_v44  ;;  %v12933_v48 = vcombine.high %v12932_v56, %v12932_v56  ;;  %v12936_v19 = vld [vmem:[#allocation82_spill] sm:$0xff]  ;;  %7959 = vmatprep.subr.bf16.mxu1 %v3544_v57  ;;  %v12941_v56 = vld [vmem:[#allocation85_spill] sm:$0xff] }
 0x1b9   : > { %v2828_v12 = vrot.slane %v12927_v3, %v9164_v29  ;;  %8019 = vmatprep.subr.bf16.mxu0 %v10880_v0  ;;  %v2022_v39 = vcombine.high %v12934_v53, %v12934_v53  ;;  %v3455_v41 = vsel %vm2850_vm11, %v12936_v19, %v12935_v61  ;;  %v10916_v20 = vrot.slane %v12874_v25, %v4636_v21  ;;  %v12939_v3 = vld [vmem:[#allocation73_spill] sm:$0xff]  ;;  %v12943_v19 = vld [vmem:[#allocation91_spill] sm:$0xff] }
 0x1ba   : > { %v3271_v49 = vrot.slane %v12931_v28, %v9164_v29  ;;  %v3071_v45 = vrot.slane %v12933_v48, %v9164_v29  ;;  %v4703_v63 = vsub.s32 4, %v12883_v52  ;;  %v3545_v6 = vpack.c.bf16 %v3532_v54, %v3492_v8  ;;  %4446 = vbcast.lane.b32.xlu0 %v10659_v4, 272  ;;  %7924 = vmatmul.mubr.msk.bf16.vlgmr.msra.gmra.mrb[20].mxu1 %vm3608_vm6, %v10448_v55 }
 0x1bb   : > { %v1872_v26 = vcombine.high %v12905_v2, %v12905_v2  ;;  %v2180_v13 = vcombine.high %v12848_v42, %v12848_v42  ;;  %v2902_v14 = vsel %vm2895_vm5, %v2893_v46, %v2548_v30  ;;  %v2958_v1 = vsel %vm2895_vm5, %v2950_v33, %v2828_v12  ;;  %4643 = vbcast.lane.b32.xlu1 %v10916_v20, 264  ;;  %v12940_v46 = vld [vmem:[#allocation77_spill] sm:$0xff] }
 0x1bc   : > { %v1670_v50 = vcombine.high %v12937_v35, %v12937_v35  ;;  %v12938_v21 = vcombine.high %v12888_v17, %v12888_v17  ;;  %v3111_v27 = vrot.slane %v1822_v34, %v9164_v29  ;;  %v3463_v42 = vsel %vm2859_vm13, %v3455_v41, %v3071_v45  ;;  %7960 = vmatpush3.bf16.msra.mxu1 %v3544_v57  ;;  %v12942_v45 = vld [vmem:[#allocation88_spill] sm:$0xff] }
 0x1bd   : > { %v3503_v2 = vsel %vm2841_vm10, %v2022_v39, %v3271_v49  ;;  %v2230_v31 = vcombine.high %v10231_v51, %v10231_v51  ;;  %7927 = vmatprep.mubr.msk.bf16.mxu1 %vm3608_vm6, %v10459_v10  ;;  %7952 = vmatmul.mubr.msk.bf16.gmra.mrb[24].mxu0 %vm3608_vm6, %v10624_v11  ;;  %v10945_v17 = vrot.slane %v12874_v25, %v4703_v63  ;;  %v4034_v54 = vsel %vm2895_vm5, %v3545_v6, 0 }
 0x1be   : > { %v3311_v18 = vrot.slane %v12938_v21, %v9164_v29  ;;  %8208 = vmatprep.subr.msk.bf16.mxu1 %vm2895_vm5, %v3545_v6  ;;  %v10949_v8 = vpack.c.bf16 %v2958_v1, %v2902_v14  ;;  %v1922_v30 = vcombine.high %v10769_v37, %v10769_v37  ;;  %v3151_v51 = vrot.slane %v1872_v26, %v9164_v29  ;;  %v12944_v26 = vld [vmem:[#allocation94_spill] sm:$0xff] }
 0x1bf   : > { %v3351_v57 = vrot.slane %v2180_v13, %v9164_v29  ;;  %7955 = vmatprep.mubr.msk.bf16.mxu0 %vm3608_vm6, %v10645_v47  ;;  %4639 = vbcast.lane.b32.xlu0 %v10916_v20, 256  ;;  %v1720_v12 = vcombine.high %v12939_v3, %v12939_v3  ;;  %v3471_v34 = vsel %vm2868_vm9, %v3463_v42, %v3111_v27  ;;  %v4770_v14 = vsub.s32 5, %v12883_v52 }
 0x1c0   : > { %4706 = vbcast.lane.b32.xlu1 %v10945_v17, 256  ;;  %v3511_v62 = vsel %vm2850_vm11, %v3503_v2, %v3311_v18  ;;  %v2987_v37 = vrot.slane %v1670_v50, %v9164_v29  ;;  %v1612_v9 = vcombine.high %v12940_v46, %v12940_v46  ;;  %v2280_v33 = vcombine.high %v10583_v60, %v10583_v60  ;;  %v12945_v18 = vld [vmem:[#allocation96_spill] sm:$0xff] }
 0x1c1   : > { %v1972_v44 = vcombine.high %v10705_v59, %v10705_v59  ;;  %7962 = vmatpush3.bf16.msra.mxu1 %v4034_v54  ;;  %v3391_v28 = vrot.slane %v2230_v31, %v9164_v29  ;;  %v3191_v49 = vrot.slane %v1922_v30, %v9164_v29  ;;  %v2078_v48 = vcombine.high %v12941_v56, %v12941_v56 }
 0x1c2   : > { %7999 = vmatprep.subr.bf16.mxu1 %v10949_v8  ;;  %v1770_v53 = vcombine.high %v12942_v45, %v12942_v45  ;;  %v3479_v60 = vsel %vm2877_vm2, %v3471_v34, %v3151_v51  ;;  %v3519_v39 = vsel %vm2859_vm13, %v3511_v62, %v3351_v57  ;;  %v3027_v59 = vrot.slane %v1720_v12, %v9164_v29 }
 0x1c3   : > { %4580 = vbcast.lane.b32.xlu0 %v10780_v22, 272  ;;  %7928 = vmatmul.mubr.msk.bf16.gmra.mrb[24].mxu1 %vm3608_vm6, %v10534_v43  ;;  %v3446_v61 = vsel %vm2841_vm10, %v1612_v9, %v2987_v37  ;;  %v2128_v41 = vcombine.high %v12943_v19, %v12943_v19  ;;  %v3431_v63 = vrot.slane %v2280_v33, %v9164_v29  ;;  %v4904_v19 = vsub.s32 7, %v12883_v52 }
 0x1c4   : > { %4450 = vbcast.lane.b32.xlu1 %v10659_v4, 280  ;;  %v3231_v6 = vrot.slane %v1972_v44, %v9164_v29  ;;  %7931 = vmatprep.mubr.msk.bf16.mxu1 %vm3608_vm6, %v10546_v23  ;;  %v1820_v13 = vcombine.high %v12944_v26, %v12944_v26  ;;  %v3487_v1 = vsel %vm2886_vm4, %v3479_v60, %v3191_v49  ;;  %v4837_v44 = vsub.s32 6, %v12883_v52 }
 0x1c5   : > { %7956 = vmatmul.mubr.msk.bf16.gmra.mrb[28].mxu0 %vm3608_vm6, %v10729_v7  ;;  %v3527_v35 = vsel %vm2868_vm9, %v3519_v39, %v3391_v28  ;;  %v3267_v50 = vrot.slane %v2078_v48, %v9164_v29  ;;  %v3067_v21 = vrot.slane %v1770_v53, %v9164_v29  ;;  %v2020_v27 = vcombine.high %v12945_v18, %v12945_v18 }
 0x1c6   : > { %7983 = vmatprep.mubr.msk.bf16.mxu0 %vm3608_vm6, %v10368_v24  ;;  %v3454_v42 = vsel %vm2850_vm11, %v3446_v61, %v3027_v59  ;;  %v1870_v2 = vcombine.high %v12902_v36, %v12902_v36  ;;  %v2178_v31 = vcombine.high %v12847_v58, %v12847_v58  ;;  %v3495_v54 = vsel %vm2895_vm5, %v3487_v1, %v3231_v6 }
 0x1c7   : > { %4710 = vbcast.lane.b32.xlu0 %v10945_v17, 264  ;;  %v3535_v30 = vsel %vm2877_vm2, %v3527_v35, %v3431_v63  ;;  %v3307_v51 = vrot.slane %v2128_v41, %v9164_v29  ;;  %v3107_v57 = vrot.slane %v1820_v13, %v9164_v29  ;;  %v11016_v3 = vrot.slane %v12874_v25, %v4770_v14 }
 0x1c8   : > { %4647 = vbcast.lane.b32.xlu1 %v10916_v20, 272  ;;  %v3462_v12 = vsel %vm2859_vm13, %v3454_v42, %v3067_v21  ;;  %v3502_v34 = vsel %vm2841_vm10, %v2020_v27, %v3267_v50  ;;  %v2228_v58 = vcombine.high %v10209_v16, %v10209_v16  ;;  %v1920_v36 = vcombine.high %v10758_v40, %v10758_v40 }
 0x1c9   : > { %v3551_v62 = vpack.c.bf16 %v3535_v30, %v3495_v54  ;;  %v3147_v37 = vrot.slane %v1870_v2, %v9164_v29  ;;  %v3347_v46 = vrot.slane %v2178_v31, %v9164_v29  ;;  %v3470_v16 = vsel %vm2868_vm9, %v3462_v12, %v3107_v57 }
 0x1ca   : > { %v3510_v9 = vsel %vm2850_vm11, %v3502_v34, %v3307_v51  ;;  %v2278_v40 = vcombine.high %v10505_v32, %v10505_v32  ;;  %v1970_v33 = vcombine.high %v10694_v38, %v10694_v38  ;;  %v3387_v28 = vrot.slane %v2228_v58, %v9164_v29 }
 0x1cb   : > { %4517 = vbcast.lane.b32.xlu0 %v10723_v5, 280  ;;  %7932 = vmatmul.mubr.msk.bf16.gmra.mrb[28].mxu1 %vm3608_vm6, %v10624_v11  ;;  %v3187_v49 = vrot.slane %v1920_v36, %v9164_v29  ;;  %v4334_v56 = vsel %vm2895_vm5, %v3551_v62, 0  ;;  %v3478_v32 = vsel %vm2877_vm2, %v3470_v16, %v3147_v37  ;;  %v3518_v38 = vsel %vm2859_vm13, %v3510_v9, %v3347_v46  ;;  %v5616_v46 = vld [vmem:[%s12587_s6 + $0x38] sm:$0xff] }
 0x1cc   : > { %4777 = vbcast.lane.b32.xlu1 %v11016_v3, 264  ;;  %7935 = vmatprep.mubr.msk.bf16.mxu1 %vm3608_vm6, %v10645_v47  ;;  %v3227_v48 = vrot.slane %v1970_v33, %v9164_v29  ;;  %v11055_v45 = vrot.slane %v12874_v25, %v4837_v44  ;;  %v3526_v60 = vsel %vm2868_vm9, %v3518_v38, %v3387_v28  ;;  %v5617_v38 = vld [vmem:[%s12587_s6 + $0x40] sm:$0xff]  ;;  %vm6016_vm9 = vcmask 1042434  }
 0x1cd   : > { %7984 = vmatmul.mubr.msk.bf16.vlgmr.msra.gmra.mrb[32].mxu0 %vm3608_vm6, %v10448_v55  ;;  %v3486_v53 = vsel %vm2886_vm4, %v3478_v32, %v3187_v49  ;;  %v11090_v52 = vrot.slane %v12874_v25, %v4904_v19  ;;  %v7392_v32 = vld [vmem:[%s9077_s26] sm:$0xff]   ;;  %vm6018_vm10 = vcmask 1043459   ;;  %vm6020_vm11 = vcmask 1044484  }
 0x1ce   : > { %8020 = vmatpush3.bf16.msra.mxu0 %v10880_v0  ;;  %7987 = vmatprep.mubr.msk.bf16.mxu0 %vm3608_vm6, %v10459_v10  ;;  %v3427_v0 = vrot.slane %v2278_v40, %v9164_v29  ;;  %v12946_v29 = vmov 0.0   ;;  %v3494_v39 = vsel %vm2895_vm5, %v3486_v53, %v3227_v48  ;;  %v7654_v53 = vld [vmem:[%s9077_s26 + $0x40] sm:$0xff]   ;;  %vm6024_vm13 = vcmask 1046534  }
 0x1cf   : > { %8211 = vmatprep.subr.msk.bf16.mxu0 %vm2895_vm5, %v3551_v62  ;;  %4773 = vbcast.lane.b32.xlu0 %v11016_v3, 256 }
 0x1d0   : > { %4714 = vbcast.lane.b32.xlu1 %v10945_v17, 272  ;;  %v3534_v59 = vsel %vm2877_vm2, %v3526_v60, %v3427_v0 }
 0x1d1   : > { %v3549_v61 = vpack.c.bf16 %v3534_v59, %v3494_v39  ;;  %v7393_v59 = vunpack.c.l.bf16 %v7392_v32 }
 0x1d2   : > { %8022 = vmatpush3.bf16.msra.mxu0 %v4334_v56  ;;  %v7647_v56 = vld [vmem:[%s9077_s26 + $0x8] sm:$0xff]  }
 0x1d3   : > { %7936 = vmatmul.mubr.msk.bf16.gmra.mrb[32].mxu1 %vm3608_vm6, %v10729_v7  ;;  %4584 = vbcast.lane.b32.xlu0 %v10780_v22, 280  ;;  %v4234_v41 = vsel %vm2895_vm5, %v3549_v61, 0  ;;  %v7397_v48 = vunpack.c.l.bf16 %v7647_v56 }
 0x1d4   : > { %7963 = vmatprep.mubr.msk.bf16.mxu1 %vm3608_vm6, %v10368_v24  ;;  %4844 = vbcast.lane.b32.xlu1 %v11055_v45, 264 }
 0x1d5   : > { %7988 = vmatmul.mubr.msk.bf16.gmra.mrb[36].mxu0 %vm3608_vm6, %v10534_v43  ;;  %8059 = vmatprep.subr.bf16.mxu0 %v12946_v29 }
 0x1d6   : > { %7991 = vmatprep.mubr.msk.bf16.mxu0 %vm3608_vm6, %v10546_v23 }
 0x1d7   : > { %4840 = vbcast.lane.b32.xlu0 %v11055_v45, 256 }
 0x1d8   : > { %4521 = vbcast.lane.b32.xlu1 %v10723_v5, 288 }
 0x1db   : > { %7964 = vmatmul.mubr.msk.bf16.vlgmr.msra.gmra.mrb[36].mxu1 %vm3608_vm6, %v10448_v55  ;;  %4454 = vbcast.lane.b32.xlu0 %v10659_v4, 288 }
 0x1dc   : > { %8000 = vmatpush3.bf16.msra.mxu1 %v10949_v8  ;;  %7967 = vmatprep.mubr.msk.bf16.mxu1 %vm3608_vm6, %v10459_v10 }
 0x1dd   : > { %7992 = vmatmul.mubr.msk.bf16.gmra.mrb[40].mxu0 %vm3608_vm6, %v10624_v11  ;;  %8210 = vmatprep.subr.msk.bf16.mxu1 %vm2895_vm5, %v3549_v61  ;;  %v7655_v61 = vld [vmem:[%s9077_s26 + $0x48] sm:$0xff]  }
 0x1de   : > { %7995 = vmatprep.mubr.msk.bf16.mxu0 %vm3608_vm6, %v10645_v47  ;;  %4781 = vbcast.lane.b32.xlu1 %v11016_v3, 272 }
 0x1df   : > { %4651 = vbcast.lane.b32.xlu0 %v10916_v20, 280 }
 0x1e0   : > { %8002 = vmatpush3.bf16.msra.mxu1 %v4234_v41 }
 0x1e1   : > { %8039 = vmatprep.subr.bf16.mxu1 %v12946_v29 }
 0x1e2   : > { %4911 = vbcast.lane.b32.xlu1 %v11090_v52, 264 }
 0x1e3   : > { %7968 = vmatmul.mubr.msk.bf16.gmra.mrb[40].mxu1 %vm3608_vm6, %v10534_v43  ;;  %4907 = vbcast.lane.b32.xlu0 %v11090_v52, 256 }
 0x1e4   : > { %7971 = vmatprep.mubr.msk.bf16.mxu1 %vm3608_vm6, %v10546_v23 }
 0x1e5   : > { %7996 = vmatmul.mubr.msk.bf16.gmra.mrb[44].mxu0 %vm3608_vm6, %v10729_v7 }
 0x1e6   : > { %8023 = vmatprep.mubr.msk.bf16.mxu0 %vm3608_vm6, %v10368_v24  ;;  %4718 = vbcast.lane.b32.xlu1 %v10945_v17, 280 }
 0x1e7   : > { %4588 = vbcast.lane.b32.xlu0 %v10780_v22, 288 }
 0x1ea   : > { %4458 = vbcast.lane.b32.xlu1 %v10659_v4, 296 }
 0x1eb   : > { %7972 = vmatmul.mubr.msk.bf16.gmra.mrb[44].mxu1 %vm3608_vm6, %v10624_v11  ;;  %4848 = vbcast.lane.b32.xlu0 %v11055_v45, 272 }
 0x1ec   : > { %7975 = vmatprep.mubr.msk.bf16.mxu1 %vm3608_vm6, %v10645_v47 }
 0x1ed   : > { %8024 = vmatmul.mubr.msk.bf16.vlgmr.msra.gmra.mrb[48].mxu0 %vm3608_vm6, %v10448_v55 }
 0x1ee   : > { %8027 = vmatprep.mubr.msk.bf16.mxu0 %vm3608_vm6, %v10459_v10  ;;  %4655 = vbcast.lane.b32.xlu1 %v10916_v20, 288 }
 0x1ef   : > { %4525 = vbcast.lane.b32.xlu0 %v10723_v5, 296 }
 0x1f2   : > { %4915 = vbcast.lane.b32.xlu1 %v11090_v52, 272 }
 0x1f3   : > { %7976 = vmatmul.mubr.msk.bf16.gmra.mrb[48].mxu1 %vm3608_vm6, %v10729_v7  ;;  %4785 = vbcast.lane.b32.xlu0 %v11016_v3, 280 }
 0x1f4   : > { %8003 = vmatprep.mubr.msk.bf16.mxu1 %vm3608_vm6, %v10368_v24 }
 0x1f5   : > { %8028 = vmatmul.mubr.msk.bf16.gmra.mrb[52].mxu0 %vm3608_vm6, %v10534_v43 }
 0x1f6   : > { %8031 = vmatprep.mubr.msk.bf16.mxu0 %vm3608_vm6, %v10546_v23  ;;  %4592 = vbcast.lane.b32.xlu1 %v10780_v22, 296 }
 0x1f7   : > { %4722 = vbcast.lane.b32.xlu0 %v10945_v17, 288 }
 0x1fa   : > { %4852 = vbcast.lane.b32.xlu1 %v11055_v45, 280 }
 0x1fb   : > { %8004 = vmatmul.mubr.msk.bf16.vlgmr.msra.gmra.mrb[52].mxu1 %vm3608_vm6, %v10448_v55  ;;  %4462 = vbcast.lane.b32.xlu0 %v10659_v4, 304 }
 0x1fc   : > { %8007 = vmatprep.mubr.msk.bf16.mxu1 %vm3608_vm6, %v10459_v10 }
 0x1fd   : > { %8032 = vmatmul.mubr.msk.bf16.gmra.mrb[56].mxu0 %vm3608_vm6, %v10624_v11 }
 0x1fe   : > { %4529 = vbcast.lane.b32.xlu1 %v10723_v5, 304  ;;  %8035 = vmatprep.mubr.msk.bf16.mxu0 %vm3608_vm6, %v10645_v47 }
 0x1ff   : > { %4659 = vbcast.lane.b32.xlu0 %v10916_v20, 296 }
 0x202   : > { %4789 = vbcast.lane.b32.xlu1 %v11016_v3, 288 }
 0x203   : > { %8008 = vmatmul.mubr.msk.bf16.gmra.mrb[56].mxu1 %vm3608_vm6, %v10534_v43  ;;  %4919 = vbcast.lane.b32.xlu0 %v11090_v52, 280 }
 0x204   : > { %8011 = vmatprep.mubr.msk.bf16.mxu1 %vm3608_vm6, %v10546_v23 }
 0x205   : > { %8036 = vmatmul.mubr.msk.bf16.gmra.mrb[60].mxu0 %vm3608_vm6, %v10729_v7 }
 0x206   : > { %4726 = vbcast.lane.b32.xlu1 %v10945_v17, 296  ;;  %8075 = vmatprep.mubr.msk.bf16.mxu0 %vm12947_vm7, %v12946_v29 }
 0x207   : > { %4596 = vbcast.lane.b32.xlu0 %v10780_v22, 304 }
 0x208   : > { %v11157_v24 = vpop.permute.xlu1 %5632 }
 0x209   : > { %v11165_v10 = vpop.permute.xlu0 %5627 }
 0x20a   : > { %4466 = vbcast.lane.b32.xlu1 %v10659_v4, 312 }
 0x20b   : > { %8012 = vmatmul.mubr.msk.bf16.gmra.mrb[60].mxu1 %vm3608_vm6, %v10624_v11  ;;  %4856 = vbcast.lane.b32.xlu0 %v11055_v45, 288 }
 0x20c   : > { %8015 = vmatprep.mubr.msk.bf16.mxu1 %vm3608_vm6, %v10645_v47  ;;  %v11163_v55 = vpop.permute.xlu1 %5637 }
 0x20e   : > { %4663 = vbcast.lane.b32.xlu1 %v10916_v20, 304 }
 0x20f   : > { %4533 = vbcast.lane.b32.xlu0 %v10723_v5, 312 }
 0x211   : > { %v11174_v43 = vpop.permute.xlu1 %5647 }
 0x212   : > { %4923 = vbcast.lane.b32.xlu1 %v11090_v52, 288  ;;  %v11177_v23 = vpop.permute.xlu0 %5642 }
 0x213   : > { %4793 = vbcast.lane.b32.xlu0 %v11016_v3, 296  ;;  %8016 = vmatmul.mubr.msk.bf16.gmra.mrb[64].mxu1 %vm3608_vm6, %v10729_v7 }
 0x214   : > { %8055 = vmatprep.mubr.msk.bf16.mxu1 %vm12947_vm7, %v12946_v29 }
 0x216   : > { %4600 = vbcast.lane.b32.xlu1 %v10780_v22, 312 }
 0x217   : > { %4730 = vbcast.lane.b32.xlu0 %v10945_v17, 304  ;;  %v11181_v11 = vpop.permute.xlu1 %5657 }
 0x218   : > { %v11183_v47 = vpop.permute.xlu0 %5652 }
 0x21a   : > { %4860 = vbcast.lane.b32.xlu1 %v11055_v45, 296 }
 0x21b   : > { %4470 = vbcast.lane.b32.xlu0 %v10659_v4, 320  ;;  %v11187_v25 = vpop.permute.xlu1 %4442 }
 0x21c   : > { %v11189_v7 = vpop.permute.xlu0 %4438 }
 0x21e   : > { %4537 = vbcast.lane.b32.xlu1 %v10723_v5, 320 }
 0x21f   : > { %4667 = vbcast.lane.b32.xlu0 %v10916_v20, 312  ;;  %v11193_v8 = vpop.permute.xlu1 %4509 }
 0x220   : > { %v11195_v63 = vpop.permute.xlu0 %4505 }
 0x222   : > { %4797 = vbcast.lane.b32.xlu1 %v11016_v3, 304 }
 0x223   : > { %4927 = vbcast.lane.b32.xlu0 %v11090_v52, 296  ;;  %v11199_v6 = vpop.permute.xlu1 %4576 }
 0x226   : > { %4734 = vbcast.lane.b32.xlu1 %v10945_v17, 312  ;;  %v11201_v26 = vpop.permute.xlu0 %4572 }
 0x227   : > { %4604 = vbcast.lane.b32.xlu0 %v10780_v22, 320  ;;  %v11205_v13 = vpop.permute.xlu1 %4513 }
 0x22a   : > { %4474 = vbcast.lane.b32.xlu1 %v10659_v4, 328 }
 0x22b   : > { %4864 = vbcast.lane.b32.xlu0 %v11055_v45, 304 }
 0x22c   : > { %v11207_v14 = vpop.permute.xlu0 %4446 }
 0x22d   : > { %v11211_v1 = vpop.permute.xlu1 %4643 }
 0x22e   : > { %4671 = vbcast.lane.b32.xlu1 %v10916_v20, 320 }
 0x22f   : > { %4541 = vbcast.lane.b32.xlu0 %v10723_v5, 328 }
 0x231   : > { %v11213_v35 = vpop.permute.xlu0 %4639 }
 0x232   : > { %4931 = vbcast.lane.b32.xlu1 %v11090_v52, 304  ;;  %v11217_v50 = vpop.permute.xlu1 %4706 }
 0x233   : > { %4801 = vbcast.lane.b32.xlu0 %v11016_v3, 312  ;;  %12948 = vst [vmem:[#allocation48_spill] sm:$0xff] %v11217_v50 }
 0x235   : > { %v11219_v21 = vpop.permute.xlu0 %4580 }
 0x236   : > { %4608 = vbcast.lane.b32.xlu1 %v10780_v22, 328  ;;  %v11223_v18 = vpop.permute.xlu1 %4450 }
 0x237   : > { %4738 = vbcast.lane.b32.xlu0 %v10945_v17, 320 }
 0x239   : > { %v11225_v27 = vpop.permute.xlu0 %4710 }
 0x23a   : > { %12949 = vst [vmem:[#allocation70_spill] sm:$0xff] %v11225_v27  ;;  %4868 = vbcast.lane.b32.xlu1 %v11055_v45, 312  ;;  %v11229_v42 = vpop.permute.xlu1 %4647  ;;  %v7429_v27 = vunpack.c.l.bf16 %v7655_v61 }
 0x23b   : > { %4478 = vbcast.lane.b32.xlu0 %v10659_v4, 336 }
 0x23d   : > { %v11231_v2 = vpop.permute.xlu0 %4517 }
 0x23e   : > { %4545 = vbcast.lane.b32.xlu1 %v10723_v5, 336  ;;  %v11235_v31 = vpop.permute.xlu1 %4777 }
 0x23f   : > { %4675 = vbcast.lane.b32.xlu0 %v10916_v20, 328 }
 0x241   : > { %v11237_v54 = vpop.permute.xlu0 %4773 }
 0x242   : > { %4805 = vbcast.lane.b32.xlu1 %v11016_v3, 320  ;;  %v11241_v30 = vpop.permute.xlu1 %4714 }
 0x243   : > { %4935 = vbcast.lane.b32.xlu0 %v11090_v52, 312  ;;  %12950 = vst [vmem:[#allocation60_spill] sm:$0xff] %v11241_v30 }
 0x245   : > { %v11243_v51 = vpop.permute.xlu0 %4584 }
 0x246   : > { %4742 = vbcast.lane.b32.xlu1 %v10945_v17, 328  ;;  %v11247_v57 = vpop.permute.xlu1 %4844 }
 0x247   : > { %4612 = vbcast.lane.b32.xlu0 %v10780_v22, 336  ;;  %12951 = vst [vmem:[#allocation79_spill] sm:$0xff] %v11247_v57 }
 0x249   : > { %v11249_v12 = vpop.permute.xlu0 %4840 }
 0x24a   : > { %12952 = vst [vmem:[#allocation90_spill] sm:$0xff] %v11249_v12  ;;  %4482 = vbcast.lane.b32.xlu1 %v10659_v4, 344  ;;  %v11253_v34 = vpop.permute.xlu1 %4521  ;;  %v7394_v12 = vunpack.c.h.bf16 %v7392_v32 }
 0x24b   : > { %4872 = vbcast.lane.b32.xlu0 %v11055_v45, 320 }
 0x24d   : > { %v11255_v58 = vpop.permute.xlu0 %4454 }
 0x24e   : > { %4679 = vbcast.lane.b32.xlu1 %v10916_v20, 336 }
 0x24f   : > { %4549 = vbcast.lane.b32.xlu0 %v10723_v5, 344 }
 0x250   : > { %v11259_v36 = vpop.permute.xlu1 %4781 }
 0x251   : > { %v11261_v62 = vpop.permute.xlu0 %4651 }
 0x252   : > { %4939 = vbcast.lane.b32.xlu1 %v11090_v52, 320 }
 0x253   : > { %4809 = vbcast.lane.b32.xlu0 %v11016_v3, 328 }
 0x254   : > { %v11265_v37 = vpop.permute.xlu1 %4911 }
 0x255   : > { %12953 = vst [vmem:[#allocation27_spill] sm:$0xff] %v11265_v37  ;;  %v11270_v16 = vpop.permute.xlu0 %4907 }
 0x256   : > { %12954 = vst [vmem:[#allocation31_spill] sm:$0xff] %v11270_v16  ;;  %4616 = vbcast.lane.b32.xlu1 %v10780_v22, 344 }
 0x257   : > { %5662 = vperm.xlu0 %8293, %v5616_v46   ;;  %v7398_v46 = vunpack.c.h.bf16 %v7647_v56 }
 0x258   : > { %v11273_v9 = vpop.permute.xlu1 %4718 }
 0x259   : > { %12955 = vst [vmem:[#allocation53_spill] sm:$0xff] %v11273_v9  ;;  %v11275_v40 = vpop.permute.xlu0 %4588 }
 0x25a   : > { %4876 = vbcast.lane.b32.xlu1 %v11055_v45, 328 }
 0x25b   : > { %4746 = vbcast.lane.b32.xlu0 %v10945_v17, 336 }
 0x25c   : > { %v11279_v33 = vpop.permute.xlu1 %4458 }
 0x25d   : > { %v11281_v44 = vpop.permute.xlu0 %4848 }
 0x25e   : > { %12956 = vst [vmem:[#allocation37_spill] sm:$0xff] %v11281_v44  ;;  %4553 = vbcast.lane.b32.xlu1 %v10723_v5, 352  ;;  %v7425_v44 = vunpack.c.l.bf16 %v7654_v53 }
 0x25f   : > { %4486 = vbcast.lane.b32.xlu0 %v10659_v4, 352 }
 0x260   : > { %v11285_v28 = vpop.permute.xlu1 %4655 }
 0x261   : > { %v11287_v49 = vpop.permute.xlu0 %4525  ;;  %v7885_v39 = vpop.f32.mrb[0].mxu1 }
 0x262   : > { %4813 = vbcast.lane.b32.xlu1 %v11016_v3, 336  ;;  %v4971_v19 = vadd.f32 %v7885_v39, %v11207_v14  ;;  %v3670_v41 = vpop.f32.mrb[1].mxu1 }
 0x263   : > { %4683 = vbcast.lane.b32.xlu0 %v10916_v20, 344  ;;  %v4969_v15 = vadd.f32 %v11189_v7, %v3670_v41  ;;  %v7886_v29 = vpop.f32.mrb[2].mxu1  ;;  %v7905_v57 = vpop.f32.mrb[4].mxu0  ;;  %v7426_v41 = vunpack.c.h.bf16 %v7654_v53  ;;  %v11320_v53 = vld [vmem:[%s9077_s26 + $0x18] sm:$0xff]  }
 0x264   : > { %v11296_v0 = vpop.permute.xlu1 %4915  ;;  %v5355_v37 = vadd.f32 %v7397_v48, %v4971_v19  ;;  %v4972_v16 = vadd.f32 %v7886_v29, %v11223_v18  ;;  %v3770_v9 = vpop.f32.mrb[5].mxu0  ;;  %v7648_v48 = vld [vmem:[%s9077_s26 + $0x10] sm:$0xff]   ;;  %12959 = vst [vmem:[#allocation47_spill] sm:$0xff] %v11320_v53 }
 0x265   : > { %12957 = vst [vmem:[#allocation40_spill] sm:$0xff] %v11296_v0  ;;  %v11299_v60 = vpop.permute.xlu0 %4785  ;;  %v4987_v0 = vadd.f32 %v7905_v57, %v11205_v13  ;;  %v5353_v14 = vadd.f32 %v7393_v59, %v4969_v15  ;;  %v4985_v39 = vadd.f32 %v11195_v63, %v3770_v9  ;;  %v7906_v7 = vpop.f32.mrb[6].mxu0  ;;  %v7430_v13 = vunpack.c.h.bf16 %v7655_v61  ;;  %v7656_v9 = vld [vmem:[%s9077_s26 + $0x50] sm:$0xff]  }
 0x266   : > { %5667 = vperm.xlu1 %8294, %v5617_v38   ;;  %v3673_v38 = vpop.f32.mrb[3].mxu1  ;;  %v5356_v29 = vadd.f32 %v7398_v46, %v4972_v16  ;;  %v4988_v18 = vadd.f32 %v7906_v7, %v11231_v2  ;;  %v3773_v57 = vpop.f32.mrb[7].mxu0  ;;  %8373 = vtanh.f32 %v5355_v37  ;;  %v7401_v61 = vunpack.c.l.bf16 %v7648_v48 }
 0x267   : > { %4943 = vbcast.lane.b32.xlu0 %v11090_v52, 328  ;;  %v4970_v56 = vadd.f32 %v11187_v25, %v3673_v38  ;;  %v5369_v25 = vadd.f32 %v7425_v44, %v4985_v39  ;;  %v4986_v63 = vadd.f32 %v11193_v8, %v3773_v57  ;;  %8375 = vtanh.f32 %v5353_v14  ;;  %v11326_v38 = vld [vmem:[%s9077_s26 + $0x58] sm:$0xff]  }
 0x268   : > { %v11309_v32 = vpop.permute.xlu1 %4592  ;;  %v5371_v16 = vadd.f32 %v7429_v27, %v4987_v0  ;;  %8377 = vtanh.f32 %v5356_v29  ;;  %12961 = vst [vmem:[#allocation58_spill] sm:$0xff] %v11326_v38  ;;  %v7433_v44 = vunpack.c.l.bf16 %v7656_v9  ;;  %v7405_v8 = vunpack.c.l.bf16 %v11320_v53 }
 0x269   : > { %v11314_v19 = vpop.permute.xlu0 %4722  ;;  %v5354_v15 = vadd.f32 %v7394_v12, %v4970_v56  ;;  %v5370_v2 = vadd.f32 %v7426_v41, %v4986_v63  ;;  %v7889_v59 = vpop.f32.mrb[4].mxu1  ;;  %v5372_v12 = vadd.f32 %v7430_v13, %v4988_v18  ;;  %v7402_v39 = vunpack.c.h.bf16 %v7648_v48 }
 0x26a   : > { %4750 = vbcast.lane.b32.xlu1 %v10945_v17, 344  ;;  %12958 = vst [vmem:[#allocation64_spill] sm:$0xff] %v11314_v19  ;;  %v3686_v37 = vpop.f32.mrb[5].mxu1  ;;  %v7434_v57 = vunpack.c.h.bf16 %v7656_v9  ;;  %v7437_v18 = vunpack.c.l.bf16 %v11326_v38 }
 0x26b   : > { %4620 = vbcast.lane.b32.xlu0 %v10780_v22, 352  ;;  %8379 = vtanh.f32 %v5354_v15  ;;  %v4973_v27 = vadd.f32 %v11255_v58, %v3686_v37  ;;  %v11331_v14 = vpop.f32.mrb[6].mxu1 }
 0x26c   : > { %v11322_v46 = vpop.permute.xlu1 %4852  ;;  %8381 = vtanh.f32 %v5369_v25  ;;  %v7909_v0 = vpop.f32.mrb[8].mxu0 }
 0x26d   : > { %12960 = vst [vmem:[#allocation69_spill] sm:$0xff] %v11322_v46  ;;  %v4463_v56 = vpop.permute.xlu0 %4462  ;;  %8383 = vtanh.f32 %v5371_v16  ;;  %v3786_v41 = vpop.f32.mrb[9].mxu0  ;;  %v5357_v13 = vadd.f32 %v7401_v61, %v4973_v27 }
 0x26e   : > { %4490 = vbcast.lane.b32.xlu1 %v10659_v4, 360  ;;  %v4975_v7 = vadd.f32 %v7889_v59, %v4463_v56  ;;  %v3689_v29 = vpop.f32.mrb[7].mxu1  ;;  %8385 = vtanh.f32 %v5370_v2  ;;  %v4989_v15 = vadd.f32 %v11253_v34, %v3786_v41  ;;  %v11336_v25 = vpop.f32.mrb[10].mxu0  ;;  %v5618_v41 = vld [vmem:[%s12587_s6 + $0x48] sm:$0xff] }
 0x26f   : > { %4880 = vbcast.lane.b32.xlu0 %v11055_v45, 336  ;;  %v4974_v63 = vadd.f32 %v11279_v33, %v3689_v29  ;;  %8387 = vtanh.f32 %v5372_v12  ;;  %v3789_v48 = vpop.f32.mrb[11].mxu0 }
 0x270   : > { %v4530_v58 = vpop.permute.xlu1 %4529  ;;  %v5359_v59 = vadd.f32 %v7405_v8, %v4975_v7  ;;  %8389 = vtanh.f32 %v5357_v13  ;;  %v5373_v9 = vadd.f32 %v7433_v44, %v4989_v15  ;;  %v4990_v34 = vadd.f32 %v11287_v49, %v3789_v48  ;;  %v8374_v61 = vpop.eup %8373 }
 0x271   : > { %v4991_v16 = vadd.f32 %v7909_v0, %v4530_v58  ;;  %v11339_v37 = vpop.permute.xlu0 %4659  ;;  %v5358_v2 = vadd.f32 %v7402_v39, %v4974_v63  ;;  %v11343_v27 = vpop.f32.mrb[8].mxu1 }
 0x272   : > { %4687 = vbcast.lane.b32.xlu1 %v10916_v20, 352  ;;  %8391 = vtanh.f32 %v5359_v59  ;;  %v5374_v56 = vadd.f32 %v7434_v57, %v4990_v34  ;;  %12962 = vst [vmem:[#allocation78_spill] sm:$0xff] %v11343_v27  ;;  %v8376_v8 = vpop.eup %8375  ;;  %v11348_v0 = vpop.f32.mrb[9].mxu1 }
 0x273   : > { %4557 = vbcast.lane.b32.xlu0 %v10723_v5, 360  ;;  %v5375_v33 = vadd.f32 %v7437_v18, %v4991_v16  ;;  %8393 = vtanh.f32 %v5373_v9  ;;  %v8378_v49 = vpop.eup %8377  ;;  %v11355_v39 = vpop.f32.mrb[10].mxu1  ;;  %v5705_v15 = vmul.f32 %v8376_v8, %v11165_v10  ;;  %v11374_v9 = vld [vmem:[%s9077_s26 + $0xc8] sm:$0xff]  }
 0x274   : > { %v11345_v12 = vpop.permute.xlu1 %4789  ;;  %8395 = vtanh.f32 %v5358_v2  ;;  %v11353_v44 = vpop.f32.mrb[12].mxu0  ;;  %12966 = vst [vmem:[#allocation105_spill] sm:$0xff] %v11355_v39  ;;  %v5708_v39 = vmul.f32 %v8378_v49, %v11177_v23  ;;  %v7493_v19 = vunpack.c.l.bf16 %v11374_v9  ;;  %v7494_v30 = vunpack.c.h.bf16 %v11374_v9 }
 0x275   : > { %12963 = vst [vmem:[#allocation86_spill] sm:$0xff] %v11345_v12  ;;  %v11350_v7 = vpop.permute.xlu0 %4919  ;;  %8397 = vtanh.f32 %v5374_v56  ;;  %12965 = vst [vmem:[#allocation107_spill] sm:$0xff] %v11353_v44  ;;  %v8380_v29 = vpop.eup %8379  ;;  %v7672_v12 = vld [vmem:[%s9077_s26 + $0xd0] sm:$0xff]  }
 0x276   : > { %4947 = vbcast.lane.b32.xlu1 %v11090_v52, 336  ;;  %12964 = vst [vmem:[#allocation106_spill] sm:$0xff] %v11350_v7  ;;  %v11360_v57 = vpop.f32.mrb[13].mxu0  ;;  %v11362_v18 = vpop.f32.mrb[11].mxu1  ;;  %8399 = vtanh.f32 %v5375_v33  ;;  %v5706_v63 = vmul.f32 %v8380_v29, %v11157_v24  ;;  %v5707_v33 = vmul.f32 %v8374_v61, %v11163_v55 }
 0x277   : > { %4817 = vbcast.lane.b32.xlu0 %v11016_v3, 344  ;;  %v8382_v13 = vpop.eup %8381  ;;  %v11366_v58 = vpop.f32.mrb[14].mxu0 }
 0x278   : > { %12967 = vst [vmem:[#allocation98_spill] sm:$0xff] %v11366_v58  ;;  %v11368_v48 = vpop.permute.xlu1 %4726  ;;  %v8384_v59 = vpop.eup %8383  ;;  %v5833_v56 = vadd.f32 %v5706_v63, %v5705_v15  ;;  %v5721_v29 = vmul.f32 %v8382_v13, %v11165_v10  ;;  %v7670_v58 = vld [vmem:[%s9077_s26 + $0xc0] sm:$0xff]  }
 0x279   : > { %12968 = vst [vmem:[#allocation35_spill] sm:$0xff] %v11368_v48  ;;  %v11371_v16 = vpop.f32.mrb[15].mxu0  ;;  %v11376_v2 = vpop.permute.xlu0 %4596  ;;  %v5723_v61 = vmul.f32 %v8384_v59, %v11163_v55  ;;  %v7489_v50 = vunpack.c.l.bf16 %v7670_v58  ;;  %v7490_v38 = vunpack.c.h.bf16 %v7670_v58 }
 0x27a   : > { %4624 = vbcast.lane.b32.xlu1 %v10780_v22, 360  ;;  %v8386_v34 = vpop.eup %8385  ;;  %v5834_v48 = vadd.f32 %v5833_v56, %v5707_v33  ;;  %v11384_v44 = vpop.f32.mrb[12].mxu1 }
 0x27b   : > { %5672 = vperm.xlu0 %8293, %v5618_v41   ;;  %v8388_v8 = vpop.eup %8387  ;;  %v5722_v46 = vmul.f32 %v8386_v34, %v11157_v24  ;;  %12969 = vst [vmem:[#allocation41_spill] sm:$0xff] %v11384_v44  ;;  %v11389_v63 = vpop.f32.mrb[13].mxu1 }
 0x27c   : > { %v8390_v7 = vpop.eup %8389  ;;  %v4467_v27 = vpop.permute.xlu1 %4466  ;;  %12970 = vst [vmem:[#allocation84_spill] sm:$0xff] %v11389_v63  ;;  %v5835_v56 = vadd.f32 %v5834_v48, %v5708_v39 }
 0x27d   : > { %v8392_v41 = vpop.eup %8391  ;;  %v5854_v15 = vadd.f32 %v5722_v46, %v5721_v29  ;;  %v5709_v13 = vmul.f32 %v8390_v7, %v11174_v43  ;;  %v11392_v34 = vadd.f32 %v11331_v14, %v4467_v27  ;;  %v11394_v49 = vpop.permute.xlu0 %4856  ;;  %v5724_v7 = vmul.f32 %v8388_v8, %v11177_v23 }
 0x27e   : > { %4884 = vbcast.lane.b32.xlu1 %v11055_v45, 344  ;;  %12972 = vst [vmem:[#allocation33_spill] sm:$0xff] %v11394_v49  ;;  %v8394_v33 = vpop.eup %8393  ;;  %v7945_v44 = vpop.f32.mrb[16].mxu0 }
 0x27f   : > { %12971 = vst [vmem:[#allocation26_spill] sm:$0xff] %v11392_v34  ;;  %4754 = vbcast.lane.b32.xlu0 %v10945_v17, 352  ;;  %v11398_v59 = vpop.f32.mrb[14].mxu1  ;;  %v8396_v46 = vpop.eup %8395  ;;  %v5855_v29 = vadd.f32 %v5854_v15, %v5723_v61  ;;  %v5725_v14 = vmul.f32 %v8394_v33, %v11174_v43  ;;  %v5019_v27 = vadd.f32 %v7945_v44, %v11229_v42 }
 0x280   : > { %12973 = vst [vmem:[#allocation36_spill] sm:$0xff] %v11398_v59  ;;  %v3970_v63 = vpop.f32.mrb[17].mxu0  ;;  %v11403_v49 = vpop.f32.mrb[15].mxu1  ;;  %v5836_v39 = vadd.f32 %v5835_v56, %v5709_v13  ;;  %v5710_v48 = vmul.f32 %v8396_v46, %v11183_v47  ;;  %v5711_v59 = vmul.f32 %v8392_v41, %v11181_v11  ;;  %v11414_v41 = vld [vmem:[%s9077_s26 + $0xd8] sm:$0xff]  }
 0x281   : > { %12974 = vst [vmem:[#allocation43_spill] sm:$0xff] %v11403_v49  ;;  %v8398_v34 = vpop.eup %8397  ;;  %v5017_v9 = vadd.f32 %v11213_v35, %v3970_v63  ;;  %v7946_v58 = vpop.f32.mrb[18].mxu0  ;;  %v5856_v61 = vadd.f32 %v5855_v29, %v5724_v7  ;;  %v5403_v44 = vadd.f32 %v7493_v19, %v5019_v27 }
 0x282   : > { %v4664_v53 = vpop.permute.xlu1 %4663  ;;  %4561 = vbcast.lane.b32.xlu1 %v10723_v5, 368  ;;  %v8400_v8 = vpop.eup %8399  ;;  %v5726_v42 = vmul.f32 %v8398_v34, %v11183_v47  ;;  %v5020_v15 = vadd.f32 %v7946_v58, %v11261_v62  ;;  %v5837_v35 = vadd.f32 %v5836_v39, %v5710_v48 }
 0x283   : > { %v3973_v13 = vpop.f32.mrb[19].mxu0  ;;  %v4534_v33 = vpop.permute.xlu0 %4533  ;;  %4494 = vbcast.lane.b32.xlu0 %v10659_v4, 368  ;;  %v5401_v63 = vadd.f32 %v7489_v50, %v5017_v9  ;;  %v5857_v46 = vadd.f32 %v5856_v61, %v5725_v14  ;;  %v5727_v49 = vmul.f32 %v8400_v8, %v11181_v11  ;;  %v7501_v14 = vunpack.c.l.bf16 %v11414_v41 }
 0x284   : > { %v5018_v56 = vadd.f32 %v11211_v1, %v3973_v13  ;;  %v11419_v7 = vadd.f32 %v11336_v25, %v4534_v33  ;;  %v5404_v19 = vadd.f32 %v7494_v30, %v5020_v15  ;;  %v11421_v62 = vadd.f32 %v5837_v35, %v5711_v59  ;;  %v11423_v29 = vpop.f32.mrb[16].mxu1  ;;  %v5619_v30 = vld [vmem:[%s12587_s6 + $0x50] sm:$0xff]  ;;  %v7663_v15 = vld [vmem:[%s9077_s26 + $0x88] sm:$0xff]   ;;  %v7662_v35 = vld [vmem:[%s9077_s26 + $0x80] sm:$0xff]  }
 0x285   : > { %8401 = vtanh.f32 %v5401_v63  ;;  %12976 = vst [vmem:[#allocation32_spill] sm:$0xff] %v11423_v29  ;;  %v5858_v1 = vadd.f32 %v5857_v46, %v5726_v42  ;;  %v11428_v50 = vpop.f32.mrb[17].mxu1  ;;  %v7497_v59 = vunpack.c.l.bf16 %v7672_v12 }
 0x286   : > { %12975 = vst [vmem:[#allocation25_spill] sm:$0xff] %v11421_v62  ;;  %v5402_v34 = vadd.f32 %v7490_v38, %v5018_v56  ;;  %v11425_v27 = vpop.permute.xlu1 %4923  ;;  %4821 = vbcast.lane.b32.xlu1 %v11016_v3, 352  ;;  %8403 = vtanh.f32 %v5403_v44  ;;  %v7949_v38 = vpop.f32.mrb[20].mxu0  ;;  %v7498_v44 = vunpack.c.h.bf16 %v7672_v12  ;;  %v7457_v12 = vunpack.c.l.bf16 %v7662_v35 }
 0x287   : > { %v11431_v25 = vpop.permute.xlu0 %4793  ;;  %4691 = vbcast.lane.b32.xlu0 %v10916_v20, 360  ;;  %v11437_v39 = vpop.f32.mrb[18].mxu1  ;;  %v11439_v48 = vadd.f32 %v5858_v1, %v5727_v49  ;;  %v5023_v8 = vadd.f32 %v7949_v38, %v4664_v53  ;;  %v7461_v53 = vunpack.c.l.bf16 %v7663_v15 }
 0x288   : > { %8405 = vtanh.f32 %v5402_v34  ;;  %12977 = vst [vmem:[#allocation50_spill] sm:$0xff] %v11437_v39  ;;  %v3986_v9 = vpop.f32.mrb[21].mxu0  ;;  %v11441_v58 = vpop.f32.mrb[19].mxu1 }
 0x289   : > { %12978 = vst [vmem:[#allocation46_spill] sm:$0xff] %v11439_v48  ;;  %12979 = vst [vmem:[#allocation102_spill] sm:$0xff] %v11441_v58  ;;  %8407 = vtanh.f32 %v5404_v19  ;;  %v5021_v61 = vadd.f32 %v11285_v28, %v3986_v9  ;;  %v7950_v42 = vpop.f32.mrb[22].mxu0  ;;  %v5407_v63 = vadd.f32 %v7501_v14, %v5023_v8  ;;  %v7458_v8 = vunpack.c.h.bf16 %v7662_v35 }
 0x28a   : > { %v11445_v13 = vpop.permute.xlu1 %4600  ;;  %5677 = vperm.xlu1 %8294, %v5619_v30   ;;  %v3989_v33 = vpop.f32.mrb[23].mxu0  ;;  %v7462_v30 = vunpack.c.h.bf16 %v7663_v15 }
 0x28b   : > { %v11448_v56 = vpop.permute.xlu0 %4730  ;;  %4951 = vbcast.lane.b32.xlu0 %v11090_v52, 344  ;;  %v5405_v49 = vadd.f32 %v7497_v59, %v5021_v61  ;;  %v5022_v46 = vadd.f32 %v11339_v37, %v3989_v33  ;;  %8409 = vtanh.f32 %v5407_v63 }
 0x28d   : > { %8411 = vtanh.f32 %v5405_v49  ;;  %v5406_v28 = vadd.f32 %v7498_v44, %v5022_v46  ;;  %v7925_v19 = vpop.f32.mrb[20].mxu1 }
 0x28e   : > { %v11452_v34 = vpop.permute.xlu1 %4860  ;;  %4758 = vbcast.lane.b32.xlu1 %v10945_v17, 360  ;;  %v5003_v1 = vadd.f32 %v7925_v19, %v11219_v21  ;;  %v3870_v14 = vpop.f32.mrb[21].mxu1 }
 0x28f   : > { %12980 = vst [vmem:[#allocation63_spill] sm:$0xff] %v11452_v34  ;;  %v4471_v38 = vpop.permute.xlu0 %4470  ;;  %4628 = vbcast.lane.b32.xlu0 %v10780_v22, 368  ;;  %v8402_v59 = vpop.eup %8401  ;;  %8413 = vtanh.f32 %v5406_v28  ;;  %v5001_v37 = vadd.f32 %v11201_v26, %v3870_v14  ;;  %v11468_v26 = vld [vmem:[%s9077_s26 + $0x98] sm:$0xff]  }
 0x290   : > { %v7926_v9 = vpop.f32.mrb[22].mxu1  ;;  %v11458_v61 = vpop.f32.mrb[24].mxu0  ;;  %v11461_v44 = vadd.f32 %v4471_v38, %v11348_v0  ;;  %v5387_v21 = vadd.f32 %v7461_v53, %v5003_v1  ;;  %v5753_v0 = vmul.f32 %v8402_v59, %v11165_v10  ;;  %v7664_v1 = vld [vmem:[%s9077_s26 + $0x90] sm:$0xff]  }
 0x291   : > { %v8404_v33 = vpop.eup %8403  ;;  %v5004_v15 = vadd.f32 %v7926_v9, %v11243_v51  ;;  %v3873_v63 = vpop.f32.mrb[23].mxu1  ;;  %v5385_v19 = vadd.f32 %v7457_v12, %v5001_v37  ;;  %v7465_v29 = vunpack.c.l.bf16 %v7664_v1 }
 0x292   : > { %v11464_v49 = vpop.f32.mrb[25].mxu0  ;;  %v8406_v46 = vpop.eup %8405  ;;  %v5002_v28 = vadd.f32 %v11199_v6, %v3873_v63  ;;  %4498 = vbcast.lane.b32.xlu1 %v10659_v4, 376  ;;  %v5755_v4 = vmul.f32 %v8404_v33, %v11163_v55 }
 0x293   : > { %v11470_v35 = vpop.f32.mrb[26].mxu0  ;;  %v4538_v14 = vpop.permute.xlu1 %4537  ;;  %v5754_v53 = vmul.f32 %v8406_v46, %v11157_v24  ;;  %4888 = vbcast.lane.b32.xlu0 %v11055_v45, 352  ;;  %8415 = vtanh.f32 %v5385_v19  ;;  %v5388_v37 = vadd.f32 %v7462_v30, %v5004_v15  ;;  %v7469_v46 = vunpack.c.l.bf16 %v11468_v26 }
 0x294   : > { %12981 = vst [vmem:[#allocation56_spill] sm:$0xff] %v11470_v35  ;;  %v11476_v51 = vpop.f32.mrb[27].mxu0  ;;  %v11479_v38 = vadd.f32 %v4538_v14, %v11360_v57  ;;  %v4668_v12 = vpop.permute.xlu0 %4667  ;;  %v5386_v9 = vadd.f32 %v7458_v8, %v5002_v28  ;;  %8417 = vtanh.f32 %v5387_v21 }
 0x295   : > { %v8408_v6 = vpop.eup %8407  ;;  %v11482_v63 = vadd.f32 %v7950_v42, %v4668_v12  ;;  %v5896_v59 = vadd.f32 %v5754_v53, %v5753_v0  ;;  %v7466_v0 = vunpack.c.h.bf16 %v7664_v1 }
 0x296   : > { %8419 = vtanh.f32 %v5386_v9  ;;  %v7929_v39 = vpop.f32.mrb[24].mxu1  ;;  %4695 = vbcast.lane.b32.xlu1 %v10916_v20, 368  ;;  %v8410_v14 = vpop.eup %8409  ;;  %v5756_v19 = vmul.f32 %v8408_v6, %v11177_v23 }
 0x297   : > { %v11486_v57 = vpop.permute.xlu1 %4797  ;;  %v5897_v30 = vadd.f32 %v5896_v59, %v5755_v4  ;;  %v5007_v42 = vadd.f32 %v7929_v39, %v11376_v2  ;;  %v3886_v8 = vpop.f32.mrb[25].mxu1  ;;  %4565 = vbcast.lane.b32.xlu0 %v10723_v5, 376  ;;  %8421 = vtanh.f32 %v5388_v37 }
 0x298   : > { %v11491_v15 = vpop.permute.xlu0 %4927  ;;  %v8412_v33 = vpop.eup %8411  ;;  %v5005_v21 = vadd.f32 %v11275_v40, %v3886_v8  ;;  %v5620_v8 = vld [vmem:[%s12587_s6 + $0x58] sm:$0xff] }
 0x299   : > { %v7930_v28 = vpop.f32.mrb[26].mxu1  ;;  %v11495_v53 = vpop.f32.mrb[28].mxu0  ;;  %v5757_v12 = vmul.f32 %v8412_v33, %v11174_v43  ;;  %v5898_v9 = vadd.f32 %v5897_v30, %v5756_v19  ;;  %v5391_v6 = vadd.f32 %v7469_v46, %v5007_v42  ;;  %v5759_v30 = vmul.f32 %v8410_v14, %v11181_v11 }
 0x29a   : > { %12982 = vst [vmem:[#allocation81_spill] sm:$0xff] %v11495_v53  ;;  %v3889_v4 = vpop.f32.mrb[27].mxu1  ;;  %v11498_v59 = vpop.f32.mrb[29].mxu0  ;;  %v11501_v2 = vadd.f32 %v7930_v28, %v11445_v13  ;;  %v5389_v39 = vadd.f32 %v7465_v29, %v5005_v21  ;;  %4955 = vbcast.lane.b32.xlu1 %v11090_v52, 352  ;;  %v7686_v21 = vld [vmem:[%s9077_s26 + $0x140] sm:$0xff]  }
 0x29b   : > { %12983 = vst [vmem:[#allocation45_spill] sm:$0xff] %v11498_v59  ;;  %v8414_v5 = vpop.eup %8413  ;;  %v5006_v37 = vadd.f32 %v11309_v32, %v3889_v4  ;;  %v11504_v40 = vpop.f32.mrb[30].mxu0  ;;  %v5899_v19 = vadd.f32 %v5898_v9, %v5757_v12  ;;  %4825 = vbcast.lane.b32.xlu0 %v11016_v3, 360  ;;  %v7687_v32 = vld [vmem:[%s9077_s26 + $0x148] sm:$0xff]   ;;  %v7554_v59 = vunpack.c.h.bf16 %v7686_v21 }
 0x29c   : > { %12984 = vst [vmem:[#allocation67_spill] sm:$0xff] %v11504_v40  ;;  %v11506_v1 = vpop.permute.xlu1 %4734  ;;  %v5758_v46 = vmul.f32 %v8414_v5, %v11183_v47  ;;  %v11511_v42 = vpop.f32.mrb[31].mxu0  ;;  %8423 = vtanh.f32 %v5389_v39  ;;  %v7557_v5 = vunpack.c.l.bf16 %v7687_v32  ;;  %v7558_v58 = vunpack.c.h.bf16 %v7687_v32 }
 0x29d   : > { %12985 = vst [vmem:[#allocation76_spill] sm:$0xff] %v11511_v42  ;;  %v4605_v13 = vpop.permute.xlu0 %4604  ;;  %v5390_v29 = vadd.f32 %v7466_v0, %v5006_v37  ;;  %8425 = vtanh.f32 %v5391_v6  ;;  %v8416_v28 = vpop.eup %8415 }
 0x29e   : > { %v5900_v33 = vadd.f32 %v5899_v19, %v5758_v46  ;;  %v11519_v12 = vpop.f32.mrb[28].mxu1  ;;  %4632 = vbcast.lane.b32.xlu1 %v10780_v22, 376  ;;  %v8418_v9 = vpop.eup %8417  ;;  %v7553_v46 = vunpack.c.l.bf16 %v7686_v21  ;;  %v5737_v22 = vmul.f32 %v8416_v28, %v11165_v10 }
 0x29f   : > { %8427 = vtanh.f32 %v5390_v29  ;;  %v3902_v0 = vpop.f32.mrb[29].mxu1  ;;  %5682 = vperm.xlu0 %8293, %v5620_v8  }
 0x2a0   : > { %v4475_v14 = vpop.permute.xlu1 %4474  ;;  %v11522_v4 = vadd.f32 %v5900_v33, %v5759_v30  ;;  %v8420_v6 = vpop.eup %8419  ;;  %v11531_v40 = vadd.f32 %v4605_v13, %v3902_v0  ;;  %v5739_v13 = vmul.f32 %v8418_v9, %v11163_v55  ;;  %v7688_v9 = vld [vmem:[%s9077_s26 + $0x150] sm:$0xff]  }
 0x2a1   : > { %v11525_v39 = vadd.f32 %v4475_v14, %v11362_v18  ;;  %v11527_v37 = vpop.permute.xlu0 %4864  ;;  %v7985_v19 = vpop.f32.mrb[32].mxu0  ;;  %v5738_v30 = vmul.f32 %v8420_v6, %v11157_v24 }
 0x2a2   : > { %12986 = vst [vmem:[#allocation49_spill] sm:$0xff] %v11522_v4  ;;  %12988 = vst [vmem:[#allocation55_spill] sm:$0xff] %v11527_v37  ;;  %v11529_v29 = vpop.f32.mrb[30].mxu1  ;;  %v5051_v33 = vadd.f32 %v7985_v19, %v11259_v36  ;;  %v4170_v53 = vpop.f32.mrb[33].mxu0  ;;  %4892 = vbcast.lane.b32.xlu1 %v11055_v45, 360 }
 0x2a3   : > { %12987 = vst [vmem:[#allocation21_spill] sm:$0xff] %v11525_v39  ;;  %v3905_v42 = vpop.f32.mrb[31].mxu1  ;;  %v8422_v18 = vpop.eup %8421  ;;  %v5049_v14 = vadd.f32 %v11237_v54, %v4170_v53  ;;  %v5875_v28 = vadd.f32 %v5738_v30, %v5737_v22  ;;  %4762 = vbcast.lane.b32.xlu0 %v10945_v17, 368  ;;  %v11543_v53 = vld [vmem:[%s9077_s26 + $0x158] sm:$0xff]  }
 0x2a4   : > { %v7986_v8 = vpop.f32.mrb[34].mxu0  ;;  %v4672_v35 = vpop.permute.xlu1 %4671  ;;  %v5435_v0 = vadd.f32 %v7557_v5, %v5051_v33  ;;  %v5740_v21 = vmul.f32 %v8422_v18, %v11177_v23 }
 0x2a5   : > { %v5052_v6 = vadd.f32 %v7986_v8, %v11299_v60  ;;  %v4173_v36 = vpop.f32.mrb[35].mxu0  ;;  %v4542_v19 = vpop.permute.xlu0 %4541  ;;  %v5433_v4 = vadd.f32 %v7553_v46, %v5049_v14  ;;  %v11546_v32 = vadd.f32 %v4672_v35, %v11464_v49  ;;  %v5876_v48 = vadd.f32 %v5875_v28, %v5739_v13 }
 0x2a6   : > { %v5050_v54 = vadd.f32 %v11235_v31, %v4173_v36  ;;  %v11551_v5 = vadd.f32 %v4542_v19, %v11371_v16  ;;  %v8424_v60 = vpop.eup %8423  ;;  %v11553_v33 = vpop.f32.mrb[32].mxu1  ;;  %4829 = vbcast.lane.b32.xlu1 %v11016_v3, 368  ;;  %v7565_v16 = vunpack.c.l.bf16 %v11543_v53  ;;  %v7561_v8 = vunpack.c.l.bf16 %v7688_v9  ;;  %v12994_v19 = vld [vmem:[#allocation86_spill] sm:$0xff] }
 0x2a7   : > { %8429 = vtanh.f32 %v5433_v4  ;;  %v5436_v22 = vadd.f32 %v7558_v58, %v5052_v6  ;;  %12990 = vst [vmem:[#allocation92_spill] sm:$0xff] %v11553_v33  ;;  %v8426_v31 = vpop.eup %8425  ;;  %v5741_v49 = vmul.f32 %v8424_v60, %v11174_v43  ;;  %v5877_v35 = vadd.f32 %v5876_v48, %v5740_v21  ;;  %v11559_v18 = vpop.f32.mrb[33].mxu1  ;;  %4699 = vbcast.lane.b32.xlu0 %v10916_v20, 376  ;;  %v5621_v58 = vld [vmem:[%s12587_s6 + $0x60] sm:$0xff] }
 0x2a8   : > { %12989 = vst [vmem:[#allocation59_spill] sm:$0xff] %v11551_v5  ;;  %v5434_v30 = vadd.f32 %v7554_v59, %v5050_v54  ;;  %v11555_v46 = vpop.permute.xlu1 %4931  ;;  %8431 = vtanh.f32 %v5435_v0  ;;  %12991 = vst [vmem:[#allocation100_spill] sm:$0xff] %v11559_v18  ;;  %v7989_v4 = vpop.f32.mrb[36].mxu0  ;;  %v5743_v20 = vmul.f32 %v8426_v31, %v11181_v11  ;;  %v7562_v60 = vunpack.c.h.bf16 %v7688_v9  ;;  %v11578_v33 = vld [vmem:[%s9077_s26 + $0x100] sm:$0xff]  }
 0x2a9   : > { %v4802_v14 = vpop.permute.xlu0 %4801  ;;  %v8428_v59 = vpop.eup %8427  ;;  %v5878_v48 = vadd.f32 %v5877_v35, %v5741_v49  ;;  %v5055_v6 = vadd.f32 %v7989_v4, %v11486_v57 }
 0x2aa   : > { %8433 = vtanh.f32 %v5434_v30  ;;  %v11566_v13 = vpop.f32.mrb[34].mxu1  ;;  %v5742_v28 = vmul.f32 %v8428_v59, %v11183_v47  ;;  %v4186_v0 = vpop.f32.mrb[37].mxu0  ;;  %v11575_v30 = vld [vmem:[%s9077_s26 + $0x108] sm:$0xff]   ;;  %5687 = vperm.xlu1 %8294, %v5621_v58  }
 0x2ab   : > { %12992 = vst [vmem:[#allocation74_spill] sm:$0xff] %v11566_v13  ;;  %v11570_v36 = vpop.f32.mrb[35].mxu1  ;;  %8435 = vtanh.f32 %v5436_v22  ;;  %v5053_v54 = vadd.f32 %v12994_v19, %v4186_v0  ;;  %v7990_v21 = vpop.f32.mrb[38].mxu0  ;;  %v5439_v35 = vadd.f32 %v7565_v16, %v5055_v6  ;;  %4959 = vbcast.lane.b32.xlu0 %v11090_v52, 360  ;;  %v11588_v22 = vld [vmem:[%s9077_s26 + $0x20] sm:$0xff]   ;;  %v12996_v58 = vld [vmem:[#allocation47_spill] sm:$0xff] }
 0x2ac   : > { %12993 = vst [vmem:[#allocation65_spill] sm:$0xff] %v11570_v36  ;;  %v4609_v13 = vpop.permute.xlu1 %4608  ;;  %v5879_v49 = vadd.f32 %v5878_v48, %v5742_v28  ;;  %v4189_v59 = vpop.f32.mrb[39].mxu0  ;;  %v11580_v57 = vadd.f32 %v7990_v21, %v4802_v14  ;;  %v7406_v48 = vunpack.c.h.bf16 %v12996_v58  ;;  %v12997_v28 = vld [vmem:[#allocation58_spill] sm:$0xff]  ;;  %v13001_v14 = vld [vmem:[#allocation48_spill] sm:$0xff] }
 0x2ad   : > { %v11582_v4 = vadd.f32 %v4609_v13, %v3905_v42  ;;  %v11584_v31 = vpop.permute.xlu0 %4738  ;;  %v5437_v9 = vadd.f32 %v7561_v8, %v5053_v54  ;;  %v5054_v0 = vadd.f32 %v11431_v25, %v4189_v59  ;;  %v7438_v16 = vunpack.c.h.bf16 %v12997_v28  ;;  %v11598_v13 = vld [vmem:[%s9077_s26 + $0x60] sm:$0xff]   ;;  %v13000_v54 = vld [vmem:[#allocation60_spill] sm:$0xff] }
 0x2ae   : > { %v11593_v6 = vadd.f32 %v5879_v49, %v5743_v20  ;;  %v7525_v42 = vunpack.c.l.bf16 %v11575_v30  ;;  %v7965_v21 = vpop.f32.mrb[36].mxu1  ;;  %v7521_v8 = vunpack.c.l.bf16 %v11578_v33  ;;  %4896 = vbcast.lane.b32.xlu1 %v11055_v45, 368  ;;  %v11607_v58 = vld [vmem:[%s9077_s26 + $0xa0] sm:$0xff]   ;;  %v7526_v28 = vunpack.c.h.bf16 %v11575_v30 }
 0x2af   : > { %12995 = vst [vmem:[#allocation95_spill] sm:$0xff] %v11582_v4  ;;  %8437 = vtanh.f32 %v5437_v9  ;;  %v5438_v19 = vadd.f32 %v7562_v60, %v5054_v0  ;;  %v5035_v49 = vadd.f32 %v7965_v21, %v13000_v54  ;;  %v4070_v59 = vpop.f32.mrb[37].mxu1  ;;  %v11611_v9 = vld [vmem:[%s9077_s26 + $0x118] sm:$0xff]   ;;  %4766 = vbcast.lane.b32.xlu0 %v10945_v17, 376  ;;  %v7522_v20 = vunpack.c.h.bf16 %v11578_v33  ;;  %v13003_v54 = vld [vmem:[#allocation78_spill] sm:$0xff] }
 0x2b0   : > { %12998 = vst [vmem:[#allocation93_spill] sm:$0xff] %v11593_v6  ;;  %v11601_v25 = vpop.permute.xlu1 %4868  ;;  %8439 = vtanh.f32 %v5439_v35  ;;  %v5033_v36 = vadd.f32 %v13001_v14, %v4070_v59  ;;  %v7966_v18 = vpop.f32.mrb[38].mxu1  ;;  %v11617_v35 = vld [vmem:[%s9077_s26 + $0xe0] sm:$0xff]  }
 0x2b1   : > { %12999 = vst [vmem:[#allocation83_spill] sm:$0xff] %v11601_v25  ;;  %v4479_v60 = vpop.permute.xlu0 %4478  ;;  %v8430_v0 = vpop.eup %8429  ;;  %8441 = vtanh.f32 %v5438_v19  ;;  %v5419_v6 = vadd.f32 %v7525_v42, %v5035_v49  ;;  %v13005_v19 = vld [vmem:[#allocation53_spill] sm:$0xff]  ;;  %v13006_v25 = vld [vmem:[#allocation70_spill] sm:$0xff] }
 0x2b2   : > { %v11619_v21 = vpop.f32.mrb[40].mxu0  ;;  %v11622_v4 = vadd.f32 %v13003_v54, %v4479_v60  ;;  %v8432_v30 = vpop.eup %8431  ;;  %v5036_v39 = vadd.f32 %v7966_v18, %v13005_v19  ;;  %v5417_v33 = vadd.f32 %v7521_v8, %v5033_v36  ;;  %v11631_v60 = vld [vmem:[%s9077_s26 + $0x110] sm:$0xff]   ;;  %4963 = vbcast.lane.b32.xlu1 %v11090_v52, 368  ;;  %v5785_v42 = vmul.f32 %v8430_v0, %v11165_v10  ;;  %v13008_v8 = vld [vmem:[#allocation107_spill] sm:$0xff] }
 0x2b3   : > { %13002 = vst [vmem:[#allocation28_spill] sm:$0xff] %v11619_v21  ;;  %v4073_v14 = vpop.f32.mrb[39].mxu1  ;;  %v4202_v59 = vpop.f32.mrb[41].mxu0  ;;  %v7533_v21 = vunpack.c.l.bf16 %v11611_v9  ;;  %4833 = vbcast.lane.b32.xlu0 %v11016_v3, 376  ;;  %v5787_v0 = vmul.f32 %v8432_v30, %v11163_v55 }
 0x2b4   : > { %13004 = vst [vmem:[#allocation34_spill] sm:$0xff] %v11622_v4  ;;  %v8434_v62 = vpop.eup %8433  ;;  %v5034_v37 = vadd.f32 %v13006_v25, %v4073_v14  ;;  %v11633_v54 = vpop.f32.mrb[42].mxu0  ;;  %8443 = vtanh.f32 %v5417_v33  ;;  %v5420_v34 = vadd.f32 %v7526_v28, %v5036_v39  ;;  %v5376_v33 = vadd.f32 %v7438_v16, %v11419_v7  ;;  %v5623_v7 = vld [vmem:[%s12587_s6 + $0x70] sm:$0xff]  ;;  %v11758_v4 = vld [vmem:[%s9077_s26 + $0x160] sm:$0xff]  }
 0x2b5   : > { %13007 = vst [vmem:[#allocation101_spill] sm:$0xff] %v11633_v54  ;;  %v4546_v5 = vpop.permute.xlu1 %4545  ;;  %v5786_v18 = vmul.f32 %v8434_v62, %v11157_v24  ;;  %v11639_v36 = vpop.f32.mrb[43].mxu0  ;;  %v5622_v62 = vld [vmem:[%s12587_s6 + $0x68] sm:$0xff]  ;;  %8445 = vtanh.f32 %v5419_v6 }
 0x2b6   : > { %v11642_v19 = vadd.f32 %v13008_v8, %v4546_v5  ;;  %v4676_v25 = vpop.permute.xlu0 %4675  ;;  %v8436_v14 = vpop.eup %8435  ;;  %v5418_v17 = vadd.f32 %v7522_v20, %v5034_v37  ;;  %v7529_v5 = vunpack.c.l.bf16 %v11631_v60  ;;  %v13010_v8 = vld [vmem:[#allocation26_spill] sm:$0xff]  ;;  %4900 = vbcast.lane.b32.xlu1 %v11055_v45, 376  ;;  %v13011_v45 = vld [vmem:[#allocation64_spill] sm:$0xff] }
 0x2b7   : > { %v11646_v54 = vadd.f32 %v4676_v25, %v11476_v51  ;;  %v5938_v49 = vadd.f32 %v5786_v18, %v5785_v42  ;;  %v5360_v3 = vadd.f32 %v7406_v48, %v13010_v8  ;;  %v7969_v39 = vpop.f32.mrb[40].mxu1  ;;  %v5788_v20 = vmul.f32 %v8436_v14, %v11177_v23  ;;  %v11660_v42 = vld [vmem:[%s9077_s26 + $0x120] sm:$0xff]   ;;  %5692 = vperm.xlu0 %8293, %v5622_v62  }
 0x2b8   : > { %13009 = vst [vmem:[#allocation99_spill] sm:$0xff] %v11642_v19  ;;  %8447 = vtanh.f32 %v5418_v17  ;;  %v5039_v30 = vadd.f32 %v7969_v39, %v11448_v56  ;;  %v4086_v6 = vpop.f32.mrb[41].mxu1  ;;  %v11672_v14 = vpop.f32.mrb[44].mxu0 }
 0x2b9   : > { %v4806_v37 = vpop.permute.xlu1 %4805  ;;  %v5939_v28 = vadd.f32 %v5938_v49, %v5787_v0  ;;  %v8438_v16 = vpop.eup %8437  ;;  %8449 = vtanh.f32 %v5420_v34  ;;  %v5037_v17 = vadd.f32 %v13011_v45, %v4086_v6  ;;  %v7530_v49 = vunpack.c.h.bf16 %v11631_v60  ;;  %13012 = vst [vmem:[#allocation104_spill] sm:$0xff] %v11672_v14  ;;  %v13014_v45 = vld [vmem:[#allocation35_spill] sm:$0xff]  ;;  %v11745_v14 = vld [vmem:[%s9077_s26 + $0x1d0] sm:$0xff]  }
 0x2ba   : > { %v11662_v18 = vadd.f32 %v4806_v37, %v4202_v59  ;;  %v11664_v48 = vpop.permute.xlu0 %4935  ;;  %v7970_v25 = vpop.f32.mrb[42].mxu1  ;;  %v5789_v62 = vmul.f32 %v8438_v16, %v11174_v43  ;;  %v5423_v8 = vadd.f32 %v7533_v21, %v5039_v30  ;;  %8451 = vtanh.f32 %v5360_v3  ;;  %5697 = vperm.xlu1 %8294, %v5623_v7   ;;  %v11695_v3 = vld [vmem:[%s9077_s26 + $0x1c8] sm:$0xff]  }
 0x2bb   : > { %v8440_v59 = vpop.eup %8439  ;;  %v5940_v0 = vadd.f32 %v5939_v28, %v5788_v20  ;;  %v11680_v34 = vadd.f32 %v7970_v25, %v11506_v1  ;;  %v4089_v39 = vpop.f32.mrb[43].mxu1  ;;  %v5421_v6 = vadd.f32 %v7529_v5, %v5037_v17  ;;  %8453 = vtanh.f32 %v5376_v33  ;;  %v11698_v5 = vld [vmem:[%s9077_s26 + $0x1c0] sm:$0xff]   ;;  %4967 = vbcast.lane.b32.xlu0 %v11090_v52, 376 }
 0x2bc   : > { %v11682_v60 = vpop.f32.mrb[45].mxu0  ;;  %v8442_v37 = vpop.eup %8441  ;;  %v5038_v51 = vadd.f32 %v13014_v45, %v4089_v39  ;;  %v13016_v1 = vunpack.c.l.bf16 %v11588_v22  ;;  %v6001_v25 = vld [vmem:[%s533_s3] sm:$0xff]  ;;  %v13018_v33 = vunpack.c.l.bf16 %v11598_v13  ;;  %v5791_v52 = vmul.f32 %v8440_v59, %v11181_v11 }
 0x2bd   : > { %13013 = vst [vmem:[#allocation103_spill] sm:$0xff] %v11682_v60  ;;  %v11685_v56 = vpop.f32.mrb[46].mxu0  ;;  %v4743_v16 = vpop.permute.xlu1 %4742  ;;  %v5941_v20 = vadd.f32 %v5940_v0, %v5789_v62  ;;  %v5790_v28 = vmul.f32 %v8442_v37, %v11183_v47  ;;  %8455 = vtanh.f32 %v5421_v6  ;;  %v5624_v62 = vld [vmem:[%s12587_s6 + $0x78] sm:$0xff]  ;;  %v13020_v0 = vunpack.c.h.bf16 %v11414_v41 }
 0x2be   : > { %13015 = vst [vmem:[#allocation54_spill] sm:$0xff] %v11685_v56  ;;  %v5361_v21 = vadd.f32 %v13016_v1, %v11461_v44  ;;  %v11692_v30 = vpop.f32.mrb[47].mxu0  ;;  %v4613_v17 = vpop.permute.xlu0 %4612  ;;  %v5377_v7 = vadd.f32 %v13018_v33, %v11479_v38  ;;  %v5422_v39 = vadd.f32 %v7530_v49, %v5038_v51  ;;  %8457 = vtanh.f32 %v5423_v8  ;;  %6003 = vperm.xlu1 %8294, %v6001_v25  }
 0x2bf   : > { %13017 = vst [vmem:[#allocation38_spill] sm:$0xff] %v11692_v30  ;;  %v11705_v44 = vadd.f32 %v11519_v12, %v4613_v17  ;;  %v5408_v37 = vadd.f32 %v13020_v0, %v11482_v63  ;;  %v5942_v45 = vadd.f32 %v5941_v20, %v5790_v28  ;;  %v8444_v1 = vpop.eup %8443  ;;  %v13021_v38 = vunpack.c.h.bf16 %v11468_v26  ;;  %v11717_v12 = vpop.f32.mrb[44].mxu1  ;;  %v11725_v20 = vld [vmem:[%s9077_s26 + $0x1d8] sm:$0xff]   ;;  %5702 = vperm.xlu0 %8293, %v5624_v62   ;;  %v13025_v62 = vld [vmem:[#allocation40_spill] sm:$0xff] }
 0x2c0   : > { %8459 = vtanh.f32 %v5422_v39  ;;  %v7621_v49 = vunpack.c.l.bf16 %v11695_v3  ;;  %v7617_v6 = vunpack.c.l.bf16 %v11698_v5  ;;  %v8446_v41 = vpop.eup %8445  ;;  %v4102_v59 = vpop.f32.mrb[45].mxu1  ;;  %v7622_v8 = vunpack.c.h.bf16 %v11695_v3  ;;  %v13022_v26 = vld [vmem:[#allocation105_spill] sm:$0xff] }
 0x2c1   : > { %13019 = vst [vmem:[#allocation44_spill] sm:$0xff] %v11705_v44  ;;  %v5392_v51 = vadd.f32 %v13021_v38, %v11501_v2  ;;  %v4483_v17 = vpop.permute.xlu1 %4482  ;;  %8461 = vtanh.f32 %v5361_v21  ;;  %v11721_v63 = vadd.f32 %v5942_v45, %v5791_v52  ;;  %v13024_v25 = vunpack.c.l.bf16 %v11607_v58  ;;  %v8025_v0 = vpop.f32.mrb[48].mxu0 }
 0x2c2   : > { %v11728_v2 = vadd.f32 %v13022_v26, %v4483_v17  ;;  %v11730_v28 = vpop.permute.xlu0 %4872  ;;  %v8448_v33 = vpop.eup %8447  ;;  %8463 = vtanh.f32 %v5377_v7  ;;  %v11736_v39 = vadd.f32 %v11584_v31, %v4102_v59  ;;  %v7618_v3 = vunpack.c.h.bf16 %v11698_v5  ;;  %v13026_v31 = vld [vmem:[#allocation31_spill] sm:$0xff] }
 0x2c3   : > { %v5393_v21 = vadd.f32 %v13024_v25, %v11531_v40  ;;  %v11739_v52 = vpop.f32.mrb[46].mxu1  ;;  %8465 = vtanh.f32 %v5408_v37  ;;  %v5769_v45 = vmul.f32 %v8444_v1, %v11165_v10  ;;  %v5770_v38 = vmul.f32 %v8448_v33, %v11157_v24  ;;  %v4370_v7 = vpop.f32.mrb[49].mxu0 }
 0x2c4   : > { %13023 = vst [vmem:[#allocation23_spill] sm:$0xff] %v11728_v2  ;;  %v5083_v17 = vadd.f32 %v8025_v0, %v13025_v62  ;;  %v4105_v26 = vpop.f32.mrb[47].mxu1  ;;  %v8450_v40 = vpop.eup %8449  ;;  %8467 = vtanh.f32 %v5392_v51  ;;  %v5081_v59 = vadd.f32 %v13026_v31, %v4370_v7  ;;  %v7629_v5 = vunpack.c.l.bf16 %v11725_v20  ;;  %v13027_v0 = vld [vmem:[#allocation106_spill] sm:$0xff]  ;;  %v13028_v7 = vld [vmem:[#allocation27_spill] sm:$0xff] }
 0x2c5   : > { %v8026_v25 = vpop.f32.mrb[50].mxu0  ;;  %v11749_v56 = vadd.f32 %v4743_v16, %v4105_v26  ;;  %v4680_v37 = vpop.permute.xlu1 %4679  ;;  %v5771_v1 = vmul.f32 %v8446_v41, %v11163_v55  ;;  %v5917_v33 = vadd.f32 %v5770_v38, %v5769_v45  ;;  %8469 = vtanh.f32 %v5393_v21 }
 0x2c6   : > { %v5467_v30 = vadd.f32 %v7621_v49, %v5083_v17  ;;  %v5084_v62 = vadd.f32 %v8026_v25, %v13027_v0  ;;  %v4373_v60 = vpop.f32.mrb[51].mxu0  ;;  %v4550_v2 = vpop.permute.xlu0 %4549  ;;  %v5465_v51 = vadd.f32 %v7617_v6, %v5081_v59  ;;  %v7625_v19 = vunpack.c.l.bf16 %v11745_v14  ;;  %v13031_v59 = vld [vmem:[#allocation98_spill] sm:$0xff] }
 0x2c7   : > { %v11753_v44 = vpop.eup %8451  ;;  %v5082_v31 = vadd.f32 %v13028_v7, %v4373_v60  ;;  %v5772_v41 = vmul.f32 %v8450_v40, %v11177_v23  ;;  %v5918_v45 = vadd.f32 %v5917_v33, %v5771_v1  ;;  %v13029_v49 = vunpack.c.l.bf16 %v11617_v35  ;;  %v11769_v26 = vpop.f32.mrb[48].mxu1 }
 0x2c8   : > { %v11760_v16 = vpop.eup %8453  ;;  %v11767_v17 = vadd.f32 %v11458_v61, %v4680_v37  ;;  %8471 = vtanh.f32 %v5465_v51  ;;  %v5468_v6 = vadd.f32 %v7622_v8, %v5084_v62  ;;  %13030 = vst [vmem:[#allocation30_spill] sm:$0xff] %v11769_v26  ;;  %v11772_v25 = vadd.f32 %v13031_v59, %v4550_v2  ;;  %v8029_v2 = vpop.f32.mrb[52].mxu0 }
 0x2c9   : > { %v5409_v38 = vadd.f32 %v13029_v49, %v11546_v32  ;;  %v8456_v21 = vpop.eup %8455  ;;  %v5466_v60 = vadd.f32 %v7618_v3, %v5082_v31  ;;  %v11774_v0 = vpop.permute.xlu1 %4939  ;;  %v5919_v33 = vadd.f32 %v5918_v45, %v5772_v41  ;;  %8473 = vtanh.f32 %v5467_v30 }
 0x2ca   : > { %13032 = vst [vmem:[#allocation24_spill] sm:$0xff] %v11772_v25  ;;  %v8458_v40 = vpop.eup %8457  ;;  %v5773_v1 = vmul.f32 %v8456_v21, %v11174_v43  ;;  %v11777_v32 = vpop.f32.mrb[49].mxu1  ;;  %v7569_v61 = vunpack.c.l.bf16 %v11758_v4  ;;  %v13034_v8 = vunpack.c.h.bf16 %v11543_v53  ;;  %v7630_v62 = vunpack.c.h.bf16 %v11725_v20 }
 0x2cb   : > { %13033 = vst [vmem:[#allocation42_spill] sm:$0xff] %v11777_v32  ;;  %v4810_v37 = vpop.permute.xlu0 %4809  ;;  %v8460_v51 = vpop.eup %8459  ;;  %8475 = vtanh.f32 %v5466_v60  ;;  %v5087_v49 = vadd.f32 %v8029_v2, %v11555_v46  ;;  %v13037_v20 = vunpack.c.h.bf16 %v11611_v9  ;;  %v7694_v9 = vld [vmem:[%s9077_s26 + $0x180] sm:$0xff]  }
 0x2cc   : > { %v5440_v3 = vadd.f32 %v13034_v8, %v11580_v57  ;;  %v11784_v7 = vpop.f32.mrb[50].mxu1  ;;  %v11787_v31 = vadd.f32 %v4810_v37, %v11639_v36  ;;  %v11789_v30 = vpop.eup %8461  ;;  %v5920_v41 = vadd.f32 %v5919_v33, %v5773_v1  ;;  %8477 = vtanh.f32 %v5409_v38  ;;  %v11803_v1 = vld [vmem:[%s9077_s26 + $0x188] sm:$0xff]  }
 0x2cd   : > { %13035 = vst [vmem:[#allocation29_spill] sm:$0xff] %v11784_v7  ;;  %v5774_v45 = vmul.f32 %v8460_v51, %v11183_v47  ;;  %v4386_v53 = vpop.f32.mrb[53].mxu0  ;;  %v11793_v57 = vpop.f32.mrb[51].mxu1  ;;  %v5424_v60 = vadd.f32 %v13037_v20, %v11680_v34  ;;  %8479 = vtanh.f32 %v5468_v6  ;;  %v7626_v38 = vunpack.c.h.bf16 %v11745_v14  ;;  %v13040_v20 = vld [vmem:[#allocation37_spill] sm:$0xff] }
 0x2ce   : > { %13036 = vst [vmem:[#allocation39_spill] sm:$0xff] %v11793_v57  ;;  %v11795_v21 = vpop.eup %8463  ;;  %v5085_v36 = vadd.f32 %v11425_v27, %v4386_v53  ;;  %v8030_v59 = vpop.f32.mrb[54].mxu0  ;;  %v5775_v37 = vmul.f32 %v8458_v40, %v11181_v11  ;;  %v5471_v8 = vadd.f32 %v7629_v5, %v5087_v49  ;;  %8481 = vtanh.f32 %v5440_v3 }
 0x2cf   : > { %v4617_v33 = vpop.permute.xlu1 %4616  ;;  %v11805_v46 = vpop.eup %8465  ;;  %v5921_v51 = vadd.f32 %v5920_v41, %v5774_v45  ;;  %v5088_v2 = vadd.f32 %v8030_v59, %v11664_v48  ;;  %v5441_v40 = vadd.f32 %v7569_v61, %v11662_v18  ;;  %v7589_v5 = vunpack.c.l.bf16 %v11803_v1  ;;  %v13041_v59 = vld [vmem:[#allocation90_spill] sm:$0xff] }
 0x2d0   : > { %v4389_v7 = vpop.f32.mrb[55].mxu0  ;;  %v11810_v34 = vpop.eup %8467  ;;  %v5469_v27 = vadd.f32 %v7625_v19, %v5085_v36  ;;  %v11814_v14 = vadd.f32 %v11529_v29, %v4617_v33  ;;  %8483 = vtanh.f32 %v5471_v8  ;;  %v13039_v48 = vunpack.c.l.bf16 %v11660_v42 }
 0x2d1   : > { %v5086_v6 = vadd.f32 %v11491_v15, %v4389_v7  ;;  %v11816_v53 = vadd.f32 %v5921_v51, %v5775_v37  ;;  %v11820_v41 = vpop.eup %8469  ;;  %v8005_v3 = vpop.f32.mrb[52].mxu1  ;;  %v7585_v15 = vunpack.c.l.bf16 %v7694_v9  ;;  %v5472_v49 = vadd.f32 %v7630_v62, %v5088_v2 }
 0x2d2   : > { %13038 = vst [vmem:[#allocation51_spill] sm:$0xff] %v11814_v14  ;;  %v5425_v45 = vadd.f32 %v13039_v48, %v11736_v39  ;;  %8485 = vtanh.f32 %v5469_v27  ;;  %v5067_v18 = vadd.f32 %v8005_v3, %v13040_v20  ;;  %v4270_v61 = vpop.f32.mrb[53].mxu1  ;;  %v8472_v36 = vpop.eup %8471  ;;  %v7590_v39 = vunpack.c.h.bf16 %v11803_v1 }
 0x2d3   : > { %v5470_v19 = vadd.f32 %v7626_v38, %v5086_v6  ;;  %v11825_v7 = vpop.permute.xlu1 %4876  ;;  %8487 = vtanh.f32 %v5424_v60  ;;  %v5065_v33 = vadd.f32 %v13041_v59, %v4270_v61  ;;  %v8006_v37 = vpop.f32.mrb[54].mxu1  ;;  %v7586_v38 = vunpack.c.h.bf16 %v7694_v9  ;;  %v13043_v60 = vld [vmem:[#allocation69_spill] sm:$0xff]  ;;  %v13044_v61 = vld [vmem:[#allocation79_spill] sm:$0xff] }
 0x2d4   : > { %v11831_v51 = vpop.f32.mrb[56].mxu0  ;;  %v8474_v8 = vpop.eup %8473  ;;  %v5451_v62 = vadd.f32 %v7589_v5, %v5067_v18  ;;  %v5068_v2 = vadd.f32 %v8006_v37, %v13043_v60  ;;  %v7697_v9 = vld [vmem:[%s9077_s26 + $0x198] sm:$0xff]   ;;  %v5817_v5 = vmul.f32 %v8472_v36, %v11165_v10  ;;  %v7696_v37 = vld [vmem:[%s9077_s26 + $0x190] sm:$0xff]  }
 0x2d5   : > { %8489 = vtanh.f32 %v5470_v19  ;;  %13042 = vst [vmem:[#allocation57_spill] sm:$0xff] %v11831_v51  ;;  %v4273_v6 = vpop.f32.mrb[55].mxu1  ;;  %v4402_v48 = vpop.f32.mrb[57].mxu0  ;;  %v11836_v19 = vld [vmem:[%s9077_s26 + $0x1e0] sm:$0xff]   ;;  %v5449_v20 = vadd.f32 %v7585_v15, %v5065_v33  ;;  %v7597_v36 = vunpack.c.l.bf16 %v7697_v9  ;;  %v7598_v57 = vunpack.c.h.bf16 %v7697_v9  ;;  %v13062_v51 = vld [vmem:[#allocation49_spill] sm:$0xff] }
 0x2d6   : > { %8491 = vtanh.f32 %v5441_v40  ;;  %v8476_v3 = vpop.eup %8475  ;;  %v5066_v1 = vadd.f32 %v13044_v61, %v4273_v6  ;;  %v5089_v59 = vadd.f32 %v11774_v0, %v4402_v48  ;;  %v11841_v26 = vpop.f32.mrb[58].mxu0  ;;  %v5452_v33 = vadd.f32 %v7590_v39, %v5068_v2  ;;  %v13047_v39 = vld [vmem:[#allocation55_spill] sm:$0xff] }
 0x2d7   : > { %8493 = vtanh.f32 %v5425_v45  ;;  %v4554_v29 = vpop.permute.xlu1 %4553  ;;  %13045 = vst [vmem:[#allocation52_spill] sm:$0xff] %v11841_v26  ;;  %v11843_v40 = vpop.eup %8477  ;;  %v5818_v18 = vmul.f32 %v8476_v3, %v11157_v24  ;;  %v7633_v6 = vunpack.c.l.bf16 %v11836_v19  ;;  %v5819_v48 = vmul.f32 %v8474_v8, %v11163_v55 }
 0x2d8   : > { %8495 = vtanh.f32 %v5472_v49  ;;  %v11849_v60 = vadd.f32 %v4554_v29, %v11428_v50  ;;  %v11851_v45 = vpop.f32.mrb[59].mxu0  ;;  %v8480_v15 = vpop.eup %8479  ;;  %v5450_v0 = vadd.f32 %v7586_v38, %v5066_v1  ;;  %v7593_v3 = vunpack.c.l.bf16 %v7696_v37  ;;  %v13048_v1 = vld [vmem:[#allocation28_spill] sm:$0xff] }
 0x2d9   : > { %8497 = vtanh.f32 %v5449_v20  ;;  %v5980_v61 = vadd.f32 %v5818_v18, %v5817_v5  ;;  %v8482_v27 = vpop.eup %8481  ;;  %v8009_v49 = vpop.f32.mrb[56].mxu1  ;;  %v7594_v50 = vunpack.c.h.bf16 %v7696_v37  ;;  %v5820_v26 = vmul.f32 %v8480_v15, %v11177_v23  ;;  %v13050_v5 = vld [vmem:[#allocation33_spill] sm:$0xff] }
 0x2da   : > { %13046 = vst [vmem:[#allocation66_spill] sm:$0xff] %v11849_v60  ;;  %8499 = vtanh.f32 %v5451_v62  ;;  %v8484_v32 = vpop.eup %8483  ;;  %v5071_v38 = vadd.f32 %v8009_v49, %v13047_v39  ;;  %v4286_v2 = vpop.f32.mrb[57].mxu1  ;;  %v5473_v9 = vadd.f32 %v7633_v6, %v5089_v59  ;;  %v13054_v6 = vld [vmem:[#allocation63_spill] sm:$0xff] }
 0x2db   : > { %8501 = vtanh.f32 %v5450_v0  ;;  %v4814_v29 = vpop.permute.xlu1 %4813  ;;  %v5981_v20 = vadd.f32 %v5980_v61, %v5819_v48  ;;  %v11860_v8 = vpop.permute.xlu0 %5662  ;;  %v5069_v18 = vadd.f32 %v13050_v5, %v4286_v2  ;;  %v5823_v2 = vmul.f32 %v8484_v32, %v11181_v11 }
 0x2dc   : > { %v11858_v60 = vadd.f32 %v13048_v1, %v4814_v29  ;;  %v8486_v62 = vpop.eup %8485  ;;  %8503 = vtanh.f32 %v5452_v33  ;;  %v8010_v0 = vpop.f32.mrb[58].mxu1  ;;  %v5712_v37 = vmul.f32 %v11753_v44, %v11860_v8  ;;  %v5455_v49 = vadd.f32 %v7597_v36, %v5071_v38  ;;  %v13052_v29 = vld [vmem:[#allocation83_spill] sm:$0xff]  ;;  %v11881_v38 = vld [vmem:[%s9077_s26 + $0x1a0] sm:$0xff]  }
 0x2dd   : > { %v11865_v14 = vpop.f32.mrb[60].mxu0  ;;  %v8488_v15 = vpop.eup %8487  ;;  %v5821_v48 = vmul.f32 %v8486_v62, %v11174_v43  ;;  %v5982_v61 = vadd.f32 %v5981_v20, %v5820_v26  ;;  %v5072_v39 = vadd.f32 %v8010_v0, %v13052_v29  ;;  %v5453_v59 = vadd.f32 %v7593_v3, %v5069_v18 }
 0x2de   : > { %13049 = vst [vmem:[#allocation68_spill] sm:$0xff] %v11858_v60  ;;  %13051 = vst [vmem:[#allocation62_spill] sm:$0xff] %v11865_v14  ;;  %v4289_v1 = vpop.f32.mrb[59].mxu1  ;;  %v11869_v25 = vpop.f32.mrb[61].mxu0  ;;  %v5728_v44 = vmul.f32 %v11760_v16, %v11860_v8  ;;  %8505 = vtanh.f32 %v5455_v49  ;;  %v5744_v16 = vmul.f32 %v11810_v34, %v11860_v8  ;;  %v5760_v18 = vmul.f32 %v11805_v46, %v11860_v8  ;;  %v13058_v46 = vld [vmem:[#allocation21_spill] sm:$0xff] }
 0x2df   : > { %13053 = vst [vmem:[#allocation61_spill] sm:$0xff] %v11869_v25  ;;  %v8490_v33 = vpop.eup %8489  ;;  %v5070_v5 = vadd.f32 %v13054_v6, %v4289_v1  ;;  %v11875_v14 = vpop.f32.mrb[62].mxu0  ;;  %v5983_v26 = vadd.f32 %v5982_v61, %v5821_v48  ;;  %v5456_v20 = vadd.f32 %v7598_v57, %v5072_v39  ;;  %8507 = vtanh.f32 %v5453_v59  ;;  %v13057_v59 = vld [vmem:[#allocation25_spill] sm:$0xff] }
 0x2e0   : > { %13055 = vst [vmem:[#allocation71_spill] sm:$0xff] %v11875_v14  ;;  %v11877_v62 = vpop.eup %8491  ;;  %v5822_v36 = vmul.f32 %v8490_v33, %v11183_v47  ;;  %v4747_v0 = vpop.permute.xlu0 %4746  ;;  %v5776_v57 = vmul.f32 %v8488_v15, %v11860_v8  ;;  %v5792_v49 = vmul.f32 %v8482_v27, %v11860_v8  ;;  %v7601_v33 = vunpack.c.l.bf16 %v11881_v38  ;;  %v13060_v27 = vld [vmem:[#allocation46_spill] sm:$0xff] }
 0x2e1   : > { %v11883_v29 = vpop.f32.mrb[63].mxu0  ;;  %v11885_v32 = vpop.eup %8493  ;;  %v5454_v3 = vadd.f32 %v7594_v50, %v5070_v5  ;;  %8509 = vtanh.f32 %v5456_v20  ;;  %v11898_v34 = vadd.f32 %v13057_v59, %v5712_v37  ;;  %v13059_v5 = vunpack.c.h.bf16 %v11588_v22  ;;  %v13061_v37 = vld [vmem:[#allocation93_spill] sm:$0xff] }
 0x2e2   : > { %13056 = vst [vmem:[#allocation80_spill] sm:$0xff] %v11883_v29  ;;  %v8496_v48 = vpop.eup %8495  ;;  %v5984_v61 = vadd.f32 %v5983_v26, %v5822_v36  ;;  %v11893_v1 = vpop.f32.mrb[60].mxu1  ;;  %v5860_v20 = vadd.f32 %v13060_v27, %v5728_v44  ;;  %v5881_v59 = vadd.f32 %v13061_v37, %v5744_v16  ;;  %v5902_v60 = vadd.f32 %v13062_v51, %v5760_v18 }
 0x2e3   : > { %v8498_v39 = vpop.eup %8497  ;;  %8511 = vtanh.f32 %v5454_v3  ;;  %v5824_v50 = vmul.f32 %v8496_v48, %v11860_v8  ;;  %v5362_v26 = vadd.f32 %v13059_v5, %v13058_v46  ;;  %v4302_v15 = vpop.f32.mrb[61].mxu1  ;;  %v7474_v51 = vunpack.c.h.bf16 %v11607_v58 }
 0x2e4   : > { %v8500_v6 = vpop.eup %8499  ;;  %v5985_v36 = vadd.f32 %v5984_v61, %v5823_v2  ;;  %8513 = vtanh.f32 %v5473_v9  ;;  %v4487_v3 = vpop.permute.xlu0 %4486  ;;  %v5801_v29 = vmul.f32 %v8498_v39, %v11165_v10  ;;  %v5073_v25 = vadd.f32 %v11730_v28, %v4302_v15  ;;  %v13063_v39 = vld [vmem:[#allocation84_spill] sm:$0xff] }
 0x2e5   : > { %v8502_v14 = vpop.eup %8501  ;;  %v11906_v48 = vpop.f32.mrb[62].mxu1  ;;  %v5923_v9 = vadd.f32 %v11816_v53, %v5776_v57  ;;  %v5944_v2 = vadd.f32 %v11721_v63, %v5792_v49  ;;  %v11917_v28 = vadd.f32 %v11717_v12, %v4747_v0  ;;  %v11920_v16 = vadd.f32 %v4487_v3, %v13063_v39  ;;  %v13064_v49 = vld [vmem:[#allocation56_spill] sm:$0xff] }
 0x2e6   : > { %v5802_v22 = vmul.f32 %v8502_v14, %v11157_v24  ;;  %v4305_v46 = vpop.f32.mrb[63].mxu1  ;;  %v5986_v44 = vadd.f32 %v5985_v36, %v5824_v50  ;;  %v8504_v61 = vpop.eup %8503  ;;  %v5457_v5 = vadd.f32 %v7601_v33, %v5073_v25  ;;  %v7506_v24 = vunpack.c.h.bf16 %v11617_v35  ;;  %v13067_v36 = vld [vmem:[#allocation95_spill] sm:$0xff] }
 0x2e7   : > { %v11914_v10 = vadd.f32 %v11825_v7, %v4305_v46  ;;  %v5803_v14 = vmul.f32 %v8500_v6, %v11163_v55  ;;  %v7538_v18 = vunpack.c.h.bf16 %v11660_v42  ;;  %v7570_v25 = vunpack.c.h.bf16 %v11758_v4  ;;  %v5668_v58 = vpop.permute.xlu1 %5667  ;;  %v11938_v6 = vpop.f32.mrb[64].mxu1 }
 0x2e8   : > { %v5959_v53 = vadd.f32 %v5802_v22, %v5801_v29  ;;  %v4684_v63 = vpop.permute.xlu0 %4683  ;;  %8515 = vtanh.f32 %v5457_v5  ;;  %v7602_v7 = vunpack.c.h.bf16 %v11881_v38  ;;  %v8506_v12 = vpop.eup %8505  ;;  %v5804_v0 = vmul.f32 %v8504_v61, %v11177_v23  ;;  %v13065_v29 = vld [vmem:[#allocation59_spill] sm:$0xff] }
 0x2e9   : > { %v11930_v33 = vadd.f32 %v13064_v49, %v4684_v63  ;;  %v7634_v35 = vunpack.c.h.bf16 %v11836_v19  ;;  %v8508_v55 = vpop.eup %8507  ;;  %8517 = vtanh.f32 %v5362_v26  ;;  %v13066_v42 = vunpack.c.h.bf16 %v11598_v13  ;;  %v11943_v26 = vpop.f32.mrb[65].mxu1 }
 0x2ea   : > { %v5960_v57 = vadd.f32 %v5959_v53, %v5803_v14  ;;  %v5713_v4 = vmul.f32 %v11789_v30, %v5668_v58  ;;  %v5729_v38 = vmul.f32 %v11795_v21, %v5668_v58  ;;  %v5394_v15 = vadd.f32 %v7474_v51, %v13067_v36  ;;  %v11949_v61 = vpop.f32.mrb[66].mxu1  ;;  %v11963_v53 = vld [vmem:[%s9077_s26 + $0x28] sm:$0xff]  }
 0x2eb   : > { %v5378_v50 = vadd.f32 %v13066_v42, %v13065_v29  ;;  %v8510_v23 = vpop.eup %8509  ;;  %v5410_v27 = vadd.f32 %v7506_v24, %v11646_v54  ;;  %v5805_v3 = vmul.f32 %v8508_v55, %v11174_v43  ;;  %v5426_v13 = vadd.f32 %v7538_v18, %v11749_v56  ;;  %v4751_v24 = vpop.permute.xlu1 %4750  ;;  %v11994_v55 = vld [vmem:[%s9077_s26 + $0xe8] sm:$0xff]  }
 0x2ec   : > { %v5961_v19 = vadd.f32 %v5960_v57, %v5804_v0  ;;  %v4944_v37 = vpop.permute.xlu0 %4943  ;;  %v5808_v30 = vmul.f32 %v8510_v23, %v11860_v8  ;;  %v5745_v21 = vmul.f32 %v11820_v41, %v5668_v58  ;;  %v5761_v46 = vmul.f32 %v11843_v40, %v5668_v58  ;;  %v11954_v14 = vpop.f32.mrb[67].mxu1  ;;  %v11980_v0 = vld [vmem:[%s9077_s26 + $0x68] sm:$0xff]   ;;  %v13068_v57 = vld [vmem:[#allocation100_spill] sm:$0xff] }
 0x2ed   : > { %v8512_v22 = vpop.eup %8511  ;;  %v5807_v54 = vmul.f32 %v8506_v12, %v11181_v11  ;;  %v5777_v51 = vmul.f32 %v11885_v32, %v5668_v58  ;;  %v5793_v56 = vmul.f32 %v11877_v62, %v5668_v58  ;;  %v11958_v41 = vadd.f32 %v11898_v34, %v5713_v4 }
 0x2ee   : > { %v8514_v5 = vpop.eup %8513  ;;  %v5962_v43 = vadd.f32 %v5961_v19, %v5805_v3  ;;  %v5806_v39 = vmul.f32 %v8512_v22, %v11183_v47  ;;  %v11960_v40 = vadd.f32 %v5860_v20, %v5729_v38  ;;  %v11965_v63 = vadd.f32 %v5881_v59, %v5745_v21  ;;  %v11998_v38 = vld [vmem:[%s9077_s26 + $0x168] sm:$0xff]   ;;  %v13071_v22 = vld [vmem:[#allocation44_spill] sm:$0xff] }
 0x2ef   : > { %v5825_v8 = vmul.f32 %v8514_v5, %v5668_v58  ;;  %v11967_v47 = vadd.f32 %v5902_v60, %v5761_v46  ;;  %v11969_v32 = vadd.f32 %v5923_v9, %v5777_v51  ;;  %v11971_v12 = vadd.f32 %v5944_v2, %v5793_v56  ;;  %v11986_v2 = vpop.permute.xlu1 %4490  ;;  %v12010_v3 = vld [vmem:[%s9077_s26 + $0x128] sm:$0xff]   ;;  %v13072_v56 = vld [vmem:[#allocation68_spill] sm:$0xff] }
 0x2f0   : > { %v5963_v11 = vadd.f32 %v5962_v43, %v5806_v39  ;;  %v4621_v18 = vpop.permute.xlu0 %4620  ;;  %v5090_v34 = vadd.f32 %v4944_v37, %v11851_v45  ;;  %v11977_v20 = vadd.f32 %v11739_v52, %v4751_v24  ;;  %8519 = vtanh.f32 %v5378_v50  ;;  %v11990_v45 = vld [vmem:[%s9077_s26 + $0xa8] sm:$0xff]   ;;  %v12027_v24 = vld [vmem:[%s9077_s26 + $0x70] sm:$0xff]  }
 0x2f1   : > { %v11973_v62 = vadd.f32 %v5986_v44, %v5825_v8  ;;  %v5442_v60 = vadd.f32 %v7570_v25, %v11787_v31  ;;  %v11984_v9 = vadd.f32 %v4621_v18, %v13068_v57  ;;  %8521 = vtanh.f32 %v5394_v15  ;;  %v12020_v21 = vld [vmem:[%s9077_s26 + $0x1e8] sm:$0xff]  }
 0x2f2   : > { %v5964_v59 = vadd.f32 %v5963_v11, %v5807_v54  ;;  %v8516_v49 = vpop.eup %8515  ;;  %v7413_v44 = vunpack.c.l.bf16 %v11963_v53  ;;  %v5458_v52 = vadd.f32 %v7602_v7, %v11914_v10  ;;  %8523 = vtanh.f32 %v5410_v27 }
 0x2f3   : > { %v5809_v42 = vmul.f32 %v8516_v49, %v5668_v58  ;;  %v5474_v31 = vadd.f32 %v7634_v35, %v5090_v34  ;;  %v8518_v50 = vpop.eup %8517  ;;  %v7445_v4 = vunpack.c.l.bf16 %v11980_v0  ;;  %8525 = vtanh.f32 %v5426_v13  ;;  %v12004_v36 = vpop.permute.xlu1 %4687  ;;  %v13069_v35 = vld [vmem:[#allocation34_spill] sm:$0xff]  ;;  %v12033_v34 = vld [vmem:[%s9077_s26 + $0x30] sm:$0xff]  }
 0x2f4   : > { %v5965_v29 = vadd.f32 %v5964_v59, %v5808_v30  ;;  %v4881_v25 = vpop.permute.xlu0 %4880  ;;  %v7477_v10 = vunpack.c.l.bf16 %v11990_v45  ;;  %8527 = vtanh.f32 %v5442_v60  ;;  %v7509_v58 = vunpack.c.l.bf16 %v11994_v55  ;;  %v12017_v30 = vld [vmem:[%s9077_s26 + $0x1a8] sm:$0xff]   ;;  %v13073_v60 = vld [vmem:[#allocation57_spill] sm:$0xff] }
 0x2f5   : > { %v5075_v23 = vadd.f32 %v11893_v1, %v4881_v25  ;;  %8529 = vtanh.f32 %v5458_v52  ;;  %v5363_v15 = vadd.f32 %v7413_v44, %v13069_v35  ;;  %v7573_v27 = vunpack.c.l.bf16 %v11998_v38  ;;  %v13070_v1 = vld [vmem:[#allocation99_spill] sm:$0xff] }
 0x2f6   : > { %v12002_v7 = vadd.f32 %v5965_v29, %v5809_v42  ;;  %8531 = vtanh.f32 %v5474_v31  ;;  %v5379_v37 = vadd.f32 %v7445_v4, %v13070_v1  ;;  %v5395_v13 = vadd.f32 %v7477_v10, %v13071_v22  ;;  %v13074_v25 = vld [vmem:[#allocation23_spill] sm:$0xff]  ;;  %v13075_v10 = vld [vmem:[#allocation24_spill] sm:$0xff] }
 0x2f7   : > { %v4948_v46 = vpop.permute.xlu1 %4947  ;;  %v5411_v5 = vadd.f32 %v7509_v58, %v11767_v17  ;;  %v7541_v54 = vunpack.c.l.bf16 %v12010_v3  ;;  %8533 = vtanh.f32 %v5363_v15  ;;  %v7414_v39 = vunpack.c.h.bf16 %v11963_v53 }
 0x2f8   : > { %v12012_v19 = vpop.permute.xlu0 %4557  ;;  %v7446_v51 = vunpack.c.h.bf16 %v11980_v0  ;;  %v5443_v8 = vadd.f32 %v7573_v27, %v13072_v56  ;;  %8535 = vtanh.f32 %v5379_v37  ;;  %v7605_v17 = vunpack.c.l.bf16 %v12017_v30 }
 0x2f9   : > { %v7637_v59 = vunpack.c.l.bf16 %v12020_v21  ;;  %v5091_v57 = vadd.f32 %v13073_v60, %v4948_v46  ;;  %8537 = vtanh.f32 %v5395_v13  ;;  %v7478_v53 = vunpack.c.h.bf16 %v11990_v45 }
 0x2fa   : > { %v8520_v43 = vpop.eup %8519  ;;  %8539 = vtanh.f32 %v5411_v5  ;;  %v7449_v52 = vunpack.c.l.bf16 %v12027_v24  ;;  %v5427_v29 = vadd.f32 %v7541_v54, %v11917_v28  ;;  %v7510_v42 = vunpack.c.h.bf16 %v11994_v55 }
 0x2fb   : > { %v8522_v18 = vpop.eup %8521  ;;  %v12039_v0 = vpop.permute.xlu1 %4624  ;;  %v5364_v4 = vadd.f32 %v7414_v39, %v13074_v25  ;;  %v5380_v58 = vadd.f32 %v7446_v51, %v13075_v10  ;;  %8541 = vtanh.f32 %v5443_v8  ;;  %v7417_v35 = vunpack.c.l.bf16 %v12033_v34 }
 0x2fc   : > { %v12030_v11 = vpop.permute.xlu0 %4817  ;;  %v8524_v49 = vpop.eup %8523  ;;  %v5459_v27 = vadd.f32 %v7605_v17, %v5075_v23  ;;  %v5475_v1 = vadd.f32 %v7637_v59, %v5091_v57  ;;  %8543 = vtanh.f32 %v5427_v29  ;;  %v13076_v59 = vld [vmem:[#allocation51_spill] sm:$0xff]  ;;  %v12081_v29 = vld [vmem:[%s9077_s26 + $0xf0] sm:$0xff]  }
 0x2fd   : > { %v8526_v44 = vpop.eup %8525  ;;  %v5396_v60 = vadd.f32 %v7478_v53, %v13076_v59  ;;  %v5412_v53 = vadd.f32 %v7510_v42, %v11930_v33  ;;  %v7450_v33 = vunpack.c.h.bf16 %v12027_v24 }
 0x2fe   : > { %v8528_v31 = vpop.eup %8527  ;;  %8545 = vtanh.f32 %v5459_v27 }
 0x2ff   : > { %v8530_v45 = vpop.eup %8529  ;;  %v12047_v55 = vpop.permute.xlu1 %4884  ;;  %8547 = vtanh.f32 %v5475_v1 }
 0x300   : > { %v5673_v15 = vpop.permute.xlu0 %5672  ;;  %v8532_v13 = vpop.eup %8531  ;;  %8549 = vtanh.f32 %v5364_v4  ;;  %v7513_v4 = vunpack.c.l.bf16 %v12081_v29 }
 0x301   : > { %v5714_v37 = vmul.f32 %v8518_v50, %v5673_v15  ;;  %v5730_v22 = vmul.f32 %v8520_v43, %v5673_v15  ;;  %v5746_v46 = vmul.f32 %v8522_v18, %v5673_v15  ;;  %v5762_v5 = vmul.f32 %v8524_v49, %v5673_v15  ;;  %v13077_v49 = vld [vmem:[#allocation66_spill] sm:$0xff] }
 0x302   : > { %v5778_v28 = vmul.f32 %v8526_v44, %v5673_v15  ;;  %v5794_v54 = vmul.f32 %v8528_v31, %v5673_v15  ;;  %v5810_v39 = vmul.f32 %v8530_v45, %v5673_v15  ;;  %v5826_v51 = vmul.f32 %v8532_v13, %v5673_v15 }
 0x303   : > { %v5841_v56 = vadd.f32 %v11958_v41, %v5714_v37  ;;  %v12051_v8 = vadd.f32 %v11960_v40, %v5730_v22  ;;  %v12054_v50 = vadd.f32 %v11965_v63, %v5746_v46  ;;  %v12057_v23 = vadd.f32 %v11967_v47, %v5762_v5  ;;  %v8534_v63 = vpop.eup %8533  ;;  %v12075_v47 = vld [vmem:[%s9077_s26 + $0xb0] sm:$0xff]  }
 0x304   : > { %v12060_v43 = vadd.f32 %v11969_v32, %v5778_v28  ;;  %v12062_v18 = vpop.permute.xlu0 %4754  ;;  %v12065_v17 = vadd.f32 %v11971_v12, %v5794_v54  ;;  %v12068_v41 = vadd.f32 %v12002_v7, %v5810_v39  ;;  %v12071_v40 = vadd.f32 %v11973_v62, %v5826_v51  ;;  %v12077_v32 = vpop.permute.xlu1 %4561  ;;  %v13080_v28 = vld [vmem:[#allocation102_spill] sm:$0xff]  ;;  %v13081_v54 = vld [vmem:[#allocation101_spill] sm:$0xff] }
 0x305   : > { %v8536_v57 = vpop.eup %8535  ;;  %v5381_v44 = vadd.f32 %v7449_v52, %v13077_v49  ;;  %v5365_v7 = vadd.f32 %v7417_v35, %v11920_v16  ;;  %v7542_v62 = vunpack.c.h.bf16 %v12010_v3  ;;  %8551 = vtanh.f32 %v5380_v58  ;;  %v13078_v52 = vld [vmem:[#allocation43_spill] sm:$0xff]  ;;  %v13079_v16 = vld [vmem:[#allocation45_spill] sm:$0xff] }
 0x306   : > { %v8538_v12 = vpop.eup %8537  ;;  %v7481_v10 = vunpack.c.l.bf16 %v12075_v47  ;;  %v7418_v15 = vunpack.c.h.bf16 %v12033_v34  ;;  %8553 = vtanh.f32 %v5396_v60  ;;  %v4982_v27 = vadd.f32 %v11986_v2, %v13078_v52  ;;  %v13082_v49 = vld [vmem:[#allocation65_spill] sm:$0xff] }
 0x307   : > { %v8540_v25 = vpop.eup %8539  ;;  %v5029_v3 = vadd.f32 %v12004_v36, %v13079_v16  ;;  %8555 = vtanh.f32 %v5381_v44  ;;  %v7574_v34 = vunpack.c.h.bf16 %v11998_v38  ;;  %v7482_v1 = vunpack.c.h.bf16 %v12075_v47  ;;  %v12149_v52 = vld [vmem:[%s9077_s26 + $0x38] sm:$0xff]  }
 0x308   : > { %v12085_v31 = vpop.permute.xlu0 %4494  ;;  %v8542_v45 = vpop.eup %8541  ;;  %8557 = vtanh.f32 %v5365_v7  ;;  %v7606_v2 = vunpack.c.h.bf16 %v12017_v30  ;;  %v5428_v37 = vadd.f32 %v7542_v62, %v11977_v20  ;;  %v5397_v36 = vadd.f32 %v7481_v10, %v11984_v9 }
 0x309   : > { %v12095_v35 = vpop.permute.xlu1 %4821  ;;  %v8544_v58 = vpop.eup %8543  ;;  %8559 = vtanh.f32 %v5412_v53  ;;  %v5366_v22 = vadd.f32 %v7418_v15, %v4982_v27  ;;  %v5413_v13 = vadd.f32 %v7513_v4, %v5029_v3  ;;  %v4998_v24 = vadd.f32 %v12012_v19, %v13080_v28  ;;  %v12135_v15 = vld [vmem:[%s9077_s26 + $0x78] sm:$0xff]   ;;  %v13084_v3 = vld [vmem:[#allocation42_spill] sm:$0xff] }
 0x30a   : > { %v8546_v5 = vpop.eup %8545  ;;  %v5060_v39 = vadd.f32 %v13081_v54, %v12030_v11  ;;  %v5014_v44 = vadd.f32 %v12039_v0, %v13082_v49  ;;  %v12116_v11 = vld [vmem:[%s9077_s26 + $0x130] sm:$0xff]   ;;  %v5076_v10 = vadd.f32 %v11906_v48, %v12047_v55  ;;  %8561 = vtanh.f32 %v5428_v37 }
 0x30b   : > { %v8548_v59 = vpop.eup %8547  ;;  %v7638_v48 = vunpack.c.h.bf16 %v12020_v21  ;;  %v13083_v55 = vld [vmem:[#allocation52_spill] sm:$0xff]  ;;  %8563 = vtanh.f32 %v5397_v36  ;;  %v7453_v21 = vunpack.c.l.bf16 %v12135_v15 }
 0x30c   : > { %v12098_v42 = vpop.permute.xlu0 %4691  ;;  %v12113_v19 = vpop.eup %8549  ;;  %8565 = vtanh.f32 %v5366_v22  ;;  %v5398_v37 = vadd.f32 %v7482_v1, %v5014_v44  ;;  %v13087_v1 = vld [vmem:[#allocation103_spill] sm:$0xff]  ;;  %v12186_v44 = vld [vmem:[%s9077_s26 + $0xb8] sm:$0xff]  }
 0x30d   : > { %v5678_v46 = vpop.permute.xlu1 %5677  ;;  %8567 = vtanh.f32 %v5413_v13 }
 0x30e   : > { %v5715_v38 = vmul.f32 %v8534_v63, %v5678_v46  ;;  %v5731_v51 = vmul.f32 %v8536_v57, %v5678_v46  ;;  %v5747_v60 = vmul.f32 %v8538_v12, %v5678_v46  ;;  %v5763_v30 = vmul.f32 %v8540_v25, %v5678_v46 }
 0x30f   : > { %v5779_v47 = vmul.f32 %v8544_v58, %v5678_v46  ;;  %v5795_v20 = vmul.f32 %v8542_v45, %v5678_v46  ;;  %v5811_v7 = vmul.f32 %v8546_v5, %v5678_v46  ;;  %v5827_v62 = vmul.f32 %v8548_v59, %v5678_v46  ;;  %v12159_v58 = vld [vmem:[%s9077_s26 + $0x170] sm:$0xff]  }
 0x310   : > { %v4952_v9 = vpop.permute.xlu0 %4951  ;;  %v12111_v53 = vadd.f32 %v5841_v56, %v5715_v38  ;;  %v12119_v63 = vadd.f32 %v12051_v8, %v5731_v51  ;;  %v12122_v57 = vadd.f32 %v12054_v50, %v5747_v60  ;;  %v12125_v12 = vadd.f32 %v12057_v23, %v5763_v30  ;;  %v12130_v56 = vpop.eup %8551  ;;  %v13085_v46 = vld [vmem:[#allocation32_spill] sm:$0xff] }
 0x311   : > { %v12128_v0 = vadd.f32 %v12060_v43, %v5779_v47  ;;  %v4759_v25 = vpop.permute.xlu1 %4758  ;;  %v12138_v8 = vadd.f32 %v12065_v17, %v5795_v20  ;;  %v12141_v50 = vadd.f32 %v12068_v41, %v5811_v7  ;;  %v12144_v23 = vadd.f32 %v12071_v40, %v5827_v62  ;;  %v12146_v43 = vpop.eup %8553  ;;  %v13088_v59 = vld [vmem:[#allocation76_spill] sm:$0xff]  ;;  %v13089_v47 = vld [vmem:[#allocation39_spill] sm:$0xff] }
 0x312   : > { %v5382_v45 = vadd.f32 %v7450_v33, %v4998_v24  ;;  %v5092_v27 = vadd.f32 %v13083_v55, %v4952_v9  ;;  %v12153_v16 = vpop.eup %8555  ;;  %v5444_v17 = vadd.f32 %v7574_v34, %v5060_v39  ;;  %v7545_v41 = vunpack.c.l.bf16 %v12116_v11  ;;  %v12183_v9 = vld [vmem:[%s9077_s26 + $0x1f0] sm:$0xff]  }
 0x313   : > { %v5045_v40 = vadd.f32 %v12062_v18, %v13084_v3  ;;  %v12161_v33 = vpop.eup %8557  ;;  %v4999_v5 = vadd.f32 %v13085_v46, %v12077_v32  ;;  %v5460_v34 = vadd.f32 %v7606_v2, %v5076_v10  ;;  %v7421_v24 = vunpack.c.l.bf16 %v12149_v52  ;;  %v13086_v18 = vld [vmem:[#allocation41_spill] sm:$0xff]  ;;  %v12175_v32 = vld [vmem:[%s9077_s26 + $0x1b0] sm:$0xff]  }
 0x314   : > { %v4629_v4 = vpop.permute.xlu0 %4628  ;;  %v12166_v36 = vpop.eup %8559  ;;  %v4983_v54 = vadd.f32 %v13086_v18, %v12085_v31  ;;  %8569 = vtanh.f32 %v5382_v45  ;;  %v7577_v22 = vunpack.c.l.bf16 %v12159_v58  ;;  %v5061_v39 = vadd.f32 %v12095_v35, %v13087_v1  ;;  %v13091_v46 = vld [vmem:[#allocation92_spill] sm:$0xff]  ;;  %v13093_v18 = vld [vmem:[#allocation81_spill] sm:$0xff] }
 0x315   : > { %v4499_v28 = vpop.permute.xlu1 %4498  ;;  %v5476_v38 = vadd.f32 %v7638_v48, %v5092_v27  ;;  %8571 = vtanh.f32 %v5444_v17  ;;  %v5429_v13 = vadd.f32 %v7545_v41, %v5045_v40  ;;  %v7514_v2 = vunpack.c.h.bf16 %v12081_v29  ;;  %v8562_v45 = vpop.eup %8561  ;;  %v13090_v40 = vld [vmem:[#allocation61_spill] sm:$0xff] }
 0x316   : > { %v5030_v31 = vadd.f32 %v12098_v42, %v13088_v59  ;;  %8573 = vtanh.f32 %v5398_v37  ;;  %v5383_v60 = vadd.f32 %v7453_v21, %v4999_v5  ;;  %v7546_v30 = vunpack.c.h.bf16 %v12116_v11  ;;  %v12191_v42 = vld [vmem:[%s9077_s26 + $0xf8] sm:$0xff]   ;;  %v12196_v41 = vpop.eup %8563  ;;  %v13094_v59 = vld [vmem:[#allocation50_spill] sm:$0xff] }
 0x317   : > { %v5046_v20 = vadd.f32 %v4759_v25, %v13089_v47  ;;  %8575 = vtanh.f32 %v5460_v34  ;;  %v5367_v49 = vadd.f32 %v7421_v24, %v4983_v54  ;;  %v7609_v7 = vunpack.c.l.bf16 %v12175_v32  ;;  %v12200_v21 = vpop.eup %8565  ;;  %v13092_v34 = vld [vmem:[#allocation36_spill] sm:$0xff] }
 0x318   : > { %v4889_v51 = vpop.permute.xlu0 %4888  ;;  %v5445_v62 = vadd.f32 %v7577_v22, %v5061_v39  ;;  %8577 = vtanh.f32 %v5476_v38  ;;  %v5414_v11 = vadd.f32 %v7514_v2, %v5030_v31  ;;  %v7641_v25 = vunpack.c.l.bf16 %v12183_v9  ;;  %v12208_v1 = vpop.eup %8567 }
 0x319   : > { %v4696_v35 = vpop.permute.xlu1 %4695  ;;  %v5077_v29 = vadd.f32 %v4889_v51, %v11943_v26  ;;  %8579 = vtanh.f32 %v5429_v13  ;;  %v5430_v48 = vadd.f32 %v7546_v30, %v5046_v20  ;;  %v7485_v55 = vunpack.c.l.bf16 %v12186_v44 }
 0x31a   : > { %8581 = vtanh.f32 %v5383_v60  ;;  %v7422_v27 = vunpack.c.h.bf16 %v12149_v52  ;;  %v7517_v3 = vunpack.c.l.bf16 %v12191_v42  ;;  %v5015_v5 = vadd.f32 %v13091_v46, %v4629_v4  ;;  %v12206_v52 = vld [vmem:[%s9077_s26 + $0x138] sm:$0xff]  }
 0x31b   : > { %8583 = vtanh.f32 %v5367_v49  ;;  %v5461_v26 = vadd.f32 %v7609_v7, %v5077_v29  ;;  %v4984_v24 = vadd.f32 %v13092_v34, %v4499_v28  ;;  %v5031_v54 = vadd.f32 %v13093_v18, %v4696_v35 }
 0x31c   : > { %v4566_v10 = vpop.permute.xlu0 %4565  ;;  %8585 = vtanh.f32 %v5445_v62  ;;  %v7454_v51 = vunpack.c.h.bf16 %v12135_v15  ;;  %v7578_v13 = vunpack.c.h.bf16 %v12159_v58  ;;  %v7486_v4 = vunpack.c.h.bf16 %v12186_v44  ;;  %v13095_v58 = vld [vmem:[#allocation38_spill] sm:$0xff] }
 0x31d   : > { %v4956_v17 = vpop.permute.xlu1 %4955  ;;  %8587 = vtanh.f32 %v5414_v11  ;;  %v5000_v31 = vadd.f32 %v13094_v59, %v4566_v10  ;;  %v7610_v60 = vunpack.c.h.bf16 %v12175_v32  ;;  %v7549_v30 = vunpack.c.l.bf16 %v12206_v52  ;;  %v13096_v44 = vld [vmem:[#allocation74_spill] sm:$0xff] }
 0x31e   : > { %v5093_v37 = vadd.f32 %v4956_v17, %v13090_v40  ;;  %v12210_v38 = vpop.eup %8569  ;;  %8589 = vtanh.f32 %v5430_v48  ;;  %v5399_v20 = vadd.f32 %v7485_v55, %v5015_v5  ;;  %v5368_v35 = vadd.f32 %v7422_v27, %v4984_v24 }
 0x31f   : > { %v8572_v28 = vpop.eup %8571  ;;  %8591 = vtanh.f32 %v5461_v26  ;;  %v5415_v49 = vadd.f32 %v7517_v3, %v5031_v54  ;;  %v5384_v3 = vadd.f32 %v7454_v51, %v5000_v31  ;;  %v13097_v51 = vld [vmem:[#allocation30_spill] sm:$0xff] }
 0x320   : > { %v4826_v22 = vpop.permute.xlu0 %4825  ;;  %v5477_v39 = vadd.f32 %v7641_v25, %v5093_v37  ;;  %v12218_v47 = vpop.eup %8573 }
 0x321   : > { %v4633_v2 = vpop.permute.xlu1 %4632  ;;  %v8576_v7 = vpop.eup %8575  ;;  %v5062_v29 = vadd.f32 %v4826_v22, %v13095_v58 }
 0x322   : > { %8593 = vtanh.f32 %v5477_v39  ;;  %v5016_v62 = vadd.f32 %v13096_v44, %v4633_v2  ;;  %v8578_v25 = vpop.eup %8577 }
 0x323   : > { %v8580_v26 = vpop.eup %8579  ;;  %8595 = vtanh.f32 %v5399_v20  ;;  %v5446_v18 = vadd.f32 %v7578_v13, %v5062_v29  ;;  %v13098_v13 = vld [vmem:[#allocation104_spill] sm:$0xff] }
 0x324   : > { %v5683_v15 = vpop.permute.xlu0 %5682  ;;  %v12227_v5 = vpop.eup %8581  ;;  %8597 = vtanh.f32 %v5368_v35 }
 0x325   : > { %v5716_v11 = vmul.f32 %v12113_v19, %v5683_v15  ;;  %v5732_v10 = vmul.f32 %v12130_v56, %v5683_v15  ;;  %v5748_v32 = vmul.f32 %v12146_v43, %v5683_v15  ;;  %v5764_v48 = vmul.f32 %v12166_v36, %v5683_v15  ;;  %v4893_v17 = vpop.permute.xlu1 %4892  ;;  %v12236_v24 = vpop.eup %8583 }
 0x326   : > { %v5780_v55 = vmul.f32 %v8562_v45, %v5683_v15  ;;  %v5796_v27 = vmul.f32 %v8572_v28, %v5683_v15  ;;  %v5812_v40 = vmul.f32 %v8576_v7, %v5683_v15  ;;  %v5828_v37 = vmul.f32 %v8578_v25, %v5683_v15  ;;  %v12234_v45 = vld [vmem:[%s9077_s26 + $0x178] sm:$0xff]   ;;  %v8586_v22 = vpop.eup %8585 }
 0x327   : > { %v5843_v46 = vadd.f32 %v12111_v53, %v5716_v11  ;;  %v5864_v19 = vadd.f32 %v12119_v63, %v5732_v10  ;;  %v5885_v56 = vadd.f32 %v12122_v57, %v5748_v32  ;;  %v5906_v43 = vadd.f32 %v12125_v12, %v5764_v48  ;;  %v12242_v39 = vpop.eup %8587 }
 0x328   : > { %v5927_v34 = vadd.f32 %v12128_v0, %v5780_v55  ;;  %v4763_v36 = vpop.permute.xlu0 %4762  ;;  %v5948_v53 = vadd.f32 %v12138_v8, %v5796_v27  ;;  %v5969_v54 = vadd.f32 %v12141_v50, %v5812_v40  ;;  %v5400_v63 = vadd.f32 %v7486_v4, %v5016_v62  ;;  %v12248_v8 = vld [vmem:[%s9077_s26 + $0x1b8] sm:$0xff]   ;;  %v12250_v50 = vpop.eup %8589 }
 0x329   : > { %v5078_v57 = vadd.f32 %v4893_v17, %v11954_v14  ;;  %v4830_v12 = vpop.permute.xlu1 %4829  ;;  %v5990_v0 = vadd.f32 %v12144_v23, %v5828_v37  ;;  %8599 = vtanh.f32 %v5415_v49  ;;  %v5047_v2 = vadd.f32 %v13097_v51, %v4763_v36  ;;  %v8592_v31 = vpop.eup %8591  ;;  %v12262_v17 = vld [vmem:[%s9077_s26 + $0x1f8] sm:$0xff]   ;;  %s12338_s26 = sshll.u32 %s9073_s25, 3 }
 0x32a   : > { %v7581_v28 = vunpack.c.l.bf16 %v12234_v45  ;;  %v5063_v59 = vadd.f32 %v13098_v13, %v4830_v12  ;;  %8601 = vtanh.f32 %v5384_v3  ;;  %v7518_v14 = vunpack.c.h.bf16 %v12191_v42  ;;  %s509_s28 = scalar_lea.vmem [#allocation8], %s12338_s26  ;;  %s516_s24 = scalar_lea.vmem [#allocation10], %s12338_s26 }
 0x32b   : > { %8603 = vtanh.f32 %v5446_v18  ;;  %v7642_v23 = vunpack.c.h.bf16 %v12183_v9  ;;  %v5462_v35 = vadd.f32 %v7610_v60, %v5078_v57  ;;  %v7613_v15 = vunpack.c.l.bf16 %v12248_v8  ;;  %v13099_v60 = vld [vmem:[#allocation67_spill] sm:$0xff] }
 0x32c   : > { %v4700_v4 = vpop.permute.xlu0 %4699  ;;  %v8594_v20 = vpop.eup %8593  ;;  %8605 = vtanh.f32 %v5400_v63  ;;  %v7550_v7 = vunpack.c.h.bf16 %v12206_v52  ;;  %v5431_v58 = vadd.f32 %v7549_v30, %v5047_v2  ;;  %v5447_v29 = vadd.f32 %v7581_v28, %v5063_v59  ;;  %v13102_v2 = vld [vmem:[#allocation62_spill] sm:$0xff] }
 0x32d   : > { %v5688_v49 = vpop.permute.xlu1 %5687  ;;  %v5032_v32 = vadd.f32 %v13099_v60, %v4700_v4  ;;  %8607 = vtanh.f32 %v5462_v35  ;;  %v7582_v13 = vunpack.c.h.bf16 %v12234_v45 }
 0x32e   : > { %v5717_v44 = vmul.f32 %v12161_v33, %v5688_v49  ;;  %v5733_v62 = vmul.f32 %v12153_v16, %v5688_v49  ;;  %v5749_v11 = vmul.f32 %v12196_v41, %v5688_v49  ;;  %v5765_v42 = vmul.f32 %v12208_v1, %v5688_v49  ;;  %v8596_v16 = vpop.eup %8595  ;;  %v13100_v41 = vld [vmem:[#allocation80_spill] sm:$0xff] }
 0x32f   : > { %v5781_v9 = vmul.f32 %v8580_v26, %v5688_v49  ;;  %v5797_v10 = vmul.f32 %v8586_v22, %v5688_v49  ;;  %v5813_v48 = vmul.f32 %v8592_v31, %v5688_v49  ;;  %v5829_v55 = vmul.f32 %v8594_v20, %v5688_v49  ;;  %v12270_v18 = vpop.eup %8597  ;;  %v13103_v31 = vld [vmem:[#allocation54_spill] sm:$0xff] }
 0x330   : > { %v4960_v25 = vpop.permute.xlu0 %4959  ;;  %v5844_v27 = vadd.f32 %v5843_v46, %v5717_v44  ;;  %v5865_v52 = vadd.f32 %v5864_v19, %v5733_v62  ;;  %v5886_v30 = vadd.f32 %v5885_v56, %v5749_v11  ;;  %v5907_v3 = vadd.f32 %v5906_v43, %v5765_v42 }
 0x331   : > { %v5928_v33 = vadd.f32 %v5927_v34, %v5781_v9  ;;  %v4897_v40 = vpop.permute.xlu1 %4896  ;;  %v12264_v37 = vadd.f32 %v5948_v53, %v5797_v10  ;;  %v5094_v1 = vadd.f32 %v4960_v25, %v13100_v41  ;;  %v12268_v36 = vadd.f32 %v5969_v54, %v5813_v48  ;;  %v13101_v53 = vld [vmem:[#allocation29_spill] sm:$0xff] }
 0x332   : > { %v5079_v26 = vadd.f32 %v11938_v6, %v4897_v40  ;;  %v7645_v22 = vunpack.c.l.bf16 %v12262_v17  ;;  %v12273_v19 = vadd.f32 %v5990_v0, %v5829_v55  ;;  %8609 = vtanh.f32 %v5431_v58 }
 0x333   : > { %v8600_v56 = vpop.eup %8599  ;;  %v5478_v43 = vadd.f32 %v7642_v23, %v5094_v1  ;;  %8611 = vtanh.f32 %v5447_v29  ;;  %v5416_v6 = vadd.f32 %v7518_v14, %v5032_v32  ;;  %v7614_v20 = vunpack.c.h.bf16 %v12248_v8 }
 0x334   : > { %v4767_v46 = vpop.permute.xlu0 %4766  ;;  %v5463_v34 = vadd.f32 %v7613_v15, %v5079_v26  ;;  %v12276_v57 = vpop.eup %8601  ;;  %v7646_v42 = vunpack.c.h.bf16 %v12262_v17 }
 0x335   : > { %v5048_v63 = vadd.f32 %v13101_v53, %v4767_v46  ;;  %v4964_v54 = vpop.permute.xlu1 %4963  ;;  %v8604_v12 = vpop.eup %8603  ;;  %8613 = vtanh.f32 %v5478_v43 }
 0x336   : > { %v5095_v28 = vadd.f32 %v13102_v2, %v4964_v54  ;;  %v8606_v0 = vpop.eup %8605  ;;  %8615 = vtanh.f32 %v5463_v34 }
 0x337   : > { %v5432_v51 = vadd.f32 %v7550_v7, %v5048_v63  ;;  %v8608_v29 = vpop.eup %8607 }
 0x338   : > { %v4834_v59 = vpop.permute.xlu0 %4833  ;;  %v5479_v4 = vadd.f32 %v7645_v22, %v5095_v28  ;;  %v13104_v22 = vld [vmem:[#allocation71_spill] sm:$0xff] }
 0x339   : > { %8617 = vtanh.f32 %v5432_v51  ;;  %v5064_v23 = vadd.f32 %v13103_v31, %v4834_v59  ;;  %v4901_v35 = vpop.permute.xlu1 %4900 }
 0x33a   : > { %8619 = vtanh.f32 %v5416_v6  ;;  %v5080_v49 = vadd.f32 %v11949_v61, %v4901_v35 }
 0x33b   : > { %8621 = vtanh.f32 %v5479_v4  ;;  %v5448_v14 = vadd.f32 %v7582_v13, %v5064_v23 }
 0x33c   : > { %v5693_v15 = vpop.permute.xlu0 %5692  ;;  %v5464_v7 = vadd.f32 %v7614_v20, %v5080_v49  ;;  %v8610_v9 = vpop.eup %8609 }
 0x33d   : > { %8623 = vtanh.f32 %v5448_v14  ;;  %v5718_v45 = vmul.f32 %v12200_v21, %v5693_v15  ;;  %v5734_v58 = vmul.f32 %v12210_v38, %v5693_v15  ;;  %v5750_v44 = vmul.f32 %v12218_v47, %v5693_v15  ;;  %v5698_v11 = vpop.permute.xlu1 %5697  ;;  %v8612_v60 = vpop.eup %8611 }
 0x33e   : > { %v5766_v62 = vmul.f32 %v12242_v39, %v5693_v15  ;;  %v5782_v8 = vmul.f32 %v12250_v50, %v5693_v15  ;;  %8625 = vtanh.f32 %v5464_v7  ;;  %v5798_v61 = vmul.f32 %v8604_v12, %v5693_v15 }
 0x33f   : > { %v5845_v10 = vadd.f32 %v5844_v27, %v5718_v45  ;;  %v5866_v25 = vadd.f32 %v5865_v52, %v5734_v58  ;;  %v5887_v32 = vadd.f32 %v5886_v30, %v5750_v44  ;;  %v5719_v38 = vmul.f32 %v12236_v24, %v5698_v11  ;;  %v8614_v47 = vpop.eup %8613 }
 0x340   : > { %v5908_v21 = vadd.f32 %v5907_v3, %v5766_v62  ;;  %v5929_v48 = vadd.f32 %v5928_v33, %v5782_v8  ;;  %v4968_v55 = vpop.permute.xlu0 %4967  ;;  %v5735_v39 = vmul.f32 %v12227_v5, %v5698_v11  ;;  %v5751_v40 = vmul.f32 %v8596_v16, %v5698_v11  ;;  %v8616_v1 = vpop.eup %8615 }
 0x341   : > { %v5767_v50 = vmul.f32 %v8600_v56, %v5698_v11  ;;  %v5783_v41 = vmul.f32 %v8610_v9, %v5698_v11  ;;  %v5814_v17 = vmul.f32 %v8608_v29, %v5693_v15  ;;  %v5799_v26 = vmul.f32 %v8612_v60, %v5698_v11 }
 0x342   : > { %v5846_v46 = vadd.f32 %v5845_v10, %v5719_v38  ;;  %v5096_v27 = vadd.f32 %v13104_v22, %v4968_v55  ;;  %v5867_v43 = vadd.f32 %v5866_v25, %v5735_v39  ;;  %v5888_v30 = vadd.f32 %v5887_v32, %v5751_v40 }
 0x343   : > { %v8618_v52 = vpop.eup %8617  ;;  %v5909_v3 = vadd.f32 %v5908_v21, %v5767_v50  ;;  %v5930_v33 = vadd.f32 %v5929_v48, %v5783_v41  ;;  %v5815_v63 = vmul.f32 %v8616_v1, %v5698_v11  ;;  %v5830_v6 = vmul.f32 %v8614_v47, %v5693_v15 }
 0x344   : > { %v8620_v34 = vpop.eup %8619  ;;  %v5480_v24 = vadd.f32 %v7646_v42, %v5096_v27  ;;  %v5703_v53 = vpop.permute.xlu0 %5702  ;;  %v5950_v5 = vadd.f32 %v12264_v37, %v5798_v61  ;;  %v5971_v37 = vadd.f32 %v12268_v36, %v5814_v17 }
 0x345   : > { %v8622_v16 = vpop.eup %8621  ;;  %v5720_v56 = vmul.f32 %v12270_v18, %v5703_v53  ;;  %v5736_v54 = vmul.f32 %v12276_v57, %v5703_v53  ;;  %v5752_v12 = vmul.f32 %v8606_v0, %v5703_v53  ;;  %v5768_v51 = vmul.f32 %v8620_v34, %v5703_v53 }
 0x346   : > { %8627 = vtanh.f32 %v5480_v24  ;;  %v5784_v2 = vmul.f32 %v8618_v52, %v5703_v53  ;;  %v5831_v28 = vmul.f32 %v8622_v16, %v5698_v11  ;;  %v5951_v13 = vadd.f32 %v5950_v5, %v5799_v26 }
 0x347   : > { %v8624_v59 = vpop.eup %8623  ;;  %v5847_v4 = vadd.f32 %v5846_v46, %v5720_v56  ;;  %v5868_v31 = vadd.f32 %v5867_v43, %v5736_v54  ;;  %v5889_v23 = vadd.f32 %v5888_v30, %v5752_v12  ;;  %v5910_v20 = vadd.f32 %v5909_v3, %v5768_v51 }
 0x348   : > { %v5800_v35 = vmul.f32 %v8624_v59, %v5703_v53  ;;  %v5931_v14 = vadd.f32 %v5930_v33, %v5784_v2  ;;  %v5992_v49 = vadd.f32 %v12273_v19, %v5830_v6  ;;  %v8626_v18 = vpop.eup %8625  ;;  %v5972_v44 = vadd.f32 %v5971_v37, %v5815_v63  ;;  %v6004_v37 = vpop.permute.xlu1 %6003 }
 0x349   : > { %v5848_v15 = vrot.slane %v5847_v4, 4  ;;  %v5869_v57 = vrot.slane %v5868_v31, 4  ;;  %v5890_v0 = vrot.slane %v5889_v23, 4  ;;  %v5911_v7 = vrot.slane %v5910_v20, 4 }
 0x34a   : > { %v5816_v45 = vmul.f32 %v8626_v18, %v5703_v53  ;;  %v5932_v58 = vrot.slane %v5931_v14, 4  ;;  %v5952_v29 = vadd.f32 %v5951_v13, %v5800_v35  ;;  %v5993_v25 = vadd.f32 %v5992_v49, %v5831_v28  ;;  %v13105_v18 = vld [vmem:[#allocation20_spill] sm:$0xff] }
 0x34b   : > { %v5849_v62 = vadd.f32 %v5848_v15, %v5847_v4  ;;  %v5870_v8 = vadd.f32 %v5869_v57, %v5868_v31  ;;  %v5891_v11 = vadd.f32 %v5890_v0, %v5889_v23  ;;  %v5912_v42 = vadd.f32 %v5911_v7, %v5910_v20  ;;  %v8309_v0 = vld [vmem:[%s9084_s17] sm:$0xff]  }
 0x34c   : > { %v5933_v9 = vadd.f32 %v5932_v58, %v5931_v14  ;;  %v5953_v61 = vrot.slane %v5952_v29, 4  ;;  %v5973_v10 = vadd.f32 %v5972_v44, %v5816_v45  ;;  %vm6005_vm15 = vcmp.lt.s32.totalorder %v13105_v18, %v6004_v37  ;;  %v8310_v7 = vld [vmem:[%s9084_s17 + $0x40] sm:$0xff]   ;;  %8040 = vmatpush3.bf16.msra.mxu1 %v8309_v0  ;;  %v8311_v45 = vld [vmem:[%s9084_s17 + $0x8] sm:$0xff]   ;;  %v8313_v44 = vld [vmem:[%s9084_s17 + $0x10] sm:$0xff]  }
 0x34d   : > { %v5850_v36 = vrot.slane %v5849_v62, 2  ;;  %v5871_v60 = vrot.slane %v5870_v8, 2  ;;  %v5892_v19 = vrot.slane %v5891_v11, 2  ;;  %v5913_v32 = vrot.slane %v5912_v42, 2  ;;  %8060 = vmatpush3.bf16.msra.mxu0 %v8310_v7  ;;  %v8312_v58 = vld [vmem:[%s9084_s17 + $0x48] sm:$0xff]   ;;  %v8347_v37 = vld [vmem:[%s9084_s17 + $0x118] sm:$0xff]  }
 0x34e   : > { %v5934_v21 = vrot.slane %v5933_v9, 2  ;;  %v5954_v48 = vadd.f32 %v5953_v61, %v5952_v29  ;;  %v5974_v38 = vrot.slane %v5973_v10, 4  ;;  %v13106_v29 = vmov 0.0   ;;  %v8349_v18 = vld [vmem:[%s9084_s17 + $0x120] sm:$0xff]   ;;  %v8351_v0 = vld [vmem:[%s9084_s17 + $0x128] sm:$0xff]  }
 0x34f   : > { %v5851_v55 = vadd.f32 %v5850_v36, %v5849_v62  ;;  %v5872_v47 = vadd.f32 %v5871_v60, %v5870_v8  ;;  %v5893_v39 = vadd.f32 %v5892_v19, %v5891_v11  ;;  %v5914_v40 = vadd.f32 %v5913_v32, %v5912_v42  ;;  %8041 = vmatprep.subr.bf16.mxu1 %v13106_v29  ;;  %v8314_v62 = vld [vmem:[%s9084_s17 + $0x50] sm:$0xff]   ;;  %v8315_v8 = vld [vmem:[%s9084_s17 + $0x18] sm:$0xff]   ;;  %v8318_v36 = vld [vmem:[%s9084_s17 + $0x60] sm:$0xff]  }
 0x350   : > { %v8628_v50 = vpop.eup %8627  ;;  %v5935_v41 = vadd.f32 %v5934_v21, %v5933_v9  ;;  %v5955_v1 = vrot.slane %v5954_v48, 2  ;;  %v5975_v17 = vadd.f32 %v5974_v38, %v5973_v10  ;;  %8061 = vmatprep.subr.bf16.mxu0 %v13106_v29  ;;  %8042 = vmatpush3.bf16.msra.mxu1 %v8311_v45  ;;  %v8316_v10 = vld [vmem:[%s9084_s17 + $0x58] sm:$0xff]   ;;  %v8319_v60 = vld [vmem:[%s9084_s17 + $0x28] sm:$0xff]   ;;  %v8321_v32 = vld [vmem:[%s9084_s17 + $0x30] sm:$0xff]  }
 0x351   : > { %v5832_v26 = vmul.f32 %v8628_v50, %v5703_v53  ;;  %v5852_v46 = vrot.slane %v5851_v55, 1  ;;  %v5873_v22 = vrot.slane %v5872_v47, 1  ;;  %v5894_v27 = vrot.slane %v5893_v39, 1  ;;  %8062 = vmatpush3.bf16.msra.mxu0 %v8312_v58  ;;  %8043 = vmatprep.subr.bf16.mxu1 %v13106_v29  ;;  %v8320_v19 = vld [vmem:[%s9084_s17 + $0x68] sm:$0xff]   ;;  %v8322_v21 = vld [vmem:[%s9084_s17 + $0x70] sm:$0xff]   ;;  %v8324_v38 = vld [vmem:[%s9084_s17 + $0x78] sm:$0xff]  }
 0x352   : > { %v5915_v52 = vrot.slane %v5914_v40, 1  ;;  %v5936_v43 = vrot.slane %v5935_v41, 1  ;;  %v5956_v30 = vadd.f32 %v5955_v1, %v5954_v48  ;;  %v5976_v3 = vrot.slane %v5975_v17, 2  ;;  %8063 = vmatprep.subr.bf16.mxu0 %v13106_v29  ;;  %v8323_v48 = vld [vmem:[%s9084_s17 + $0x38] sm:$0xff]   ;;  %v13107_v50 = vld [vmem:[#allocation22_spill] sm:$0xff]  ;;  %v8352_v7 = vld [vmem:[%s9084_s17 + $0x168] sm:$0xff]  }
 0x353   : > { %v5853_v33 = vadd.f32 %v5852_v46, %v5851_v55  ;;  %v5874_v34 = vadd.f32 %v5873_v22, %v5872_v47  ;;  %v5895_v24 = vadd.f32 %v5894_v27, %v5893_v39  ;;  %v5994_v63 = vadd.f32 %v5993_v25, %v5832_v26  ;;  %v8317_v25 = vld [vmem:[%s9084_s17 + $0x20] sm:$0xff]   ;;  %v8353_v58 = vld [vmem:[%s9084_s17 + $0x130] sm:$0xff]  }
 0x354   : > { %v5957_v6 = vrot.slane %v5956_v30, 1  ;;  %v5977_v5 = vadd.f32 %v5976_v3, %v5975_v17  ;;  %v5916_v16 = vadd.f32 %v5915_v52, %v5914_v40  ;;  %v5937_v53 = vadd.f32 %v5936_v43, %v5935_v41  ;;  %8044 = vmatpush3.bf16.msra.mxu1 %v8313_v44  ;;  %v6962_v39 = vld [vmem:[%s9133_s5] sm:$0xff]  ;;  %v8328_v3 = vld [vmem:[%s9084_s17 + $0xc8] sm:$0xff]   ;;  %v8354_v44 = vld [vmem:[%s9084_s17 + $0x170] sm:$0xff]   ;;  %s6970_s5 = sand.u32 1, %s8933_s21   ;;  %s8701_s21 = scalar_lea.vmem %s8700_s13, 256 }
 0x355   : > { %v5995_v56 = vrot.slane %v5994_v63, 4  ;;  %v6015_v54 = vsel %vm6014_vm8, %v5874_v34, %v5853_v33  ;;  %8064 = vmatpush3.bf16.msra.mxu0 %v8314_v62  ;;  %8045 = vmatprep.subr.bf16.mxu1 %v13106_v29  ;;  %v8325_v46 = vld [vmem:[%s9084_s17 + $0x80] sm:$0xff]   ;;  %v8329_v33 = vld [vmem:[%s9084_s17 + $0x90] sm:$0xff]   ;;  %s12478_s19 = scalar_lea.sflag [#allocation9], %s6970_s5 }
 0x356   : > { %v5958_v12 = vadd.f32 %v5957_v6, %v5956_v30  ;;  %v5978_v51 = vrot.slane %v5977_v5, 1  ;;  %v6017_v2 = vsel %vm6016_vm9, %v5895_v24, %v6015_v54  ;;  %8065 = vmatprep.subr.bf16.mxu0 %v13106_v29  ;;  %v8326_v52 = vld [vmem:[%s9084_s17 + $0xc0] sm:$0xff]   ;;  %v8327_v30 = vld [vmem:[%s9084_s17 + $0x88] sm:$0xff]   ;;  %v8330_v34 = vld [vmem:[%s9084_s17 + $0xd0] sm:$0xff]  }
 0x357   : > { %v5996_v28 = vadd.f32 %v5995_v56, %v5994_v63  ;;  %v6019_v13 = vsel %vm6018_vm10, %v5916_v16, %v6017_v2  ;;  %v8331_v24 = vld [vmem:[%s9084_s17 + $0x98] sm:$0xff]   ;;  %v8333_v6 = vld [vmem:[%s9084_s17 + $0xa0] sm:$0xff]   ;;  %v8335_v16 = vld [vmem:[%s9084_s17 + $0xa8] sm:$0xff]  }
 0x358   : > { %v5979_v59 = vadd.f32 %v5978_v51, %v5977_v5  ;;  %v6021_v4 = vsel %vm6020_vm11, %v5937_v53, %v6019_v13  ;;  %8046 = vmatpush3.bf16.msra.mxu1 %v8315_v8  ;;  %v8332_v63 = vld [vmem:[%s9084_s17 + $0xd8] sm:$0xff]   ;;  %v8334_v5 = vld [vmem:[%s9084_s17 + $0xe0] sm:$0xff]   ;;  %v8336_v56 = vld [vmem:[%s9084_s17 + $0xe8] sm:$0xff]  }
 0x359   : > { %v5997_v31 = vrot.slane %v5996_v28, 2  ;;  %v6023_v23 = vsel %vm6022_vm12, %v5958_v12, %v6021_v4  ;;  %8047 = vmatprep.subr.bf16.mxu1 %v13106_v29  ;;  %8066 = vmatpush3.bf16.msra.mxu0 %v8316_v10  ;;  %v8337_v54 = vld [vmem:[%s9084_s17 + $0xb0] sm:$0xff]   ;;  %v8339_v12 = vld [vmem:[%s9084_s17 + $0xb8] sm:$0xff]   ;;  %v8341_v13 = vld [vmem:[%s9084_s17 + $0x100] sm:$0xff]  }
 0x35a   : > { %v6025_v20 = vsel %vm6024_vm13, %v5979_v59, %v6023_v23  ;;  %8067 = vmatprep.subr.bf16.mxu0 %v13106_v29  ;;  %v8338_v53 = vld [vmem:[%s9084_s17 + $0xf0] sm:$0xff]   ;;  %v8340_v2 = vld [vmem:[%s9084_s17 + $0xf8] sm:$0xff]   ;;  %v8342_v4 = vld [vmem:[%s9084_s17 + $0x140] sm:$0xff]  }
 0x35b   : > { %v5998_v35 = vadd.f32 %v5997_v31, %v5996_v28  ;;  %v8343_v23 = vld [vmem:[%s9084_s17 + $0x108] sm:$0xff]   ;;  %v8355_v8 = vld [vmem:[%s9084_s17 + $0x138] sm:$0xff]  }
 0x35c   : > { %8048 = vmatpush3.bf16.msra.mxu1 %v8317_v25  ;;  %v8358_v25 = vld [vmem:[%s9084_s17 + $0x1c0] sm:$0xff]  }
 0x35d   : > { %v5999_v14 = vrot.slane %v5998_v35, 1  ;;  %8049 = vmatprep.subr.bf16.mxu1 %v13106_v29  ;;  %8068 = vmatpush3.bf16.msra.mxu0 %v8318_v36 }
 0x35e   : > { %8069 = vmatprep.subr.bf16.mxu0 %v13106_v29 }
 0x35f   : > { %v6000_v49 = vadd.f32 %v5999_v14, %v5998_v35  ;;  %v8345_v35 = vld [vmem:[%s9084_s17 + $0x110] sm:$0xff]  }
 0x360   : > { %8050 = vmatpush3.bf16.msra.mxu1 %v8319_v60  ;;  %v8346_v14 = vld [vmem:[%s9084_s17 + $0x150] sm:$0xff]   ;;  %v8359_v60 = vld [vmem:[%s9084_s17 + $0x188] sm:$0xff]  }
 0x361   : > { %v6027_v15 = vsel %vm6026_vm14, %v6000_v49, %v6025_v20  ;;  %8051 = vmatprep.subr.bf16.mxu1 %v13106_v29  ;;  %8070 = vmatpush3.bf16.msra.mxu0 %v8320_v19  ;;  %v8344_v20 = vld [vmem:[%s9084_s17 + $0x148] sm:$0xff]   ;;  %v8348_v49 = vld [vmem:[%s9084_s17 + $0x158] sm:$0xff]  }
 0x362   : > { %v6029_v57 = vsel %vm6005_vm15, %v6027_v15, -1e+30  ;;  %8071 = vmatprep.subr.bf16.mxu0 %v13106_v29  ;;  %v8350_v15 = vld [vmem:[%s9084_s17 + $0x160] sm:$0xff]   ;;  %v8360_v19 = vld [vmem:[%s9084_s17 + $0x1c8] sm:$0xff]  }
 0x363   : > { %6030 = vmax.xlane.f32.xlu0 %v6029_v57 }
 0x364   : > { %8052 = vmatpush3.bf16.msra.mxu1 %v8321_v32  ;;  %v8361_v32 = vld [vmem:[%s9084_s17 + $0x190] sm:$0xff]  }
 0x365   : > { %8053 = vmatprep.subr.bf16.mxu1 %v13106_v29  ;;  %8072 = vmatpush3.bf16.msra.mxu0 %v8322_v21  ;;  %v8362_v21 = vld [vmem:[%s9084_s17 + $0x1d0] sm:$0xff]  }
 0x366   : > { %8073 = vmatprep.subr.bf16.mxu0 %v13106_v29 }
 0x368   : > { %8054 = vmatpush3.bf16.msra.mxu1 %v8323_v48  ;;  %v8363_v48 = vld [vmem:[%s9084_s17 + $0x198] sm:$0xff]  }
 0x369   : > { %8079 = vmatprep.subr.bf16.mxu1 %v13106_v29  ;;  %8074 = vmatpush3.bf16.msra.mxu0 %v8324_v38  ;;  %v8364_v38 = vld [vmem:[%s9084_s17 + $0x1d8] sm:$0xff]  }
 0x36a   : > { %8099 = vmatprep.subr.bf16.mxu0 %v13106_v29 }
 0x3f0   : > { %v6031_v11 = vpop.xlane.xlu0 %6030 }
 0x3f1   : > { %v6032_v42 = vsub.f32 %v6029_v57, %v6031_v11 }
 0x3f3   : > { %v6033_v9 = vmul.f32 1.442695, %v6032_v42  ;;  %v8356_v42 = vld [vmem:[%s9084_s17 + $0x178] sm:$0xff]  }
 0x3f5   : > { %8629 = vpow2.f32 %v6033_v9 }
 0x3ff   : > { %v8630_v61 = vpop.eup %8629 }
 0x400   : > { %6035 = vadd.xlane.f32.xlu1 %v8630_v61 }
 0x48d   : > { %v6036_v55 = vpop.xlane.xlu1 %6035 }
 0x48e   : > { %8631 = vrcp.f32 %v6036_v55  ;;  %v8365_v55 = vld [vmem:[%s9084_s17 + $0x1a0] sm:$0xff]  }
 0x498   : > { %v8632_v47 = vpop.eup %8631 }
 0x499   : > { %v12341_v40 = vmul.f32 %v8632_v47, %v8630_v61  ;;  %v8357_v61 = vld [vmem:[%s9084_s17 + $0x180] sm:$0xff]  }
 0x49a   : > { %v8366_v47 = vld [vmem:[%s9084_s17 + $0x1e0] sm:$0xff]  }
 0x49b   : > { %v6047_v41 = vrot.slane %v12341_v40, %v13107_v50  ;;  %6961 = vst [vmem:[%s509_s28] sm:$0xff] %v12341_v40  ;;  %v6963_v1 = vadd.f32 %v6962_v39, %v12341_v40  ;;  %v6040_v57 = vcombine.high %v12341_v40, %v12341_v40  ;;  %v8367_v39 = vld [vmem:[%s9084_s17 + $0x1a8] sm:$0xff]  }
 0x49c   : > { %v8368_v40 = vld [vmem:[%s9084_s17 + $0x1e8] sm:$0xff]  }
 0x49d   : > { %v6063_v17 = vrot.slane %v6047_v41, %v13107_v50  ;;  %v6055_v26 = vcombine.high %v6047_v41, %v6047_v41  ;;  %6964 = vst [vmem:[%s516_s24] sm:$0xff] %v6963_v1  ;;  %v6054_v45 = vrot.slane %v6040_v57, %v13107_v50  ;;  %v8370_v41 = vld [vmem:[%s9084_s17 + $0x1f0] sm:$0xff]   ;;  %v8371_v1 = vld [vmem:[%s9084_s17 + $0x1b8] sm:$0xff]  }
 0x49f   : > { %v6097_v22 = vpack.c.bf16 %v6063_v17, %v6063_v17  ;;  %v6077_v27 = vrot.slane %v6055_v26, %v13107_v50  ;;  %v6085_v51 = vcombine.high %v6063_v17, %v6063_v17  ;;  %v6056_v62 = vcombine.high %v6054_v45, %v6054_v45  ;;  %v8372_v26 = vld [vmem:[%s9084_s17 + $0x1f8] sm:$0xff]  }
 0x4a0   : > { %v6070_v11 = vrot.slane %v6054_v45, %v13107_v50 }
 0x4a1   : > { %8056 = vmatmul.mubr.bf16.vlgmr.msra.gmra.mrb[68].mxu1 %v6097_v22  ;;  %v6098_v43 = vpack.c.bf16 %v6077_v27, %v6077_v27  ;;  %v6087_v28 = vcombine.high %v6077_v27, %v6077_v27  ;;  %v6099_v59 = vpack.c.bf16 %v6085_v51, %v6085_v51  ;;  %v6084_v9 = vrot.slane %v6056_v62, %v13107_v50  ;;  %v8369_v50 = vld [vmem:[%s9084_s17 + $0x1b0] sm:$0xff]   ;;  %s7002_s17 = sshll.u32 %s509_s28, 4  ;;  %s7003_s17 = int_to_ptr.vmem [resolvable:$true] %s7002_s17 }
 0x4a2   : > { %8080 = vmatpush3.bf16.msra.mxu1 %v8325_v46  ;;  %8095 = vmatprep.mubr.msk.bf16.mxu1 %vm12947_vm7, %v13106_v29  ;;  %v6101_v10 = vpack.c.bf16 %v6070_v11, %v6070_v11  ;;  %v6086_v17 = vcombine.high %v6070_v11, %v6070_v11  ;;  %s8695_s14 = scalar_lea.vmem %s7003_s17, 128  ;;  %p8702_p5 = scmp.lt.s32.totalorder %s7003_s17, %s8700_s13 }
 0x4a3   : > { %8076 = vmatmul.mubr.bf16.vlgmr.msra.gmra.mrb[64].mxu0 %v6098_v43  ;;  %8081 = vmatprep.subr.bf16.mxu1 %v13106_v29  ;;  %v6100_v31 = vpack.c.bf16 %v6087_v28, %v6087_v28  ;;  %v6102_v36 = vpack.c.bf16 %v6084_v9, %v6084_v9  ;;  %v6088_v46 = vcombine.high %v6084_v9, %v6084_v9  ;;  %p8696_p0 = scmp.ne.s32.totalorder %s7003_s17, %s8695_s14  ;;  %p8703_p10 = scmp.lt.s32.totalorder %s8701_s21, %s8695_s14 }
 0x4a4   : > { %8100 = vmatpush3.bf16.msra.mxu0 %v8326_v52  ;;  %8115 = vmatprep.mubr.msk.bf16.mxu0 %vm12947_vm7, %v13106_v29  ;;  %v6103_v22 = vpack.c.bf16 %v6086_v17, %v6086_v17 }
 0x4a5   : > { %8101 = vmatprep.subr.bf16.mxu0 %v13106_v29  ;;  %v6104_v27 = vpack.c.bf16 %v6088_v46, %v6088_v46  ;;  %p8697_p9 = pnand %p8696_p0, %p13108_p2  ;;  %p8704_p11 = por %p8703_p10, %p8702_p5 }
 0x4a6   : > { %8082 = vmatpush3.bf16.msra.mxu1 %v8327_v30 }
 0x4a7   : > { %8083 = vmatprep.subr.bf16.mxu1 %v13106_v29  ;;  %p8698_p4 = pneg %p8697_p9 }
 0x4a8   : > { %8102 = vmatpush3.bf16.msra.mxu0 %v8328_v3 }
 0x4a9   : > { %8103 = vmatprep.subr.bf16.mxu0 %v13106_v29  ;;  %p8705_p7 = pnand %p8704_p11, %p8698_p4 }
 0x4aa   : > { %8084 = vmatpush3.bf16.msra.mxu1 %v8329_v33 }
 0x4ab   : > { %8085 = vmatprep.subr.bf16.mxu1 %v13106_v29 }
 0x4ac   : > { %8104 = vmatpush3.bf16.msra.mxu0 %v8330_v34 }
 0x4ad   : > { %8105 = vmatprep.subr.bf16.mxu0 %v13106_v29 }
 0x4ae   : > { %8086 = vmatpush3.bf16.msra.mxu1 %v8331_v24 }
 0x4af   : > { %8087 = vmatprep.subr.bf16.mxu1 %v13106_v29 }
 0x4b0   : > { %8106 = vmatpush3.bf16.msra.mxu0 %v8332_v63 }
 0x4b1   : > { %8107 = vmatprep.subr.bf16.mxu0 %v13106_v29 }
 0x4b2   : > { %8088 = vmatpush3.bf16.msra.mxu1 %v8333_v6 }
 0x4b3   : > { %8089 = vmatprep.subr.bf16.mxu1 %v13106_v29 }
 0x4b4   : > { %8108 = vmatpush3.bf16.msra.mxu0 %v8334_v5 }
 0x4b5   : > { %8109 = vmatprep.subr.bf16.mxu0 %v13106_v29 }
 0x4b6   : > { %8090 = vmatpush3.bf16.msra.mxu1 %v8335_v16 }
 0x4b7   : > { %8091 = vmatprep.subr.bf16.mxu1 %v13106_v29 }
 0x4b8   : > { %8110 = vmatpush3.bf16.msra.mxu0 %v8336_v56 }
 0x4b9   : > { %8111 = vmatprep.subr.bf16.mxu0 %v13106_v29 }
 0x4ba   : > { %8092 = vmatpush3.bf16.msra.mxu1 %v8337_v54 }
 0x4bb   : > { %8093 = vmatprep.subr.bf16.mxu1 %v13106_v29 }
 0x4bc   : > { %8112 = vmatpush3.bf16.msra.mxu0 %v8338_v53 }
 0x4bd   : > { %8113 = vmatprep.subr.bf16.mxu0 %v13106_v29 }
 0x4be   : > { %8094 = vmatpush3.bf16.msra.mxu1 %v8339_v12 }
 0x4bf   : > { %8119 = vmatprep.subr.bf16.mxu1 %v13106_v29 }
 0x4c0   : > { %8114 = vmatpush3.bf16.msra.mxu0 %v8340_v2 }
 0x4c1   : > { %8096 = vmatmul.mubr.bf16.vlgmr.msra.gmra.mrb[72].mxu1 %v6099_v59  ;;  %8139 = vmatprep.subr.bf16.mxu0 %v13106_v29 }
 0x4c2   : > { %8120 = vmatpush3.bf16.msra.mxu1 %v8341_v13  ;;  %8135 = vmatprep.mubr.msk.bf16.mxu1 %vm12947_vm7, %v13106_v29 }
 0x4c3   : > { %8116 = vmatmul.mubr.bf16.vlgmr.msra.gmra.mrb[68].mxu0 %v6100_v31  ;;  %8121 = vmatprep.subr.bf16.mxu1 %v13106_v29 }
 0x4c4   : > { %8140 = vmatpush3.bf16.msra.mxu0 %v8342_v4  ;;  %8155 = vmatprep.mubr.msk.bf16.mxu0 %vm12947_vm7, %v13106_v29 }
 0x4c5   : > { %8141 = vmatprep.subr.bf16.mxu0 %v13106_v29 }
 0x4c6   : > { %8122 = vmatpush3.bf16.msra.mxu1 %v8343_v23 }
 0x4c7   : > { %8123 = vmatprep.subr.bf16.mxu1 %v13106_v29 }
 0x4c8   : > { %8142 = vmatpush3.bf16.msra.mxu0 %v8344_v20 }
 0x4c9   : > { %8143 = vmatprep.subr.bf16.mxu0 %v13106_v29 }
 0x4ca   : > { %8124 = vmatpush3.bf16.msra.mxu1 %v8345_v35 }
 0x4cb   : > { %8125 = vmatprep.subr.bf16.mxu1 %v13106_v29 }
 0x4cc   : > { %8144 = vmatpush3.bf16.msra.mxu0 %v8346_v14 }
 0x4cd   : > { %8145 = vmatprep.subr.bf16.mxu0 %v13106_v29 }
 0x4ce   : > { %8126 = vmatpush3.bf16.msra.mxu1 %v8347_v37 }
 0x4cf   : > { %8127 = vmatprep.subr.bf16.mxu1 %v13106_v29 }
 0x4d0   : > { %8146 = vmatpush3.bf16.msra.mxu0 %v8348_v49 }
 0x4d1   : > { %8147 = vmatprep.subr.bf16.mxu0 %v13106_v29 }
 0x4d2   : > { %8128 = vmatpush3.bf16.msra.mxu1 %v8349_v18 }
 0x4d3   : > { %8129 = vmatprep.subr.bf16.mxu1 %v13106_v29 }
 0x4d4   : > { %8148 = vmatpush3.bf16.msra.mxu0 %v8350_v15 }
 0x4d5   : > { %8149 = vmatprep.subr.bf16.mxu0 %v13106_v29 }
 0x4d6   : > { %8130 = vmatpush3.bf16.msra.mxu1 %v8351_v0 }
 0x4d7   : > { %8131 = vmatprep.subr.bf16.mxu1 %v13106_v29 }
 0x4d8   : > { %8150 = vmatpush3.bf16.msra.mxu0 %v8352_v7 }
 0x4d9   : > { %8151 = vmatprep.subr.bf16.mxu0 %v13106_v29 }
 0x4da   : > { %8132 = vmatpush3.bf16.msra.mxu1 %v8353_v58 }
 0x4db   : > { %8133 = vmatprep.subr.bf16.mxu1 %v13106_v29 }
 0x4dc   : > { %8152 = vmatpush3.bf16.msra.mxu0 %v8354_v44 }
 0x4dd   : > { %8153 = vmatprep.subr.bf16.mxu0 %v13106_v29 }
 0x4de   : > { %8134 = vmatpush3.bf16.msra.mxu1 %v8355_v8 }
 0x4df   : > { %8159 = vmatprep.subr.bf16.mxu1 %v13106_v29 }
 0x4e0   : > { %8154 = vmatpush3.bf16.msra.mxu0 %v8356_v42 }
 0x4e1   : > { %8136 = vmatmul.mubr.bf16.vlgmr.msra.gmra.mrb[76].mxu1 %v6101_v10  ;;  %8179 = vmatprep.subr.bf16.mxu0 %v13106_v29 }
 0x4e2   : > { %8160 = vmatpush3.bf16.msra.mxu1 %v8357_v61  ;;  %8175 = vmatprep.mubr.msk.bf16.mxu1 %vm12947_vm7, %v13106_v29 }
 0x4e3   : > { %8156 = vmatmul.mubr.bf16.vlgmr.msra.gmra.mrb[72].mxu0 %v6102_v36  ;;  %8161 = vmatprep.subr.bf16.mxu1 %v13106_v29 }
 0x4e4   : > { %8180 = vmatpush3.bf16.msra.mxu0 %v8358_v25  ;;  %8195 = vmatprep.mubr.msk.bf16.mxu0 %vm12947_vm7, %v13106_v29 }
 0x4e5   : > { %8181 = vmatprep.subr.bf16.mxu0 %v13106_v29 }
 0x4e6   : > { %8162 = vmatpush3.bf16.msra.mxu1 %v8359_v60 }
 0x4e7   : > { %8163 = vmatprep.subr.bf16.mxu1 %v13106_v29 }
 0x4e8   : > { %8182 = vmatpush3.bf16.msra.mxu0 %v8360_v19 }
 0x4e9   : > { %8183 = vmatprep.subr.bf16.mxu0 %v13106_v29 }
 0x4ea   : > { %8164 = vmatpush3.bf16.msra.mxu1 %v8361_v32 }
 0x4eb   : > { %8165 = vmatprep.subr.bf16.mxu1 %v13106_v29 }
 0x4ec   : > { %8184 = vmatpush3.bf16.msra.mxu0 %v8362_v21 }
 0x4ed   : > { %8185 = vmatprep.subr.bf16.mxu0 %v13106_v29 }
 0x4ee   : > { %8166 = vmatpush3.bf16.msra.mxu1 %v8363_v48 }
 0x4ef   : > { %8167 = vmatprep.subr.bf16.mxu1 %v13106_v29 }
 0x4f0   : > { %8186 = vmatpush3.bf16.msra.mxu0 %v8364_v38 }
 0x4f1   : > { %8187 = vmatprep.subr.bf16.mxu0 %v13106_v29 }
 0x4f2   : > { %8168 = vmatpush3.bf16.msra.mxu1 %v8365_v55 }
 0x4f3   : > { %8169 = vmatprep.subr.bf16.mxu1 %v13106_v29 }
 0x4f4   : > { %8188 = vmatpush3.bf16.msra.mxu0 %v8366_v47 }
 0x4f5   : > { %8189 = vmatprep.subr.bf16.mxu0 %v13106_v29 }
 0x4f6   : > { %8170 = vmatpush3.bf16.msra.mxu1 %v8367_v39 }
 0x4f7   : > { %8171 = vmatprep.subr.bf16.mxu1 %v13106_v29 }
 0x4f8   : > { %8190 = vmatpush3.bf16.msra.mxu0 %v8368_v40 }
 0x4f9   : > { %8191 = vmatprep.subr.bf16.mxu0 %v13106_v29 }
 0x4fa   : > { %8172 = vmatpush3.bf16.msra.mxu1 %v8369_v50 }
 0x4fb   : > { %8173 = vmatprep.subr.bf16.mxu1 %v13106_v29 }
 0x4fc   : > { %8192 = vmatpush3.bf16.msra.mxu0 %v8370_v41 }
 0x4fd   : > { %8193 = vmatprep.subr.bf16.mxu0 %v13106_v29 }
 0x4fe   : > { %8174 = vmatpush3.bf16.msra.mxu1 %v8371_v1 }
 0x500   : > { %8194 = vmatpush3.bf16.msra.mxu0 %v8372_v26 }
 0x501   : > { %8176 = vmatmul.mubr.bf16.vlgmr.msra.gmra.mrb[80].mxu1 %v6103_v22 }
 0x503   : > { %8196 = vmatmul.mubr.bf16.vlgmr.msra.gmra.mrb[76].mxu0 %v6104_v27 }
 0x504   : > { %8708 = shalt.err (!%p8705_p7)
}
 0x505   : > { %s8709_s0 = scalar_lea.hbm %s12474_s22, 128  ;;  %s8713_s3 = scalar_lea.hbm %s12591_s10, 512 }
 0x506   : > { %p8710_p8 = scmp.ne.s32.totalorder %s12474_s22, %s8709_s0  ;;  %p8714_p3 = scmp.lt.u32.totalorder %s12474_s22, %s12591_s10 }
 0x507   : > { %p8715_p6 = scmp.lt.u32.totalorder %s8713_s3, %s8709_s0  ;;  %p8717_p0 = scmp.lt.u32.totalorder %s8709_s0, %s12474_s22 }
 0x508   : > { %p8711_p13 = pnand %p8710_p8, %p13108_p2 }
 0x509   : > { %p8716_p12 = por %p8715_p6, %p8714_p3 }
 0x50a   : > { %p8712_p1 = pneg %p8711_p13 }
 0x50b   : > { %p8718_p9 = por %p8717_p0, %p8716_p12 }
 0x50d   : > { %p8719_p4 = pnand %p8718_p9, %p8712_p1 }
 0x50f   : > { %8722 = shalt.err (!%p8719_p4)
}
 0x510   : > { %8217 = dma.vmem_to_hbm [thread:$0]  (%p13108_p2), %s7003_s17, 128, %s12474_s22, %s12478_s19  }
 0x511   : > { %s12502_s12 = scalar_lea.hbm %s12592_s11, %s12468_s16  ;;  %s7015_s27 = sshll.u32 %s516_s24, 4  ;;  %s7016_s27 = int_to_ptr.vmem [resolvable:$true] %s7015_s27 }
 0x512   : > { %s8723_s14 = scalar_lea.vmem %s7016_s27, 128  ;;  %s8850_s30 = smov [#allocation10]  }
 0x513   : > { %p8724_p5 = scmp.ne.s32.totalorder %s7016_s27, %s8723_s14  ;;  %s8727_s13 = sshll.u32 %s8850_s30, 4  ;;  %s8728_s13 = int_to_ptr.vmem [resolvable:$false] %s8727_s13 }
 0x514   : > { %s8729_s21 = scalar_lea.vmem %s8728_s13, 256  ;;  %p8730_p7 = scmp.lt.s32.totalorder %s7016_s27, %s8728_s13 }
 0x515   : > { %p8725_p10 = pnand %p8724_p5, %p13108_p2  ;;  %p8731_p8 = scmp.lt.s32.totalorder %s8729_s21, %s8723_s14 }
 0x517   : > { %p8726_p11 = pneg %p8725_p10  ;;  %p8732_p13 = por %p8731_p8, %p8730_p7 }
 0x519   : > { %p8733_p1 = pnand %p8732_p13, %p8726_p11 }
 0x51b   : > { %8736 = shalt.err (!%p8733_p1)
}
 0x51c   : > { %s8737_s24 = scalar_lea.hbm %s12502_s12, 128  ;;  %s8741_s0 = scalar_lea.hbm %s12592_s11, 512 }
 0x51d   : > { %p8738_p3 = scmp.ne.s32.totalorder %s12502_s12, %s8737_s24  ;;  %p8742_p0 = scmp.lt.u32.totalorder %s12502_s12, %s12592_s11 }
 0x51e   : > { %p8743_p9 = scmp.lt.u32.totalorder %s8741_s0, %s8737_s24  ;;  %p8745_p5 = scmp.lt.u32.totalorder %s8737_s24, %s12502_s12 }
 0x51f   : > { %p8739_p6 = pnand %p8738_p3, %p13108_p2 }
 0x520   : > { %p8744_p4 = por %p8743_p9, %p8742_p0 }
 0x521   : > { %p8740_p12 = pneg %p8739_p6 }
 0x522   : > { %p8746_p10 = por %p8745_p5, %p8744_p4 }
 0x524   : > { %p8747_p11 = pnand %p8746_p10, %p8740_p12 }
 0x526   : > { %8750 = shalt.err (!%p8747_p11)
}
 0x527   : > { %8218 = dma.vmem_to_hbm [thread:$0]  (%p13108_p2), %s7016_s27, 128, %s12502_s12, %s12478_s19  }
 0x528   : > { %s502_s19 = scalar_lea.vmem [#allocation7], %s12338_s26  ;;  %s12535_s28 = scalar_lea.hbm %s12590_s9, %s12468_s16 }
 0x529   : > { %s6989_s3 = sshll.u32 %s502_s19, 4  ;;  %s6966_s26 = scalar_lea.sflag [#allocation4], %s9073_s25  ;;  %s12537_s3 = int_to_ptr.vmem [resolvable:$true] %s6989_s3 }
 0x52a   : > { %s8751_s5 = scalar_lea.vmem %s12537_s3, 128  ;;  %s8851_s12 = smov [#allocation7]  }
 0x52b   : > { %p8752_p7 = scmp.ne.s32.totalorder %s12537_s3, %s8751_s5  ;;  %s8755_s27 = sshll.u32 %s8851_s12, 4  ;;  %s8756_s27 = int_to_ptr.vmem [resolvable:$false] %s8755_s27 }
 0x52c   : > { %s8757_s16 = scalar_lea.vmem %s8756_s27, 256  ;;  %p8758_p1 = scmp.lt.s32.totalorder %s12537_s3, %s8756_s27 }
 0x52d   : > { %p8753_p8 = pnand %p8752_p7, %p13108_p2  ;;  %p8759_p3 = scmp.lt.s32.totalorder %s8757_s16, %s8751_s5 }
 0x52f   : > { %p8754_p13 = pneg %p8753_p8  ;;  %p8760_p6 = por %p8759_p3, %p8758_p1 }
 0x531   : > { %p8761_p12 = pnand %p8760_p6, %p8754_p13 }
 0x574   : > { %v6315_v29 = vpop.f32.mrb[68].mxu1 }
 0x575   : > { %v8057_v52 = vpop.f32.mrb[69].mxu1 }
 0x576   : > { %v6318_v43 = vpop.f32.mrb[70].mxu1  ;;  %v6403_v30 = vpop.f32.mrb[64].mxu0 }
 0x577   : > { %v6945_v3 = vrot.slane %v6403_v30, 7  ;;  %v8058_v33 = vpop.f32.mrb[71].mxu1  ;;  %v8077_v34 = vpop.f32.mrb[65].mxu0 }
 0x578   : > { %v6406_v24 = vpop.f32.mrb[66].mxu0 }
 0x579   : > { %v6946_v63 = vsel %vm6014_vm8, %v6945_v3, %v6315_v29  ;;  %v8078_v6 = vpop.f32.mrb[67].mxu0 }
 0x594   : > { %v6491_v5 = vpop.f32.mrb[72].mxu1 }
 0x595   : > { %v6947_v16 = vrot.slane %v6491_v5, 6  ;;  %v8097_v56 = vpop.f32.mrb[73].mxu1 }
 0x596   : > { %v6494_v54 = vpop.f32.mrb[74].mxu1  ;;  %v6579_v53 = vpop.f32.mrb[68].mxu0 }
 0x597   : > { %v6948_v12 = vsel %vm6016_vm9, %v6947_v16, %v6946_v63  ;;  %v6949_v51 = vrot.slane %v6579_v53, 5  ;;  %v8098_v2 = vpop.f32.mrb[75].mxu1  ;;  %v8117_v28 = vpop.f32.mrb[69].mxu0 }
 0x598   : > { %v6582_v13 = vpop.f32.mrb[70].mxu0 }
 0x599   : > { %v6950_v59 = vsel %vm6018_vm10, %v6949_v51, %v6948_v12  ;;  %v8118_v4 = vpop.f32.mrb[71].mxu0 }
 0x5b4   : > { %v6667_v31 = vpop.f32.mrb[76].mxu1 }
 0x5b5   : > { %v6951_v23 = vrot.slane %v6667_v31, 4  ;;  %v8137_v20 = vpop.f32.mrb[77].mxu1 }
 0x5b6   : > { %v6670_v35 = vpop.f32.mrb[78].mxu1  ;;  %v6755_v14 = vpop.f32.mrb[72].mxu0 }
 0x5b7   : > { %v6952_v37 = vsel %vm6020_vm11, %v6951_v23, %v6950_v59  ;;  %v6953_v49 = vrot.slane %v6755_v14, 3  ;;  %v8138_v18 = vpop.f32.mrb[79].mxu1  ;;  %v8157_v15 = vpop.f32.mrb[73].mxu0 }
 0x5b8   : > { %v6758_v57 = vpop.f32.mrb[74].mxu0 }
 0x5b9   : > { %v6954_v0 = vsel %vm6022_vm12, %v6953_v49, %v6952_v37  ;;  %v8158_v7 = vpop.f32.mrb[75].mxu0 }
 0x5d4   : > { %v6843_v45 = vpop.f32.mrb[80].mxu1 }
 0x5d5   : > { %v6955_v58 = vrot.slane %v6843_v45, 2  ;;  %v8177_v44 = vpop.f32.mrb[81].mxu1 }
 0x5d6   : > { %v6846_v62 = vpop.f32.mrb[82].mxu1  ;;  %v6931_v8 = vpop.f32.mrb[76].mxu0 }
 0x5d7   : > { %v6956_v11 = vsel %vm6024_vm13, %v6955_v58, %v6954_v0  ;;  %v6957_v42 = vrot.slane %v6931_v8, 1  ;;  %v8178_v9 = vpop.f32.mrb[83].mxu1  ;;  %v8197_v61 = vpop.f32.mrb[77].mxu0 }
 0x5d8   : > { %v6934_v10 = vpop.f32.mrb[78].mxu0 }
 0x5d9   : > { %v6958_v25 = vsel %vm6026_vm14, %v6957_v42, %v6956_v11  ;;  %v8198_v36 = vpop.f32.mrb[79].mxu0 }
 0x5da   : > { %6960 = vst [vmem:[%s502_s19] sm:$0xff] %v6958_v25 }
 0x5db   : > { %8764 = shalt.err (!%p8761_p12)
}
 0x5dc   : > { %s8765_s25 = scalar_lea.hbm %s12535_s28, 128  ;;  %s8769_s13 = scalar_lea.hbm %s12590_s9, 512 }
 0x5dd   : > { %p8766_p0 = scmp.ne.s32.totalorder %s12535_s28, %s8765_s25  ;;  %p8770_p5 = scmp.lt.u32.totalorder %s12535_s28, %s12590_s9 }
 0x5de   : > { %p8771_p10 = scmp.lt.u32.totalorder %s8769_s13, %s8765_s25  ;;  %p8773_p7 = scmp.lt.u32.totalorder %s8765_s25, %s12535_s28 }
 0x5df   : > { %p8767_p9 = pnand %p8766_p0, %p13108_p2 }
 0x5e0   : > { %p8772_p11 = por %p8771_p10, %p8770_p5 }
 0x5e1   : > { %p8768_p4 = pneg %p8767_p9 }
 0x5e2   : > { %p8774_p8 = por %p8773_p7, %p8772_p11 }
 0x5e4   : > { %p8775_p13 = pnand %p8774_p8, %p8768_p4 }
 0x5e6   : > { %8778 = shalt.err (!%p8775_p13)
}
 0x5e7   : > { %8216 = dma.vmem_to_hbm [thread:$0]  (%p13108_p2), %s12537_s3, 128, %s12535_s28, %s6966_s26  }
 0x5e8 PF: > { %s13109_s22 = sld [smem:[#allocation15_spill]]  ;;  %s13110_s17 = sld [smem:[#allocation19_spill]] }
 0x5e9   : > { %p8240_p1 = scmp.ge.s32.totalorder %s8825_s20, 2 }
 0x5ee   : > { %s7027_s0 = sand.u32 1, %s13109_s22   ;;  %p13111_p3 = scmp.ne.s32.totalorder %s13110_s17, 0 }
 0x5ef   : > { %s7028_s1 = scalar_lea.sflag [#allocation4], %s7027_s0 }
 0x5f0   : > { %p8230_p6 = pnand %p8240_p1, %p13111_p3 }
 0x5f2   : > { %8804 = dma.done.wait (!%p8230_p6), %s7028_s1, 128  }
 0x5f3   : > { %8806 = vsyncadd (!%p8230_p6), %s7028_s1, 4294967168  ;;  %s13112_s2 = sadd.s32 4294967294, %s8825_s20  }
 0x5f4   : > { %s7036_s19 = sand.u32 1, %s13112_s2  }
 0x5f5   : > { %s7037_s15 = scalar_lea.sflag [#allocation9], %s7036_s19 }
 0x5f6   : > { %8808 = dma.done.wait (!%p8230_p6), %s7037_s15, 256  }
 0x5f7   : > { %8810 = vsyncadd (!%p8230_p6), %s7037_s15, 4294967040  ;;  %s13113_s20 = sld [smem:[#allocation17_spill]]  ;;  %s13114_s29 = sld [smem:[#allocation16_spill]] }
 0x5f8   : > { %s13115_s19 = sld [smem:[#allocation18_spill]]  ;;  %s13116_s17 = smov %s8817_s18 }
 0x5fd   : > { %p31_p2 = scmp.ge.s32.totalorder %s13113_s20, 6   ;;  %s13117_s18 = smov %s13114_s29 }
 0x5ff   :  { %33 = sbr.rel (!%p31_p2) target bundleno = 15 (0xf), region = 158 }
 0x606   :  { %7051 = vsyncpa [#allocation3], 1 }
 0x607   :  { %7053 = vsyncpa [#allocation3 + $0x1], 1 }
 0x608   :  { %7054 = vsyncpa [#allocation6], 1 }
 0x609   :  { %7056 = vsyncpa [#allocation6 + $0x1], 1 }
 0x60a   :  { %7057 = vsyncpa [#allocation4], 1 }
 0x60b   :  { %7059 = vsyncpa [#allocation4 + $0x1], 1 }
 0x60c   :  { %7060 = vsyncpa [#allocation9], 1 }
 0x60d   :  { %7062 = vsyncpa [#allocation9 + $0x1], 1 }

</bundles_post_ra>
